<compile_context>
chip_gen: v6e
topology: v6e:2x2x1
jax: 0.10.0
libtpu: 0.0.40
codegen_flags: <defaults>
</compile_context>

<pallas_src>
import jax
import jax.numpy as jnp
from jax.experimental import pallas as pl
from jax.experimental.pallas import tpu as pltpu


def bn_relu_kernel(x_ref, gamma_ref, beta_ref, o_ref):
    # x_ref / o_ref: (N, Cb, HW);  gamma_ref / beta_ref: (Cb, 1).
    n, cb, hw = x_ref.shape
    inv_count = 1.0 / float(n * hw)

    # Pass 1: per-channel mean (lane reduce, then tiny cross-batch add).
    x = x_ref[...].astype(jnp.float32)
    s = jnp.sum(x, axis=2, keepdims=True)                    # (N, Cb, 1)
    mean = jnp.sum(s, axis=0, keepdims=True) * inv_count     # (1, Cb, 1)

    # Pass 2: per-channel biased variance (two-pass: numerically safe, and the
    # block is already VMEM-resident so re-reading x costs no HBM traffic).
    x = x_ref[...].astype(jnp.float32)
    centered = x - mean
    ss = jnp.sum(centered * centered, axis=2, keepdims=True)
    var = jnp.sum(ss, axis=0, keepdims=True) * inv_count     # (1, Cb, 1)

    inv_std = jax.lax.rsqrt(var + 1e-5)
    gamma = gamma_ref[...].reshape(1, cb, 1)
    beta = beta_ref[...].reshape(1, cb, 1)
    scale = inv_std * gamma                                  # (1, Cb, 1)
    bias = beta - mean * scale                               # (1, Cb, 1)

    # Pass 3: normalize + affine + ReLU -> one mul + add + max per element.
    x = x_ref[...].astype(jnp.float32)
    y = x * scale + bias
    o_ref[...] = jnp.maximum(y, 0.0).astype(o_ref.dtype)


def _tensorcores_per_chip():
    """Heuristic TC-per-chip count (v7x / v4 megacore parts have 2)."""
    try:
        kind = jax.devices()[0].device_kind.lower()
    except Exception:
        return 1
    if "v7" in kind or "v4" in kind:
        return 2
    return 1


def _pick_channel_block(C, per_channel_bytes, sublane_mult, n_cores):
    """Pick the channel block Cb (a divisor of C) such that:
       - Cb is a multiple of the sublane packing (or Cb == C),
       - double-buffered in+out blocks stay under a conservative VMEM budget,
       - the grid C//Cb is a multiple of n_cores with >= 2 blocks per core when
         possible (so each core overlaps DMA of block i+1 with compute of i),
       preferring the largest such Cb (fewest grid steps)."""
    budget = 24 * 2**20  # 2 arrays x 2 buffers per block, safe under v7x VMEM
    divisors = [d for d in range(1, C + 1) if C % d == 0]
    valid = [d for d in divisors
             if (d % sublane_mult == 0 or d == C)
             and 4 * d * per_channel_bytes <= budget]
    if not valid:
        # TODO(synk): add a second ("arbitrary") grid axis over the flattened
        # batch*spatial dim with VMEM sum/sumsq accumulators + a revisit pass
        # for shapes where even one channel-row block exceeds the VMEM budget.
        valid = [min(d for d in divisors if d % sublane_mult == 0 or d == C)]
    target = 2 * n_cores
    for cb in sorted(valid, reverse=True):
        blocks = C // cb
        if blocks % n_cores == 0 and blocks >= target:
            return cb
    for cb in sorted(valid, reverse=True):
        if (C // cb) % n_cores == 0:
            return cb
    return max(valid)


def batchnorm_relu(x_nchw, gamma, beta):
    """Training-mode BatchNorm2d (eps=1e-5, affine) + ReLU.
    x_nchw: (N, C, H, W); gamma/beta: (C,)."""
    N, C, H, W = x_nchw.shape
    HW = H * W

    # Free reshape only -- no transpose, no extra HBM traffic, any N.
    x3 = x_nchw.reshape(N, C, HW)
    g = gamma.reshape(C, 1).astype(jnp.float32)
    b = beta.reshape(C, 1).astype(jnp.float32)

    itemsize = jnp.dtype(x_nchw.dtype).itemsize
    sublane_mult = 8 if itemsize >= 4 else (16 if itemsize == 2 else 32)
    n_cores = _tensorcores_per_chip()
    per_channel_bytes = N * HW * itemsize
    Cb = _pick_channel_block(C, per_channel_bytes, sublane_mult, n_cores)
    grid = (C // Cb,)

    # Explicit VMEM accounting: in+out double-buffered blocks + padded affine
    # params + headroom for compiler temporaries.
    block_bytes = Cb * per_channel_bytes
    vmem_est = 4 * block_bytes + 8 * Cb * 128 * 4 + (4 << 20)
    vmem_limit = int(min(max(vmem_est, 16 << 20), 60 << 20))

    total = N * C * HW
    cost = pl.CostEstimate(
        flops=7 * total,                       # sum, centered sq, mul+add+max
        transcendentals=C,                     # one rsqrt per channel
        bytes_accessed=2 * total * itemsize + 2 * C * 4,
    )

    out3 = pl.pallas_call(
        bn_relu_kernel,
        out_shape=jax.ShapeDtypeStruct((N, C, HW), x_nchw.dtype),
        grid_spec=pltpu.PrefetchScalarGridSpec(
            num_scalar_prefetch=0,
            grid=grid,
            in_specs=[
                pl.BlockSpec((N, Cb, HW), lambda i: (0, i, 0)),
                pl.BlockSpec((Cb, 1), lambda i: (i, 0)),
                pl.BlockSpec((Cb, 1), lambda i: (i, 0)),
            ],
            out_specs=pl.BlockSpec((N, Cb, HW), lambda i: (0, i, 0)),
        ),
        compiler_params=pltpu.CompilerParams(
            dimension_semantics=("parallel",),
            vmem_limit_bytes=vmem_limit,
        ),
        cost_estimate=cost,
    )(x3, g, b)

    return out3.reshape(N, C, H, W)


def _reference(x, gamma, beta, eps=1e-5):
    xr = x.astype(jnp.float32)
    mean = jnp.mean(xr, axis=(0, 2, 3), keepdims=True)
    var = jnp.mean((xr - mean) ** 2, axis=(0, 2, 3), keepdims=True)
    y = (xr - mean) * jax.lax.rsqrt(var + eps)
    y = y * gamma.reshape(1, -1, 1, 1) + beta.reshape(1, -1, 1, 1)
    return jnp.maximum(y, 0.0)


if __name__ == "__main__":
    key = jax.random.PRNGKey(0)
    kx, kg, kb, kx2 = jax.random.split(key, 4)

    # Module shape: x129 = torch.randn([1, 480, 28, 28]).
    N, C, H, W = 1, 480, 28, 28
    x = jax.random.normal(kx, (N, C, H, W), dtype=jnp.float32)
    gamma = 1.0 + 0.1 * jax.random.normal(kg, (C,), dtype=jnp.float32)
    beta = 0.1 * jax.random.normal(kb, (C,), dtype=jnp.float32)

    out = jax.block_until_ready(batchnorm_relu(x, gamma, beta))
    ref = _reference(x, gamma, beta)
    assert out.shape == (N, C, H, W)
    assert jnp.max(jnp.abs(out - ref)) < 1e-4

    # Small N > 1 case to exercise the (now transpose-free) batched path.
    N2, C2, H2, W2 = 2, 32, 8, 8
    x2 = jax.random.normal(kx2, (N2, C2, H2, W2), dtype=jnp.float32)
    g2, b2 = gamma[:C2], beta[:C2]
    out2 = jax.block_until_ready(batchnorm_relu(x2, g2, b2))
    ref2 = _reference(x2, g2, b2)
    assert out2.shape == (N2, C2, H2, W2)
    assert jnp.max(jnp.abs(out2 - ref2)) < 1e-4

    print("KERNEL_OK")
</pallas_src>

<mosaic_0001>
module attributes {stable_mosaic.version = 11 : i64} {
  func.func @bn_relu_kernel(%arg0: i32, %arg1: memref<1x240x784xf32, #tpu.memory_space<vmem>>, %arg2: memref<240x1xf32, #tpu.memory_space<vmem>>, %arg3: memref<240x1xf32, #tpu.memory_space<vmem>>, %arg4: memref<1x240x784xf32, #tpu.memory_space<vmem>>) attributes {dimension_semantics = [#tpu.dimension_semantics<parallel>], iteration_bounds = array<i64: 2>, scalar_prefetch = 0 : i64, scratch_operands = 0 : i64, tpu.core_type = #tpu.core_type<tc>, window_params = [{transform_indices = @transform_0, window_bounds = array<i64: 1, 240, 784>}, {transform_indices = @transform_1, window_bounds = array<i64: 240, 1>}, {transform_indices = @transform_2, window_bounds = array<i64: 240, 1>}, {transform_indices = @transform_3, window_bounds = array<i64: 1, 240, 784>}]} {
    %c0 = arith.constant 0 : index
    %c0_0 = arith.constant 0 : index
    %c0_1 = arith.constant 0 : index
    %0 = vector.load %arg1[%c0, %c0_0, %c0_1] : memref<1x240x784xf32, #tpu.memory_space<vmem>>, vector<1x240x784xf32>
    %cst = arith.constant dense<0.000000e+00> : vector<1x240xf32>
    %1 = vector.multi_reduction <add>, %0, %cst [2] : vector<1x240x784xf32> to vector<1x240xf32>
    %2 = vector.shape_cast %1 : vector<1x240xf32> to vector<1x240x1xf32>
    %cst_2 = arith.constant dense<0.000000e+00> : vector<240x1xf32>
    %3 = vector.multi_reduction <add>, %2, %cst_2 [0] : vector<1x240x1xf32> to vector<240x1xf32>
    %4 = vector.shape_cast %3 : vector<240x1xf32> to vector<1x240x1xf32>
    %cst_3 = arith.constant 0.00127551018 : f32
    %5 = vector.broadcast %cst_3 : f32 to vector<1x240x1xf32>
    %6 = arith.mulf %4, %5 : vector<1x240x1xf32>
    %c0_4 = arith.constant 0 : index
    %c0_5 = arith.constant 0 : index
    %c0_6 = arith.constant 0 : index
    %7 = vector.load %arg1[%c0_4, %c0_5, %c0_6] : memref<1x240x784xf32, #tpu.memory_space<vmem>>, vector<1x240x784xf32>
    %8 = vector.broadcast %6 : vector<1x240x1xf32> to vector<1x240x784xf32>
    %9 = arith.subf %7, %8 : vector<1x240x784xf32>
    %10 = arith.mulf %9, %9 : vector<1x240x784xf32>
    %cst_7 = arith.constant dense<0.000000e+00> : vector<1x240xf32>
    %11 = vector.multi_reduction <add>, %10, %cst_7 [2] : vector<1x240x784xf32> to vector<1x240xf32>
    %12 = vector.shape_cast %11 : vector<1x240xf32> to vector<1x240x1xf32>
    %cst_8 = arith.constant dense<0.000000e+00> : vector<240x1xf32>
    %13 = vector.multi_reduction <add>, %12, %cst_8 [0] : vector<1x240x1xf32> to vector<240x1xf32>
    %14 = vector.shape_cast %13 : vector<240x1xf32> to vector<1x240x1xf32>
    %cst_9 = arith.constant 0.00127551018 : f32
    %15 = vector.broadcast %cst_9 : f32 to vector<1x240x1xf32>
    %16 = arith.mulf %14, %15 : vector<1x240x1xf32>
    %cst_10 = arith.constant 9.99999974E-6 : f32
    %17 = vector.broadcast %cst_10 : f32 to vector<1x240x1xf32>
    %18 = arith.addf %16, %17 : vector<1x240x1xf32>
    %19 = math.rsqrt %18 : vector<1x240x1xf32>
    %c0_11 = arith.constant 0 : index
    %c0_12 = arith.constant 0 : index
    %20 = vector.load %arg2[%c0_11, %c0_12] : memref<240x1xf32, #tpu.memory_space<vmem>>, vector<240x1xf32>
    %21 = vector.shape_cast %20 : vector<240x1xf32> to vector<1x240x1xf32>
    %c0_13 = arith.constant 0 : index
    %c0_14 = arith.constant 0 : index
    %22 = vector.load %arg3[%c0_13, %c0_14] : memref<240x1xf32, #tpu.memory_space<vmem>>, vector<240x1xf32>
    %23 = vector.shape_cast %22 : vector<240x1xf32> to vector<1x240x1xf32>
    %24 = arith.mulf %19, %21 : vector<1x240x1xf32>
    %25 = arith.mulf %6, %24 : vector<1x240x1xf32>
    %26 = arith.subf %23, %25 : vector<1x240x1xf32>
    %c0_15 = arith.constant 0 : index
    %c0_16 = arith.constant 0 : index
    %c0_17 = arith.constant 0 : index
    %27 = vector.load %arg1[%c0_15, %c0_16, %c0_17] : memref<1x240x784xf32, #tpu.memory_space<vmem>>, vector<1x240x784xf32>
    %28 = vector.broadcast %24 : vector<1x240x1xf32> to vector<1x240x784xf32>
    %29 = arith.mulf %27, %28 : vector<1x240x784xf32>
    %30 = vector.broadcast %26 : vector<1x240x1xf32> to vector<1x240x784xf32>
    %31 = arith.addf %29, %30 : vector<1x240x784xf32>
    %cst_18 = arith.constant 0.000000e+00 : f32
    %32 = vector.broadcast %cst_18 : f32 to vector<1x240x784xf32>
    %33 = arith.maximumf %31, %32 : vector<1x240x784xf32>
    %c0_19 = arith.constant 0 : index
    %c0_20 = arith.constant 0 : index
    %c0_21 = arith.constant 0 : index
    %34 = vector.load %arg4[%c0_19, %c0_20, %c0_21] : memref<1x240x784xf32, #tpu.memory_space<vmem>>, vector<1x240x784xf32>
    tpu.vector_store %arg4[%c0_19, %c0_20, %c0_21], %33 {strides = array<i32>} : memref<1x240x784xf32, #tpu.memory_space<vmem>>, vector<1x240x784xf32>,
    return
  }
  func.func @transform_0(%arg0: i32) -> (i32, i32, i32) {
    %c0_i32 = arith.constant 0 : i32
    %c0_i32_0 = arith.constant 0 : i32
    %c0_i32_1 = arith.constant 0 : i32
    return %c0_i32, %arg0, %c0_i32_0 : i32, i32, i32
  }
  func.func @transform_1(%arg0: i32) -> (i32, i32) {
    %c0_i32 = arith.constant 0 : i32
    %c0_i32_0 = arith.constant 0 : i32
    return %arg0, %c0_i32 : i32, i32
  }
  func.func @transform_2(%arg0: i32) -> (i32, i32) {
    %c0_i32 = arith.constant 0 : i32
    %c0_i32_0 = arith.constant 0 : i32
    return %arg0, %c0_i32 : i32, i32
  }
  func.func @transform_3(%arg0: i32) -> (i32, i32, i32) {
    %c0_i32 = arith.constant 0 : i32
    %c0_i32_0 = arith.constant 0 : i32
    %c0_i32_1 = arith.constant 0 : i32
    return %c0_i32, %arg0, %c0_i32_0 : i32, i32, i32
  }
}

</mosaic_0001>

<bundles_post_ra>
// kernel: tpu_custom_call.1
= control target key start
LH: loop header
LB: loop body
LE: loop exit
PB: predicated region body
PF: predicated region fallthrough
CT: control target
= control target key end

     0   :  { %s3441_s12 = smov 0   ;;  %s5976_s0 = inlined_call_operand.vmem [shape: f32[1,480,784], index: 0, kind: input, shape index: {}]   ;;  %s5977_s1 = inlined_call_operand.vmem [shape: f32[480,1], index: 1, kind: input, shape index: {}]   ;;  %s5978_s2 = inlined_call_operand.vmem [shape: f32[480,1], index: 2, kind: input, shape index: {}]   ;;  %s5979_s3 = inlined_call_operand.vmem [shape: f32[1,480,784], index: 3, kind: output, shape index: {}]  }
   0x1 LB: > { %s2946_s13 = sadd.s32 4294967295, %s3418_s12   ;;  %p2950_p0 = scmp.ge.s32.totalorder %s3418_s12, 1  ;;  %s3418_s12 = sphi %s3441_s12, %s13_s12  }
   0x2   : > { %p161_p1 = scmp.lt.s32.totalorder %s3418_s12, 3 }
   0x4   : > { %p162_p2 = pnand %p2950_p0, %p161_p1 }
   0x6   : > { %165 = sbr.rel (%p162_p2) target bundleno = 759 (0x2f7), region = 32 }
   0xb   : > { %s197_s14 = smul.u32 30, %s2946_s13  ;;  %vm438_vm0 = vcmask 130048  }
   0xd   : > { %p198_p3 = scmp.lt.s32.totalorder %s197_s14, 59 }
   0xf   : > { %s6344_s14 = smov (!%p198_p3, %s197_s14), 59 }
  0x10   : > { %s2957_s15 = smul.u32 56, %s6344_s14  ;;  %s2952_s19 = sshll.u32 %s6344_s14, 3 }
  0x11   : > { %s4324_s22 = scalar_lea.vmem %s5977_s1, %s2952_s19  ;;  %s4331_s25 = scalar_lea.vmem %s5978_s2, %s2952_s19 }
  0x12   : > { %s3457_s18 = scalar_lea.vmem %s5976_s0, %s2957_s15  ;;  %s5489_s28 = scalar_lea.vmem %s5979_s3, %s2957_s15 }
  0x13   : > { %v3460_v0 = vld [vmem:[%s3457_s18 + $0x70] sm:$0xff]  ;;  %v3463_v1 = vld [vmem:[%s3457_s18 + $0x78] sm:$0xff]  ;;  %v3466_v2 = vld [vmem:[%s3457_s18 + $0x80] sm:$0xff] }
  0x14   : > { %v452_v3 = vadd.f32 %v3463_v1, %v3460_v0  ;;  %v3471_v4 = vld [vmem:[%s3457_s18 + $0x88] sm:$0xff]  ;;  %v3474_v5 = vld [vmem:[%s3457_s18] sm:$0xff]  ;;  %v3480_v7 = vld [vmem:[%s3457_s18 + $0x90] sm:$0xff] }
  0x15   : > { %v3477_v6 = vld [vmem:[%s3457_s18 + $0x8] sm:$0xff]  ;;  %v3484_v9 = vld [vmem:[%s3457_s18 + $0x10] sm:$0xff]  ;;  %v3489_v11 = vld [vmem:[%s3457_s18 + $0x98] sm:$0xff] }
  0x16   : > { %v453_v8 = vadd.f32 %v452_v3, %v3466_v2  ;;  %v433_v10 = vadd.f32 %v3477_v6, %v3474_v5  ;;  %v3492_v12 = vld [vmem:[%s3457_s18 + $0x18] sm:$0xff]  ;;  %v3495_v13 = vld [vmem:[%s3457_s18 + $0xa8] sm:$0xff]  ;;  %v3498_v14 = vld [vmem:[%s3457_s18 + $0xa0] sm:$0xff] }
  0x17   : > { %v3503_v17 = vld [vmem:[%s3457_s18 + $0xb0] sm:$0xff]  ;;  %v3506_v18 = vld [vmem:[%s3457_s18 + $0xb8] sm:$0xff]  ;;  %v3509_v19 = vld [vmem:[%s3457_s18 + $0x20] sm:$0xff]  ;;  %v457_v28 = vsel %vm438_vm0, %v3498_v14, 0.0 }
  0x18   : > { %v454_v15 = vadd.f32 %v453_v8, %v3471_v4  ;;  %v434_v16 = vadd.f32 %v433_v10, %v3484_v9  ;;  %v3512_v20 = vld [vmem:[%s3457_s18 + $0x30] sm:$0xff]  ;;  %v3515_v21 = vld [vmem:[%s3457_s18 + $0xc0] sm:$0xff]  ;;  %v461_v22 = vadd.f32 %v3503_v17, %v3495_v13  ;;  %v3522_v25 = vld [vmem:[%s3457_s18 + $0x38] sm:$0xff] }
  0x19   : > { %v3525_v26 = vld [vmem:[%s3457_s18 + $0x40] sm:$0xff]  ;;  %v3528_v27 = vld [vmem:[%s3457_s18 + $0x48] sm:$0xff]  ;;  %v3544_v35 = vld [vmem:[%s3457_s18 + $0xd0] sm:$0xff]  ;;  %v439_v39 = vsel %vm438_vm0, %v3512_v20, 0.0 }
  0x1a   : > { %v455_v23 = vadd.f32 %v454_v15, %v3480_v7  ;;  %v435_v24 = vadd.f32 %v434_v16, %v3492_v12  ;;  %v3533_v29 = vld [vmem:[%s3457_s18 + $0x28] sm:$0xff]  ;;  %v462_v31 = vadd.f32 %v461_v22, %v3506_v18  ;;  %v443_v32 = vadd.f32 %v3525_v26, %v3522_v25  ;;  %v3547_v36 = vld [vmem:[%s3457_s18 + $0x50] sm:$0xff]  ;;  %v3550_v37 = vld [vmem:[%s3457_s18 + $0xe0] sm:$0xff] }
  0x1b   : > { %v3536_v30 = vld [vmem:[%s3457_s18 + $0xc8] sm:$0xff]  ;;  %v3558_v40 = vld [vmem:[%s3457_s18 + $0xd8] sm:$0xff]  ;;  %v3566_v44 = vld [vmem:[%s3457_s18 + $0xf0] sm:$0xff] }
  0x1c   : > { %v456_v33 = vadd.f32 %v455_v23, %v3489_v11  ;;  %v436_v34 = vadd.f32 %v435_v24, %v3509_v19  ;;  %v3553_v38 = vld [vmem:[%s3457_s18 + $0xe8] sm:$0xff]  ;;  %v463_v41 = vadd.f32 %v462_v31, %v3515_v21  ;;  %v3562_v42 = vld [vmem:[%s3457_s18 + $0x58] sm:$0xff]  ;;  %v444_v43 = vadd.f32 %v443_v32, %v3528_v27  ;;  %v3572_v48 = vld [vmem:[%s3457_s18 + $0x60] sm:$0xff] }
  0x1d   : > { %v470_v45 = vadd.f32 %v3553_v38, %v3550_v37  ;;  %v3575_v49 = vld [vmem:[%s3457_s18 + $0xf8] sm:$0xff]  ;;  %v3580_v52 = vld [vmem:[%s3457_s18 + $0x68] sm:$0xff]  ;;  %v259_v55 = vld [vmem:[%s3457_s18 + $0x120] sm:$0xff]  ;;  %v466_v58 = vsel %vm438_vm0, %v3558_v40, 0.0 }
  0x1e   : > { %v458_v46 = vadd.f32 %v457_v28, %v456_v33  ;;  %v437_v47 = vadd.f32 %v436_v34, %v3533_v29  ;;  %v258_v50 = vld [vmem:[%s3457_s18 + $0x118] sm:$0xff]  ;;  %v464_v51 = vadd.f32 %v463_v41, %v3536_v30  ;;  %v445_v53 = vadd.f32 %v444_v43, %v3547_v36  ;;  %v260_v56 = vld [vmem:[%s3457_s18 + $0x128] sm:$0xff]  ;;  %v3589_v59 = vld [vmem:[%s3457_s18 + $0x100] sm:$0xff] }
  0x1f   : > { %v471_v54 = vadd.f32 %v470_v45, %v3566_v44  ;;  %v3592_v60 = vld [vmem:[%s3457_s18 + $0x110] sm:$0xff]  ;;  %v479_v62 = vadd.f32 %v259_v55, %v258_v50  ;;  %v266_v15 = vld [vmem:[%s3457_s18 + $0x158] sm:$0xff]  ;;  %v267_v16 = vld [vmem:[%s3457_s18 + $0x160] sm:$0xff]  ;;  %v448_v22 = vsel %vm438_vm0, %v3580_v52, 0.0 }
  0x20   : > { %459 = vadd.xlane.f32.xlu1 %v458_v46  ;;  %v440_v57 = vadd.f32 %v439_v39, %v437_v47  ;;  %v261_v61 = vld [vmem:[%s3457_s18 + $0x130] sm:$0xff]  ;;  %v465_v63 = vadd.f32 %v464_v51, %v3544_v35  ;;  %v446_v3 = vadd.f32 %v445_v53, %v3562_v42  ;;  %v3604_v23 = vld [vmem:[%s3457_s18 + $0x108] sm:$0xff]  ;;  %v3607_v24 = vld [vmem:[%s3457_s18 + $0x138] sm:$0xff]  ;;  %v475_v46 = vsel %vm438_vm0, %v3592_v60, 0.0 }
  0x21   : > { %v472_v8 = vadd.f32 %v471_v54, %v3575_v49  ;;  %v265_v10 = vld [vmem:[%s3457_s18 + $0x150] sm:$0xff]  ;;  %5991 = vst [vmem:[#allocation2_spill] sm:$0xff] %v3604_v23  ;;  %5992 = vst [vmem:[#allocation3_spill] sm:$0xff] %v3607_v24  ;;  %v480_v28 = vadd.f32 %v479_v62, %v260_v56  ;;  %v263_v39 = vld [vmem:[%s3457_s18 + $0x140] sm:$0xff] }
  0x22   : > { %441 = vadd.xlane.f32.xlu0 %v440_v57  ;;  %v488_v31 = vadd.f32 %v266_v15, %v265_v10  ;;  %v467_v32 = vadd.f32 %v466_v58, %v465_v63  ;;  %v447_v33 = vadd.f32 %v446_v3, %v3572_v48  ;;  %v268_v41 = vld [vmem:[%s3457_s18 + $0x168] sm:$0xff]  ;;  %v273_v45 = vld [vmem:[%s3457_s18 + $0x190] sm:$0xff]  ;;  %v274_v54 = vld [vmem:[%s3457_s18 + $0x198] sm:$0xff] }
  0x23   : > { %v473_v34 = vadd.f32 %v472_v8, %v3589_v59  ;;  %v272_v43 = vld [vmem:[%s3457_s18 + $0x188] sm:$0xff]  ;;  %v481_v50 = vadd.f32 %v480_v28, %v261_v61  ;;  %v269_v51 = vld [vmem:[%s3457_s18 + $0x170] sm:$0xff]  ;;  %v270_v58 = vld [vmem:[%s3457_s18 + $0x178] sm:$0xff] }
  0x24   : > { %v3618_v47 = vld [vmem:[%s3457_s18 + $0x148] sm:$0xff]  ;;  %v489_v53 = vadd.f32 %v488_v31, %v267_v16  ;;  %v497_v55 = vadd.f32 %v273_v45, %v272_v43  ;;  %468 = vadd.xlane.f32.xlu1 %v467_v32  ;;  %v449_v56 = vadd.f32 %v448_v22, %v447_v33  ;;  %v275_v62 = vld [vmem:[%s3457_s18 + $0x1a0] sm:$0xff]  ;;  %v281_v16 = vld [vmem:[%s3457_s18 + $0x1d0] sm:$0xff] }
  0x25   : > { %5993 = vst [vmem:[#allocation4_spill] sm:$0xff] %v3618_v47  ;;  %v474_v57 = vadd.f32 %v473_v34, %v3604_v23  ;;  %v279_v63 = vld [vmem:[%s3457_s18 + $0x1c0] sm:$0xff]  ;;  %v482_v3 = vadd.f32 %v481_v50, %v3607_v24  ;;  %v280_v15 = vld [vmem:[%s3457_s18 + $0x1c8] sm:$0xff]  ;;  %v484_v28 = vsel %vm438_vm0, %v3618_v47, 0.0  ;;  %v278_v32 = vld [vmem:[%s3457_s18 + $0x1b8] sm:$0xff] }
  0x26   : > { %v271_v8 = vld [vmem:[%s3457_s18 + $0x180] sm:$0xff]  ;;  %v490_v61 = vadd.f32 %v489_v53, %v268_v41  ;;  %v498_v10 = vadd.f32 %v497_v55, %v274_v54  ;;  %450 = vadd.xlane.f32.xlu0 %v449_v56  ;;  %v276_v31 = vld [vmem:[%s3457_s18 + $0x1a8] sm:$0xff]  ;;  %v282_v33 = vld [vmem:[%s3457_s18 + $0x1d8] sm:$0xff]  ;;  %v506_v34 = vadd.f32 %v280_v15, %v279_v63 }
  0x27   : > { %v476_v22 = vadd.f32 %v475_v46, %v474_v57  ;;  %v483_v43 = vadd.f32 %v482_v3, %v263_v39  ;;  %v286_v50 = vld [vmem:[%s3457_s18 + $0x1f8] sm:$0xff]  ;;  %v287_v53 = vld [vmem:[%s3457_s18 + $0x200] sm:$0xff]  ;;  %v288_v54 = vld [vmem:[%s3457_s18 + $0x208] sm:$0xff]  ;;  %v493_v46 = vsel %vm438_vm0, %v271_v8, 0.0  ;;  %v502_v8 = vsel %vm438_vm0, %v278_v32, 0.0 }
  0x28   : > { %v491_v41 = vadd.f32 %v490_v61, %v269_v51  ;;  %v499_v45 = vadd.f32 %v498_v10, %v275_v62  ;;  %v277_v55 = vld [vmem:[%s3457_s18 + $0x1b0] sm:$0xff]  ;;  %v283_v56 = vld [vmem:[%s3457_s18 + $0x1e0] sm:$0xff]  ;;  %v507_v57 = vadd.f32 %v506_v34, %v281_v16  ;;  %v515_v47 = vadd.f32 %v287_v53, %v286_v50  ;;  %v284_v39 = vld [vmem:[%s3457_s18 + $0x1e8] sm:$0xff] }
  0x29   : > { %v485_v24 = vadd.f32 %v484_v28, %v483_v43  ;;  %v289_v51 = vld [vmem:[%s3457_s18 + $0x210] sm:$0xff]  ;;  %v294_v3 = vld [vmem:[%s3457_s18 + $0x238] sm:$0xff]  ;;  %v295_v28 = vld [vmem:[%s3457_s18 + $0x240] sm:$0xff] }
  0x2a   : > { %v492_v63 = vadd.f32 %v491_v41, %v270_v58  ;;  %v500_v15 = vadd.f32 %v499_v45, %v276_v31  ;;  %v293_v62 = vld [vmem:[%s3457_s18 + $0x230] sm:$0xff]  ;;  %477 = vadd.xlane.f32.xlu0 %v476_v22  ;;  %v508_v10 = vadd.f32 %v507_v57, %v282_v33  ;;  %v290_v16 = vld [vmem:[%s3457_s18 + $0x218] sm:$0xff]  ;;  %v516_v34 = vadd.f32 %v515_v47, %v288_v54  ;;  %v291_v41 = vld [vmem:[%s3457_s18 + $0x220] sm:$0xff] }
  0x2b   : > { %v285_v61 = vld [vmem:[%s3457_s18 + $0x1f0] sm:$0xff]  ;;  %v524_v58 = vadd.f32 %v294_v3, %v293_v62  ;;  %486 = vadd.xlane.f32.xlu1 %v485_v24  ;;  %v296_v45 = vld [vmem:[%s3457_s18 + $0x248] sm:$0xff]  ;;  %v302_v47 = vld [vmem:[%s3457_s18 + $0x278] sm:$0xff] }
  0x2c   : > { %v494_v31 = vadd.f32 %v493_v46, %v492_v63  ;;  %v501_v43 = vadd.f32 %v500_v15, %v277_v55  ;;  %v300_v50 = vld [vmem:[%s3457_s18 + $0x268] sm:$0xff]  ;;  %v509_v22 = vadd.f32 %v508_v10, %v283_v56  ;;  %v517_v53 = vadd.f32 %v516_v34, %v289_v51  ;;  %v301_v57 = vld [vmem:[%s3457_s18 + $0x270] sm:$0xff]  ;;  %v299_v46 = vld [vmem:[%s3457_s18 + $0x260] sm:$0xff] }
  0x2d   : > { %v292_v32 = vld [vmem:[%s3457_s18 + $0x228] sm:$0xff]  ;;  %v525_v33 = vadd.f32 %v524_v58, %v295_v28  ;;  %v511_v24 = vsel %vm438_vm0, %v285_v61, 0.0  ;;  %v297_v62 = vld [vmem:[%s3457_s18 + $0x250] sm:$0xff]  ;;  %v303_v55 = vld [vmem:[%s3457_s18 + $0x280] sm:$0xff]  ;;  %v533_v63 = vadd.f32 %v301_v57, %v300_v50 }
  0x2e   : > { %v503_v54 = vadd.f32 %v502_v8, %v501_v43  ;;  %495 = vadd.xlane.f32.xlu0 %v494_v31  ;;  %v510_v56 = vadd.f32 %v509_v22, %v284_v39  ;;  %v518_v15 = vadd.f32 %v517_v53, %v290_v16  ;;  %v307_v3 = vld [vmem:[%s3457_s18 + $0x2a0] sm:$0xff]  ;;  %v308_v10 = vld [vmem:[%s3457_s18 + $0x2a8] sm:$0xff]  ;;  %v309_v34 = vld [vmem:[%s3457_s18 + $0x2b0] sm:$0xff]  ;;  %v520_v8 = vsel %vm438_vm0, %v292_v32, 0.0 }
  0x2f   : > { %v526_v51 = vadd.f32 %v525_v33, %v296_v45  ;;  %v298_v61 = vld [vmem:[%s3457_s18 + $0x258] sm:$0xff]  ;;  %v304_v28 = vld [vmem:[%s3457_s18 + $0x288] sm:$0xff]  ;;  %v534_v58 = vadd.f32 %v533_v63, %v302_v47  ;;  %v542_v31 = vadd.f32 %v308_v10, %v307_v3  ;;  %v305_v45 = vld [vmem:[%s3457_s18 + $0x290] sm:$0xff]  ;;  %v529_v33 = vsel %vm438_vm0, %v299_v46, 0.0 }
  0x30   : > { %504 = vadd.xlane.f32.xlu1 %v503_v54  ;;  %v512_v43 = vadd.f32 %v511_v24, %v510_v56  ;;  %v519_v39 = vadd.f32 %v518_v15, %v291_v41  ;;  %v310_v50 = vld [vmem:[%s3457_s18 + $0x2b8] sm:$0xff]  ;;  %v315_v53 = vld [vmem:[%s3457_s18 + $0x2e0] sm:$0xff]  ;;  %v316_v63 = vld [vmem:[%s3457_s18 + $0x2e8] sm:$0xff] }
  0x31   : > { %v527_v16 = vadd.f32 %v526_v51, %v297_v62  ;;  %v314_v22 = vld [vmem:[%s3457_s18 + $0x2d8] sm:$0xff]  ;;  %v535_v32 = vadd.f32 %v534_v58, %v303_v55  ;;  %v311_v54 = vld [vmem:[%s3457_s18 + $0x2c0] sm:$0xff]  ;;  %v543_v47 = vadd.f32 %v542_v31, %v309_v34  ;;  %v312_v56 = vld [vmem:[%s3457_s18 + $0x2c8] sm:$0xff] }
  0x32   : > { %v306_v57 = vld [vmem:[%s3457_s18 + $0x298] sm:$0xff]  ;;  %v551_v24 = vadd.f32 %v315_v53, %v314_v22  ;;  %513 = vadd.xlane.f32.xlu0 %v512_v43  ;;  %v521_v41 = vadd.f32 %v520_v8, %v519_v39  ;;  %v317_v15 = vld [vmem:[%s3457_s18 + $0x2f0] sm:$0xff]  ;;  %v323_v34 = vld [vmem:[%s3457_s18 + $0x320] sm:$0xff] }
  0x33   : > { %v528_v62 = vadd.f32 %v527_v16, %v298_v61  ;;  %v321_v51 = vld [vmem:[%s3457_s18 + $0x310] sm:$0xff]  ;;  %v536_v3 = vadd.f32 %v535_v32, %v304_v28  ;;  %v544_v10 = vadd.f32 %v543_v47, %v310_v50  ;;  %v322_v58 = vld [vmem:[%s3457_s18 + $0x318] sm:$0xff]  ;;  %v538_v8 = vsel %vm438_vm0, %v306_v57, 0.0  ;;  %v320_v61 = vld [vmem:[%s3457_s18 + $0x308] sm:$0xff] }
  0x34   : > { %v313_v46 = vld [vmem:[%s3457_s18 + $0x2d0] sm:$0xff]  ;;  %v552_v55 = vadd.f32 %v551_v24, %v316_v63  ;;  %522 = vadd.xlane.f32.xlu1 %v521_v41  ;;  %v318_v43 = vld [vmem:[%s3457_s18 + $0x2f8] sm:$0xff]  ;;  %v324_v39 = vld [vmem:[%s3457_s18 + $0x328] sm:$0xff]  ;;  %v560_v16 = vadd.f32 %v322_v58, %v321_v51 }
  0x35   : > { %v530_v31 = vadd.f32 %v529_v33, %v528_v62  ;;  %v537_v28 = vadd.f32 %v536_v3, %v305_v45  ;;  %v545_v22 = vadd.f32 %v544_v10, %v311_v54  ;;  %v328_v53 = vld [vmem:[%s3457_s18 + $0x348] sm:$0xff]  ;;  %v329_v32 = vld [vmem:[%s3457_s18 + $0x350] sm:$0xff]  ;;  %v330_v47 = vld [vmem:[%s3457_s18 + $0x358] sm:$0xff]  ;;  %v547_v33 = vsel %vm438_vm0, %v313_v46, 0.0 }
  0x36   : > { %v553_v50 = vadd.f32 %v552_v55, %v317_v15  ;;  %v319_v57 = vld [vmem:[%s3457_s18 + $0x300] sm:$0xff]  ;;  %v325_v63 = vld [vmem:[%s3457_s18 + $0x330] sm:$0xff]  ;;  %v561_v24 = vadd.f32 %v560_v16, %v323_v34  ;;  %v569_v41 = vadd.f32 %v329_v32, %v328_v53  ;;  %v326_v15 = vld [vmem:[%s3457_s18 + $0x338] sm:$0xff]  ;;  %v556_v55 = vsel %vm438_vm0, %v320_v61, 0.0 }
  0x37   : > { %531 = vadd.xlane.f32.xlu0 %v530_v31  ;;  %v539_v62 = vadd.f32 %v538_v8, %v537_v28  ;;  %v546_v45 = vadd.f32 %v545_v22, %v312_v56  ;;  %v331_v51 = vld [vmem:[%s3457_s18 + $0x360] sm:$0xff]  ;;  %v336_v10 = vld [vmem:[%s3457_s18 + $0x388] sm:$0xff]  ;;  %v337_v16 = vld [vmem:[%s3457_s18 + $0x390] sm:$0xff] }
  0x38   : > { %v554_v54 = vadd.f32 %v553_v50, %v318_v43  ;;  %v335_v3 = vld [vmem:[%s3457_s18 + $0x380] sm:$0xff]  ;;  %v562_v46 = vadd.f32 %v561_v24, %v324_v39  ;;  %v332_v31 = vld [vmem:[%s3457_s18 + $0x368] sm:$0xff]  ;;  %v570_v34 = vadd.f32 %v569_v41, %v330_v47  ;;  %v333_v28 = vld [vmem:[%s3457_s18 + $0x370] sm:$0xff] }
  0x39   : > { %v327_v58 = vld [vmem:[%s3457_s18 + $0x340] sm:$0xff]  ;;  %v578_v8 = vadd.f32 %v336_v10, %v335_v3  ;;  %540 = vadd.xlane.f32.xlu1 %v539_v62  ;;  %v548_v56 = vadd.f32 %v547_v33, %v546_v45  ;;  %v338_v22 = vld [vmem:[%s3457_s18 + $0x398] sm:$0xff]  ;;  %v344_v47 = vld [vmem:[%s3457_s18 + $0x3c8] sm:$0xff] }
  0x3a   : > { %v555_v43 = vadd.f32 %v554_v54, %v319_v57  ;;  %v342_v50 = vld [vmem:[%s3457_s18 + $0x3b8] sm:$0xff]  ;;  %v563_v53 = vadd.f32 %v562_v46, %v325_v63  ;;  %v571_v32 = vadd.f32 %v570_v34, %v331_v51  ;;  %v343_v24 = vld [vmem:[%s3457_s18 + $0x3c0] sm:$0xff]  ;;  %v565_v33 = vsel %vm438_vm0, %v327_v58, 0.0  ;;  %v341_v57 = vld [vmem:[%s3457_s18 + $0x3b0] sm:$0xff] }
  0x3b   : > { %v334_v61 = vld [vmem:[%s3457_s18 + $0x378] sm:$0xff]  ;;  %v579_v39 = vadd.f32 %v578_v8, %v337_v16  ;;  %549 = vadd.xlane.f32.xlu0 %v548_v56  ;;  %v339_v62 = vld [vmem:[%s3457_s18 + $0x3a0] sm:$0xff]  ;;  %v345_v45 = vld [vmem:[%s3457_s18 + $0x3d0] sm:$0xff]  ;;  %v587_v54 = vadd.f32 %v343_v24, %v342_v50 }
  0x3c   : > { %v557_v41 = vadd.f32 %v556_v55, %v555_v43  ;;  %v564_v63 = vadd.f32 %v563_v53, %v326_v15  ;;  %v572_v3 = vadd.f32 %v571_v32, %v332_v31  ;;  %v349_v10 = vld [vmem:[%s3457_s18 + $0x3f0] sm:$0xff]  ;;  %v350_v46 = vld [vmem:[%s3457_s18 + $0x3f8] sm:$0xff]  ;;  %v351_v34 = vld [vmem:[%s3457_s18 + $0x400] sm:$0xff]  ;;  %v574_v55 = vsel %vm438_vm0, %v334_v61, 0.0 }
  0x3d   : > { %v580_v51 = vadd.f32 %v579_v39, %v338_v22  ;;  %v340_v58 = vld [vmem:[%s3457_s18 + $0x3a8] sm:$0xff]  ;;  %v346_v16 = vld [vmem:[%s3457_s18 + $0x3d8] sm:$0xff]  ;;  %v588_v8 = vadd.f32 %v587_v54, %v344_v47  ;;  %v596_v56 = vadd.f32 %v350_v46, %v349_v10  ;;  %v347_v22 = vld [vmem:[%s3457_s18 + $0x3e0] sm:$0xff]  ;;  %v583_v39 = vsel %vm438_vm0, %v341_v57, 0.0 }
  0x3e   : > { %558 = vadd.xlane.f32.xlu1 %v557_v41  ;;  %v566_v43 = vadd.f32 %v565_v33, %v564_v63  ;;  %v573_v15 = vadd.f32 %v572_v3, %v333_v28  ;;  %v352_v50 = vld [vmem:[%s3457_s18 + $0x408] sm:$0xff]  ;;  %v357_v32 = vld [vmem:[%s3457_s18 + $0x430] sm:$0xff]  ;;  %v358_v54 = vld [vmem:[%s3457_s18 + $0x438] sm:$0xff] }
  0x3f   : > { %v581_v31 = vadd.f32 %v580_v51, %v339_v62  ;;  %v356_v53 = vld [vmem:[%s3457_s18 + $0x428] sm:$0xff]  ;;  %v589_v61 = vadd.f32 %v588_v8, %v345_v45  ;;  %v353_v41 = vld [vmem:[%s3457_s18 + $0x410] sm:$0xff]  ;;  %v597_v47 = vadd.f32 %v596_v56, %v351_v34  ;;  %v354_v63 = vld [vmem:[%s3457_s18 + $0x418] sm:$0xff] }
  0x40   : > { %v348_v24 = vld [vmem:[%s3457_s18 + $0x3e8] sm:$0xff]  ;;  %v605_v33 = vadd.f32 %v357_v32, %v356_v53  ;;  %567 = vadd.xlane.f32.xlu0 %v566_v43  ;;  %v575_v28 = vadd.f32 %v574_v55, %v573_v15  ;;  %v359_v3 = vld [vmem:[%s3457_s18 + $0x440] sm:$0xff]  ;;  %v365_v34 = vld [vmem:[%s3457_s18 + $0x470] sm:$0xff] }
  0x41   : > { %v582_v62 = vadd.f32 %v581_v31, %v340_v58  ;;  %v363_v51 = vld [vmem:[%s3457_s18 + $0x460] sm:$0xff]  ;;  %v590_v10 = vadd.f32 %v589_v61, %v346_v16  ;;  %v598_v46 = vadd.f32 %v597_v47, %v352_v50  ;;  %v364_v8 = vld [vmem:[%s3457_s18 + $0x468] sm:$0xff]  ;;  %v592_v55 = vsel %vm438_vm0, %v348_v24, 0.0  ;;  %v362_v58 = vld [vmem:[%s3457_s18 + $0x458] sm:$0xff] }
  0x42   : > { %v355_v57 = vld [vmem:[%s3457_s18 + $0x420] sm:$0xff]  ;;  %v606_v45 = vadd.f32 %v605_v33, %v358_v54  ;;  %576 = vadd.xlane.f32.xlu1 %v575_v28  ;;  %v360_v43 = vld [vmem:[%s3457_s18 + $0x448] sm:$0xff]  ;;  %v366_v15 = vld [vmem:[%s3457_s18 + $0x478] sm:$0xff]  ;;  %v614_v31 = vadd.f32 %v364_v8, %v363_v51 }
  0x43   : > { %v584_v56 = vadd.f32 %v583_v39, %v582_v62  ;;  %v591_v16 = vadd.f32 %v590_v10, %v347_v22  ;;  %v599_v53 = vadd.f32 %v598_v46, %v353_v41  ;;  %v370_v32 = vld [vmem:[%s3457_s18 + $0x498] sm:$0xff]  ;;  %v371_v61 = vld [vmem:[%s3457_s18 + $0x4a0] sm:$0xff]  ;;  %v372_v47 = vld [vmem:[%s3457_s18 + $0x4a8] sm:$0xff]  ;;  %v601_v39 = vsel %vm438_vm0, %v355_v57, 0.0 }
  0x44   : > { %v607_v50 = vadd.f32 %v606_v45, %v359_v3  ;;  %v361_v24 = vld [vmem:[%s3457_s18 + $0x450] sm:$0xff]  ;;  %v367_v54 = vld [vmem:[%s3457_s18 + $0x480] sm:$0xff]  ;;  %v615_v33 = vadd.f32 %v614_v31, %v365_v34  ;;  %v623_v28 = vadd.f32 %v371_v61, %v370_v32  ;;  %v368_v3 = vld [vmem:[%s3457_s18 + $0x488] sm:$0xff]  ;;  %v610_v45 = vsel %vm438_vm0, %v362_v58, 0.0 }
  0x45   : > { %585 = vadd.xlane.f32.xlu0 %v584_v56  ;;  %v593_v62 = vadd.f32 %v592_v55, %v591_v16  ;;  %v600_v22 = vadd.f32 %v599_v53, %v354_v63  ;;  %v373_v51 = vld [vmem:[%s3457_s18 + $0x4b0] sm:$0xff]  ;;  %v378_v46 = vld [vmem:[%s3457_s18 + $0x4d8] sm:$0xff]  ;;  %v379_v31 = vld [vmem:[%s3457_s18 + $0x4e0] sm:$0xff] }
  0x46   : > { %v608_v41 = vadd.f32 %v607_v50, %v360_v43  ;;  %v377_v10 = vld [vmem:[%s3457_s18 + $0x4d0] sm:$0xff]  ;;  %v616_v57 = vadd.f32 %v615_v33, %v366_v15  ;;  %v374_v56 = vld [vmem:[%s3457_s18 + $0x4b8] sm:$0xff]  ;;  %v624_v34 = vadd.f32 %v623_v28, %v372_v47  ;;  %v375_v16 = vld [vmem:[%s3457_s18 + $0x4c0] sm:$0xff] }
  0x47   : > { %v369_v8 = vld [vmem:[%s3457_s18 + $0x490] sm:$0xff]  ;;  %v632_v55 = vadd.f32 %v378_v46, %v377_v10  ;;  %594 = vadd.xlane.f32.xlu1 %v593_v62  ;;  %v602_v63 = vadd.f32 %v601_v39, %v600_v22  ;;  %v380_v53 = vld [vmem:[%s3457_s18 + $0x4e8] sm:$0xff]  ;;  %v386_v47 = vld [vmem:[%s3457_s18 + $0x518] sm:$0xff] }
  0x48   : > { %v609_v43 = vadd.f32 %v608_v41, %v361_v24  ;;  %v384_v50 = vld [vmem:[%s3457_s18 + $0x508] sm:$0xff]  ;;  %v617_v32 = vadd.f32 %v616_v57, %v367_v54  ;;  %v625_v61 = vadd.f32 %v624_v34, %v373_v51  ;;  %v385_v33 = vld [vmem:[%s3457_s18 + $0x510] sm:$0xff]  ;;  %v619_v39 = vsel %vm438_vm0, %v369_v8, 0.0  ;;  %v383_v24 = vld [vmem:[%s3457_s18 + $0x500] sm:$0xff] }
  0x49   : > { %v376_v58 = vld [vmem:[%s3457_s18 + $0x4c8] sm:$0xff]  ;;  %v633_v15 = vadd.f32 %v632_v55, %v379_v31  ;;  %603 = vadd.xlane.f32.xlu0 %v602_v63  ;;  %v381_v62 = vld [vmem:[%s3457_s18 + $0x4f0] sm:$0xff]  ;;  %v387_v22 = vld [vmem:[%s3457_s18 + $0x520] sm:$0xff]  ;;  %v641_v41 = vadd.f32 %v385_v33, %v384_v50 }
  0x4a   : > { %v611_v28 = vadd.f32 %v610_v45, %v609_v43  ;;  %v618_v54 = vadd.f32 %v617_v32, %v368_v3  ;;  %v626_v10 = vadd.f32 %v625_v61, %v374_v56  ;;  %v391_v46 = vld [vmem:[%s3457_s18 + $0x540] sm:$0xff]  ;;  %v392_v57 = vld [vmem:[%s3457_s18 + $0x548] sm:$0xff]  ;;  %v393_v34 = vld [vmem:[%s3457_s18 + $0x550] sm:$0xff]  ;;  %v628_v45 = vsel %vm438_vm0, %v376_v58, 0.0 }
  0x4b   : > { %v634_v51 = vadd.f32 %v633_v15, %v380_v53  ;;  %v382_v8 = vld [vmem:[%s3457_s18 + $0x4f8] sm:$0xff]  ;;  %v388_v31 = vld [vmem:[%s3457_s18 + $0x528] sm:$0xff]  ;;  %v642_v55 = vadd.f32 %v641_v41, %v386_v47  ;;  %v650_v63 = vadd.f32 %v392_v57, %v391_v46  ;;  %v389_v53 = vld [vmem:[%s3457_s18 + $0x530] sm:$0xff]  ;;  %v637_v15 = vsel %vm438_vm0, %v383_v24, 0.0 }
  0x4c   : > { %612 = vadd.xlane.f32.xlu1 %v611_v28  ;;  %v620_v43 = vadd.f32 %v619_v39, %v618_v54  ;;  %v627_v3 = vadd.f32 %v626_v10, %v375_v16  ;;  %v394_v50 = vld [vmem:[%s3457_s18 + $0x558] sm:$0xff]  ;;  %v399_v61 = vld [vmem:[%s3457_s18 + $0x580] sm:$0xff]  ;;  %v400_v41 = vld [vmem:[%s3457_s18 + $0x588] sm:$0xff] }
  0x4d   : > { %v635_v56 = vadd.f32 %v634_v51, %v381_v62  ;;  %v398_v32 = vld [vmem:[%s3457_s18 + $0x578] sm:$0xff]  ;;  %v643_v58 = vadd.f32 %v642_v55, %v387_v22  ;;  %v395_v28 = vld [vmem:[%s3457_s18 + $0x560] sm:$0xff]  ;;  %v651_v47 = vadd.f32 %v650_v63, %v393_v34  ;;  %v396_v54 = vld [vmem:[%s3457_s18 + $0x568] sm:$0xff] }
  0x4e   : > { %v390_v33 = vld [vmem:[%s3457_s18 + $0x538] sm:$0xff]  ;;  %v659_v39 = vadd.f32 %v399_v61, %v398_v32  ;;  %621 = vadd.xlane.f32.xlu0 %v620_v43  ;;  %v629_v16 = vadd.f32 %v628_v45, %v627_v3  ;;  %v401_v10 = vld [vmem:[%s3457_s18 + $0x590] sm:$0xff]  ;;  %v407_v34 = vld [vmem:[%s3457_s18 + $0x5c0] sm:$0xff] }
  0x4f   : > { %v636_v62 = vadd.f32 %v635_v56, %v382_v8  ;;  %v405_v51 = vld [vmem:[%s3457_s18 + $0x5b0] sm:$0xff]  ;;  %v644_v46 = vadd.f32 %v643_v58, %v388_v31  ;;  %v652_v57 = vadd.f32 %v651_v47, %v394_v50  ;;  %v406_v55 = vld [vmem:[%s3457_s18 + $0x5b8] sm:$0xff]  ;;  %v646_v45 = vsel %vm438_vm0, %v390_v33, 0.0  ;;  %v404_v8 = vld [vmem:[%s3457_s18 + $0x5a8] sm:$0xff] }
  0x50   : > { %v397_v24 = vld [vmem:[%s3457_s18 + $0x570] sm:$0xff]  ;;  %v660_v22 = vadd.f32 %v659_v39, %v400_v41  ;;  %630 = vadd.xlane.f32.xlu1 %v629_v16  ;;  %v402_v43 = vld [vmem:[%s3457_s18 + $0x598] sm:$0xff]  ;;  %v408_v3 = vld [vmem:[%s3457_s18 + $0x5c8] sm:$0xff]  ;;  %v668_v56 = vadd.f32 %v406_v55, %v405_v51 }
  0x51   : > { %v638_v63 = vadd.f32 %v637_v15, %v636_v62  ;;  %v645_v31 = vadd.f32 %v644_v46, %v389_v53  ;;  %v653_v32 = vadd.f32 %v652_v57, %v395_v28  ;;  %v412_v61 = vld [vmem:[%s3457_s18 + $0x5e8] sm:$0xff]  ;;  %v413_v58 = vld [vmem:[%s3457_s18 + $0x5f0] sm:$0xff]  ;;  %v414_v47 = vld [vmem:[%s3457_s18 + $0x5f8] sm:$0xff]  ;;  %v655_v15 = vsel %vm438_vm0, %v397_v24, 0.0 }
  0x52   : > { %v661_v50 = vadd.f32 %v660_v22, %v401_v10  ;;  %v403_v33 = vld [vmem:[%s3457_s18 + $0x5a0] sm:$0xff]  ;;  %v409_v41 = vld [vmem:[%s3457_s18 + $0x5d0] sm:$0xff]  ;;  %v669_v39 = vadd.f32 %v668_v56, %v407_v34  ;;  %v677_v16 = vadd.f32 %v413_v58, %v412_v61  ;;  %v420_v46 = vld [vmem:[%s3457_s18 + $0x628] sm:$0xff]  ;;  %v664_v57 = vsel %vm438_vm0, %v404_v8, 0.0 }
  0x53   : > { %639 = vadd.xlane.f32.xlu0 %v638_v63  ;;  %v647_v62 = vadd.f32 %v646_v45, %v645_v31  ;;  %v654_v53 = vadd.f32 %v653_v32, %v396_v54  ;;  %v415_v10 = vld [vmem:[%s3457_s18 + $0x600] sm:$0xff]  ;;  %v410_v22 = vld [vmem:[%s3457_s18 + $0x5d8] sm:$0xff]  ;;  %v421_v34 = vld [vmem:[%s3457_s18 + $0x630] sm:$0xff] }
  0x54   : > { %v662_v28 = vadd.f32 %v661_v50, %v402_v43  ;;  %v419_v51 = vld [vmem:[%s3457_s18 + $0x620] sm:$0xff]  ;;  %v670_v55 = vadd.f32 %v669_v39, %v408_v3  ;;  %v678_v63 = vadd.f32 %v677_v16, %v414_v47  ;;  %v416_v43 = vld [vmem:[%s3457_s18 + $0x608] sm:$0xff]  ;;  %v422_v31 = vld [vmem:[%s3457_s18 + $0x638] sm:$0xff] }
  0x55   : > { %v411_v24 = vld [vmem:[%s3457_s18 + $0x5e0] sm:$0xff]  ;;  %v686_v56 = vadd.f32 %v420_v46, %v419_v51  ;;  %648 = vadd.xlane.f32.xlu1 %v647_v62  ;;  %v656_v54 = vadd.f32 %v655_v15, %v654_v53  ;;  %v426_v32 = vld [vmem:[%s3457_s18 + $0x658] sm:$0xff]  ;;  %v428_v3 = vld [vmem:[%s3457_s18 + $0x668] sm:$0xff] }
  0x56   : > { %v663_v45 = vadd.f32 %v662_v28, %v403_v33  ;;  %v671_v50 = vadd.f32 %v670_v55, %v409_v41  ;;  %v418_v8 = vld [vmem:[%s3457_s18 + $0x618] sm:$0xff]  ;;  %v679_v61 = vadd.f32 %v678_v63, %v415_v10  ;;  %v427_v23 = vld [vmem:[%s3457_s18 + $0x660] sm:$0xff]  ;;  %v673_v39 = vsel %vm438_vm0, %v411_v24, 0.0  ;;  %v417_v16 = vld [vmem:[%s3457_s18 + $0x610] sm:$0xff] }
  0x57   : > { %v687_v58 = vadd.f32 %v686_v56, %v421_v34  ;;  %657 = vadd.xlane.f32.xlu0 %v656_v54  ;;  %v423_v15 = vld [vmem:[%s3457_s18 + $0x640] sm:$0xff]  ;;  %v695_v33 = vadd.f32 %v427_v23, %v426_v32  ;;  %v425_v28 = vld [vmem:[%s3457_s18 + $0x650] sm:$0xff]  ;;  %v682_v10 = vsel %vm438_vm0, %v418_v8, 0.0  ;;  %v424_v46 = vld [vmem:[%s3457_s18 + $0x648] sm:$0xff] }
  0x58   : > { %v665_v47 = vadd.f32 %v664_v57, %v663_v45  ;;  %v672_v62 = vadd.f32 %v671_v50, %v410_v22  ;;  %v680_v53 = vadd.f32 %v679_v61, %v416_v43  ;;  %v429_v51 = vld [vmem:[%s3457_s18 + $0x670] sm:$0xff]  ;;  %v430_v24 = vld [vmem:[%s3457_s18 + $0x678] sm:$0xff]  ;;  %v691_v56 = vsel %vm438_vm0, %v425_v28, 0.0  ;;  %v432_v54 = vld [vmem:[%s3457_s18 + $0x688] sm:$0xff] }
  0x59   : > { %v688_v41 = vadd.f32 %v687_v58, %v422_v31  ;;  %v696_v55 = vadd.f32 %v695_v33, %v428_v3  ;;  %v431_v43 = vld [vmem:[%s3457_s18 + $0x680] sm:$0xff]  ;;  %v700_v50 = vsel %vm438_vm0, %v432_v54, 0.0 }
  0x5a   : > { %666 = vadd.xlane.f32.xlu1 %v665_v47  ;;  %v674_v63 = vadd.f32 %v673_v39, %v672_v62  ;;  %v681_v57 = vadd.f32 %v680_v53, %v417_v16 }
  0x5b   : > { %v689_v34 = vadd.f32 %v688_v41, %v423_v15  ;;  %v697_v45 = vadd.f32 %v696_v55, %v429_v51 }
  0x5c   : > { %675 = vadd.xlane.f32.xlu0 %v674_v63  ;;  %v683_v23 = vadd.f32 %v682_v10, %v681_v57 }
  0x5d   : > { %v690_v22 = vadd.f32 %v689_v34, %v424_v46  ;;  %v698_v31 = vadd.f32 %v697_v45, %v430_v24 }
  0x5e   : > { %684 = vadd.xlane.f32.xlu1 %v683_v23 }
  0x5f   : > { %v692_v32 = vadd.f32 %v691_v56, %v690_v22  ;;  %v699_v8 = vadd.f32 %v698_v31, %v431_v43 }
  0x61   : > { %693 = vadd.xlane.f32.xlu0 %v692_v32  ;;  %v701_v61 = vadd.f32 %v700_v50, %v699_v8 }
  0x63   : > { %702 = vadd.xlane.f32.xlu1 %v701_v61 }
  0xa9   : > { %v460_v58 = vpop.xlane.xlu1 %459 }
  0xaa   : > { %v3810_v3 = vmul.f32 0.0012755102, %v460_v58 }
  0xab   : > { %v442_v47 = vpop.xlane.xlu0 %441 }
  0xac   : > { %v3812_v39 = vmul.f32 0.0012755102, %v442_v47  ;;  %v778_v16 = vsub.f32 %v3460_v0, %v3810_v3  ;;  %v779_v15 = vsub.f32 %v3463_v1, %v3810_v3  ;;  %v780_v33 = vsub.f32 %v3466_v2, %v3810_v3 }
  0xad   : > { %v781_v62 = vsub.f32 %v3471_v4, %v3810_v3  ;;  %v782_v53 = vsub.f32 %v3480_v7, %v3810_v3  ;;  %v469_v28 = vpop.xlane.xlu1 %468 }
  0xae   : > { %v764_v41 = vsub.f32 %v3474_v5, %v3812_v39  ;;  %v765_v51 = vsub.f32 %v3477_v6, %v3812_v39  ;;  %v766_v0 = vsub.f32 %v3484_v9, %v3812_v39  ;;  %v767_v1 = vsub.f32 %v3492_v12, %v3812_v39 }
  0xaf   : > { %v768_v2 = vsub.f32 %v3509_v19, %v3812_v39  ;;  %v769_v4 = vsub.f32 %v3533_v29, %v3812_v39  ;;  %v770_v7 = vsub.f32 %v3512_v20, %v3812_v39  ;;  %v783_v5 = vsub.f32 %v3489_v11, %v3810_v3  ;;  %v451_v6 = vpop.xlane.xlu0 %450 }
  0xb0   : > { %v3840_v10 = vmul.f32 0.0012755102, %v469_v28  ;;  %v974_v46 = vmul.f32 %v764_v41, %v764_v41  ;;  %v975_v9 = vmul.f32 %v765_v51, %v765_v51  ;;  %v784_v12 = vsub.f32 %v3498_v14, %v3810_v3 }
  0xb1   : > { %v3844_v55 = vmul.f32 0.0012755102, %v451_v6  ;;  %v976_v19 = vmul.f32 %v766_v0, %v766_v0  ;;  %v977_v63 = vmul.f32 %v767_v1, %v767_v1  ;;  %v980_v57 = vmul.f32 %v770_v7, %v770_v7 }
  0xb2   : > { %v1184_v29 = vadd.f32 %v975_v9, %v974_v46  ;;  %v988_v34 = vmul.f32 %v778_v16, %v778_v16  ;;  %v989_v24 = vmul.f32 %v779_v15, %v779_v15  ;;  %v990_v20 = vmul.f32 %v780_v33, %v780_v33 }
  0xb3   : > { %v978_v56 = vmul.f32 %v768_v2, %v768_v2  ;;  %v979_v54 = vmul.f32 %v769_v4, %v769_v4  ;;  %v1189_v11 = vsel %vm438_vm0, %v980_v57, 0.0  ;;  %v991_v45 = vmul.f32 %v781_v62, %v781_v62  ;;  %v478_v23 = vpop.xlane.xlu0 %477 }
  0xb4   : > { %v1185_v22 = vadd.f32 %v1184_v29, %v976_v19  ;;  %v992_v43 = vmul.f32 %v782_v53, %v782_v53  ;;  %v1202_v31 = vadd.f32 %v989_v24, %v988_v34  ;;  %v771_v14 = vsub.f32 %v3522_v25, %v3844_v55  ;;  %v487_v32 = vpop.xlane.xlu1 %486 }
  0xb5   : > { %v994_v50 = vmul.f32 %v784_v12, %v784_v12  ;;  %v772_v8 = vsub.f32 %v3525_v26, %v3844_v55  ;;  %v773_v61 = vsub.f32 %v3528_v27, %v3844_v55  ;;  %v774_v58 = vsub.f32 %v3547_v36, %v3844_v55 }
  0xb6   : > { %v3855_v47 = vmul.f32 0.0012755102, %v478_v23  ;;  %v1186_v16 = vadd.f32 %v1185_v22, %v977_v63  ;;  %v993_v15 = vmul.f32 %v783_v5, %v783_v5  ;;  %v1203_v33 = vadd.f32 %v1202_v31, %v990_v20 }
  0xb7   : > { %v3857_v62 = vmul.f32 0.0012755102, %v487_v32  ;;  %v775_v25 = vsub.f32 %v3562_v42, %v3844_v55  ;;  %v777_v53 = vsub.f32 %v3580_v52, %v3844_v55  ;;  %v981_v26 = vmul.f32 %v771_v14, %v771_v14  ;;  %v496_v28 = vpop.xlane.xlu0 %495 }
  0xb8   : > { %v1187_v41 = vadd.f32 %v1186_v16, %v978_v56  ;;  %v1204_v27 = vadd.f32 %v1203_v33, %v991_v45  ;;  %v776_v36 = vsub.f32 %v3572_v48, %v3844_v55  ;;  %v982_v51 = vmul.f32 %v772_v8, %v772_v8 }
  0xb9   : > { %v3865_v0 = vmul.f32 0.0012755102, %v496_v28  ;;  %v505_v1 = vpop.xlane.xlu1 %504  ;;  %v1207_v2 = vsel %vm438_vm0, %v994_v50, 0.0  ;;  %v983_v4 = vmul.f32 %v773_v61, %v773_v61  ;;  %v984_v7 = vmul.f32 %v774_v58, %v774_v58 }
  0xba   : > { %v1188_v5 = vadd.f32 %v1187_v41, %v979_v54  ;;  %v1205_v42 = vadd.f32 %v1204_v27, %v992_v43  ;;  %v985_v6 = vmul.f32 %v775_v25, %v775_v25  ;;  %v987_v46 = vmul.f32 %v777_v53, %v777_v53  ;;  %v5994_v41 = vld [vmem:[#allocation2_spill] sm:$0xff] }
  0xbb   : > { %v1193_v52 = vadd.f32 %v982_v51, %v981_v26  ;;  %v785_v9 = vsub.f32 %v3495_v13, %v3840_v10  ;;  %v786_v12 = vsub.f32 %v3503_v17, %v3840_v10  ;;  %v787_v48 = vsub.f32 %v3506_v18, %v3840_v10  ;;  %v514_v19 = vpop.xlane.xlu0 %513 }
  0xbc   : > { %v1190_v63 = vadd.f32 %v1189_v11, %v1188_v5  ;;  %v1206_v57 = vadd.f32 %v1205_v42, %v993_v15  ;;  %v986_v29 = vmul.f32 %v776_v36, %v776_v36  ;;  %v788_v34 = vsub.f32 %v3515_v21, %v3840_v10 }
  0xbd   : > { %v3876_v24 = vmul.f32 0.0012755102, %v505_v1  ;;  %v1194_v20 = vadd.f32 %v1193_v52, %v983_v4  ;;  %v1198_v56 = vsel %vm438_vm0, %v987_v46, 0.0  ;;  %v789_v13 = vsub.f32 %v3536_v30, %v3840_v10  ;;  %v523_v17 = vpop.xlane.xlu1 %522  ;;  %v3030_v52 = vld [vmem:[%s3457_s18 + $0x120] sm:$0xff] }
  0xbe   : > { %1191 = vadd.xlane.f32.xlu0 %v1190_v63  ;;  %v790_v18 = vsub.f32 %v3544_v35, %v3840_v10  ;;  %v791_v54 = vsub.f32 %v3558_v40, %v3840_v10  ;;  %v995_v11 = vmul.f32 %v785_v9, %v785_v9  ;;  %v996_v45 = vmul.f32 %v786_v12, %v786_v12  ;;  %v3031_v12 = vld [vmem:[%s3457_s18 + $0x128] sm:$0xff] }
  0xbf   : > { %v3885_v23 = vmul.f32 0.0012755102, %v514_v19  ;;  %v1208_v21 = vadd.f32 %v1207_v2, %v1206_v57  ;;  %v1195_v22 = vadd.f32 %v1194_v20, %v984_v7  ;;  %v997_v43 = vmul.f32 %v787_v48, %v787_v48 }
  0xc0   : > { %v3887_v31 = vmul.f32 0.0012755102, %v523_v17  ;;  %v532_v14 = vpop.xlane.xlu0 %531  ;;  %v998_v32 = vmul.f32 %v788_v34, %v788_v34  ;;  %v999_v30 = vmul.f32 %v789_v13, %v789_v13  ;;  %v1211_v50 = vadd.f32 %v996_v45, %v995_v11  ;;  %v3032_v34 = vld [vmem:[%s3457_s18 + $0x130] sm:$0xff]  ;;  %v5995_v17 = vld [vmem:[#allocation3_spill] sm:$0xff] }
  0xc1   : > { %v1196_v8 = vadd.f32 %v1195_v22, %v985_v6  ;;  %v1001_v61 = vmul.f32 %v791_v54, %v791_v54  ;;  %v792_v35 = vsub.f32 %v3550_v37, %v3855_v47  ;;  %v793_v40 = vsub.f32 %v3553_v38, %v3855_v47  ;;  %v3029_v6 = vld [vmem:[%s3457_s18 + $0x118] sm:$0xff]  ;;  %v5996_v54 = vld [vmem:[#allocation4_spill] sm:$0xff] }
  0xc2   : > { %1209 = vadd.xlane.f32.xlu0 %v1208_v21  ;;  %v1000_v58 = vmul.f32 %v790_v18, %v790_v18  ;;  %v1212_v16 = vadd.f32 %v1211_v50, %v997_v43  ;;  %v794_v15 = vsub.f32 %v3566_v44, %v3855_v47  ;;  %v795_v33 = vsub.f32 %v3575_v49, %v3855_v47  ;;  %v541_v26 = vpop.xlane.xlu1 %540 }
  0xc3   : > { %v3897_v25 = vmul.f32 0.0012755102, %v532_v14  ;;  %v1197_v53 = vadd.f32 %v1196_v8, %v986_v29  ;;  %v796_v28 = vsub.f32 %v3589_v59, %v3855_v47  ;;  %v798_v37 = vsub.f32 %v3592_v60, %v3855_v47  ;;  %v3033_v8 = vld [vmem:[%s3457_s18 + $0x140] sm:$0xff] }
  0xc4   : > { %v1213_v38 = vadd.f32 %v1212_v16, %v998_v32  ;;  %v797_v27 = vsub.f32 %v5994_v41, %v3855_v47  ;;  %v1002_v44 = vmul.f32 %v792_v35, %v792_v35  ;;  %v1003_v36 = vmul.f32 %v793_v40, %v793_v40  ;;  %v550_v1 = vpop.xlane.xlu0 %549  ;;  %v3034_v16 = vld [vmem:[%s3457_s18 + $0x150] sm:$0xff] }
  0xc5   : > { %v1199_v49 = vadd.f32 %v1198_v56, %v1197_v53  ;;  %v3905_v51 = vmul.f32 0.0012755102, %v541_v26  ;;  %v1216_v2 = vsel %vm438_vm0, %v1001_v61, 0.0  ;;  %v1004_v4 = vmul.f32 %v794_v15, %v794_v15  ;;  %v3035_v53 = vld [vmem:[%s3457_s18 + $0x158] sm:$0xff] }
  0xc6   : > { %v1214_v59 = vadd.f32 %v1213_v38, %v999_v30  ;;  %v1005_v7 = vmul.f32 %v795_v33, %v795_v33  ;;  %v1006_v60 = vmul.f32 %v796_v28, %v796_v28  ;;  %v1008_v5 = vmul.f32 %v798_v37, %v798_v37  ;;  %v3036_v28 = vld [vmem:[%s3457_s18 + $0x160] sm:$0xff]  ;;  %v3037_v38 = vld [vmem:[%s3457_s18 + $0x168] sm:$0xff] }
  0xc7   : > { %1200 = vadd.xlane.f32.xlu1 %v1199_v49  ;;  %v1220_v42 = vadd.f32 %v1003_v36, %v1002_v44  ;;  %v799_v46 = vsub.f32 %v3029_v6, %v3857_v62  ;;  %v800_v9 = vsub.f32 %v3030_v52, %v3857_v62  ;;  %v801_v48 = vsub.f32 %v3031_v12, %v3857_v62  ;;  %v559_v29 = vpop.xlane.xlu1 %558  ;;  %v3038_v36 = vld [vmem:[%s3457_s18 + $0x170] sm:$0xff] }
  0xc8   : > { %v3914_v19 = vmul.f32 0.0012755102, %v550_v1  ;;  %v1215_v63 = vadd.f32 %v1214_v59, %v1000_v58  ;;  %v1007_v57 = vmul.f32 %v797_v27, %v797_v27  ;;  %v802_v20 = vsub.f32 %v3032_v34, %v3857_v62  ;;  %v3039_v1 = vld [vmem:[%s3457_s18 + $0x178] sm:$0xff]  ;;  %v3040_v59 = vld [vmem:[%s3457_s18 + $0x180] sm:$0xff] }
  0xc9   : > { %v1221_v56 = vadd.f32 %v1220_v42, %v1004_v4  ;;  %v1225_v13 = vsel %vm438_vm0, %v1008_v5, 0.0  ;;  %v803_v18 = vsub.f32 %v5995_v17, %v3857_v62  ;;  %v805_v11 = vsub.f32 %v5996_v54, %v3857_v62  ;;  %v568_v21 = vpop.xlane.xlu0 %567  ;;  %v3041_v17 = vld [vmem:[%s3457_s18 + $0x188] sm:$0xff] }
  0xca   : > { %v1217_v45 = vadd.f32 %v1216_v2, %v1215_v63  ;;  %v1009_v22 = vmul.f32 %v799_v46, %v799_v46  ;;  %v1010_v43 = vmul.f32 %v800_v9, %v800_v9  ;;  %v1011_v14 = vmul.f32 %v801_v48, %v801_v48 }
  0xcb   : > { %v1222_v32 = vadd.f32 %v1221_v56, %v1005_v7  ;;  %v3923_v30 = vmul.f32 0.0012755102, %v559_v29  ;;  %v3925_v50 = vmul.f32 0.0012755102, %v568_v21  ;;  %v804_v61 = vsub.f32 %v3033_v8, %v3857_v62  ;;  %v577_v9 = vpop.xlane.xlu1 %576  ;;  %v3043_v21 = vld [vmem:[%s3457_s18 + $0x198] sm:$0xff] }
  0xcc   : > { %1218 = vadd.xlane.f32.xlu1 %v1217_v45  ;;  %v1012_v35 = vmul.f32 %v802_v20, %v802_v20  ;;  %v1015_v40 = vmul.f32 %v805_v11, %v805_v11  ;;  %v1229_v58 = vadd.f32 %v1010_v43, %v1009_v22  ;;  %v806_v15 = vsub.f32 %v3034_v16, %v3865_v0  ;;  %v3042_v45 = vld [vmem:[%s3457_s18 + $0x190] sm:$0xff] }
  0xcd   : > { %v1223_v33 = vadd.f32 %v1222_v32, %v1006_v60  ;;  %v807_v26 = vsub.f32 %v3035_v53, %v3865_v0  ;;  %v808_v37 = vsub.f32 %v3036_v28, %v3865_v0  ;;  %v809_v41 = vsub.f32 %v3037_v38, %v3865_v0  ;;  %v3044_v32 = vld [vmem:[%s3457_s18 + $0x1a0] sm:$0xff]  ;;  %v3047_v28 = vld [vmem:[%s3457_s18 + $0x1b0] sm:$0xff] }
  0xce   : > { %v1013_v27 = vmul.f32 %v803_v18, %v803_v18  ;;  %v1230_v44 = vadd.f32 %v1229_v58, %v1011_v14  ;;  %v810_v49 = vsub.f32 %v3038_v36, %v3865_v0  ;;  %v811_v2 = vsub.f32 %v3039_v1, %v3865_v0  ;;  %v3046_v58 = vld [vmem:[%s3457_s18 + $0x1b8] sm:$0xff] }
  0xcf   : > { %v1224_v4 = vadd.f32 %v1223_v33, %v1007_v57  ;;  %v812_v7 = vsub.f32 %v3040_v59, %v3865_v0  ;;  %v1016_v60 = vmul.f32 %v806_v15, %v806_v15  ;;  %v1017_v5 = vmul.f32 %v807_v26, %v807_v26  ;;  %v586_v57 = vpop.xlane.xlu0 %585  ;;  %v3050_v59 = vld [vmem:[%s3457_s18 + $0x1d0] sm:$0xff] }
  0xd0   : > { %v1014_v42 = vmul.f32 %v804_v61, %v804_v61  ;;  %v1231_v6 = vadd.f32 %v1230_v44, %v1012_v35  ;;  %v1234_v46 = vsel %vm438_vm0, %v1015_v40, 0.0  ;;  %v1018_v52 = vmul.f32 %v808_v37, %v808_v37  ;;  %v3045_v61 = vld [vmem:[%s3457_s18 + $0x1a8] sm:$0xff] }
  0xd1   : > { %v1226_v12 = vadd.f32 %v1225_v13, %v1224_v4  ;;  %v1019_v48 = vmul.f32 %v809_v41, %v809_v41  ;;  %v1020_v63 = vmul.f32 %v810_v49, %v810_v49  ;;  %v1238_v29 = vadd.f32 %v1017_v5, %v1016_v60  ;;  %v3048_v49 = vld [vmem:[%s3457_s18 + $0x1c0] sm:$0xff]  ;;  %v3051_v60 = vld [vmem:[%s3457_s18 + $0x1d8] sm:$0xff] }
  0xd2   : > { %v1232_v34 = vadd.f32 %v1231_v6, %v1013_v27  ;;  %v1021_v20 = vmul.f32 %v811_v2, %v811_v2  ;;  %v1022_v56 = vmul.f32 %v812_v7, %v812_v7  ;;  %v813_v18 = vsub.f32 %v3041_v17, %v3876_v24  ;;  %v3049_v2 = vld [vmem:[%s3457_s18 + $0x1c8] sm:$0xff] }
  0xd3   : > { %1227 = vadd.xlane.f32.xlu0 %v1226_v12  ;;  %v1239_v54 = vadd.f32 %v1238_v29, %v1018_v52  ;;  %v3946_v11 = vmul.f32 0.0012755102, %v577_v9  ;;  %v814_v13 = vsub.f32 %v3042_v45, %v3876_v24  ;;  %v815_v22 = vsub.f32 %v3043_v21, %v3876_v24  ;;  %v3052_v52 = vld [vmem:[%s3457_s18 + $0x1e0] sm:$0xff]  ;;  %v3053_v12 = vld [vmem:[%s3457_s18 + $0x1e8] sm:$0xff] }
  0xd4   : > { %v1233_v43 = vadd.f32 %v1232_v34, %v1014_v42  ;;  %v3952_v14 = vmul.f32 0.0012755102, %v586_v57  ;;  %v816_v8 = vsub.f32 %v3044_v32, %v3876_v24  ;;  %v817_v35 = vsub.f32 %v3045_v61, %v3876_v24 }
  0xd5   : > { %v1240_v40 = vadd.f32 %v1239_v54, %v1019_v48  ;;  %v819_v16 = vsub.f32 %v3046_v58, %v3876_v24  ;;  %v1023_v15 = vmul.f32 %v813_v18, %v813_v18  ;;  %v1024_v33 = vmul.f32 %v814_v13, %v814_v13 }
  0xd6   : > { %v1235_v53 = vadd.f32 %v1234_v46, %v1233_v43  ;;  %v1243_v26 = vsel %vm438_vm0, %v1022_v56, 0.0  ;;  %v818_v37 = vsub.f32 %v3047_v28, %v3876_v24  ;;  %v1025_v38 = vmul.f32 %v815_v22, %v815_v22  ;;  %v604_v43 = vpop.xlane.xlu0 %603 }
  0xd7   : > { %v1241_v41 = vadd.f32 %v1240_v40, %v1020_v63  ;;  %v1026_v27 = vmul.f32 %v816_v8, %v816_v8  ;;  %v1029_v44 = vmul.f32 %v819_v16, %v819_v16  ;;  %v1247_v36 = vadd.f32 %v1024_v33, %v1023_v15  ;;  %v3054_v63 = vld [vmem:[%s3457_s18 + $0x1f0] sm:$0xff]  ;;  %v3056_v15 = vld [vmem:[%s3457_s18 + $0x200] sm:$0xff] }
  0xd8   : > { %1236 = vadd.xlane.f32.xlu1 %v1235_v53  ;;  %v820_v1 = vsub.f32 %v3048_v49, %v3885_v23  ;;  %v821_v4 = vsub.f32 %v3049_v2, %v3885_v23  ;;  %v822_v7 = vsub.f32 %v3050_v59, %v3885_v23  ;;  %v823_v5 = vsub.f32 %v3051_v60, %v3885_v23  ;;  %v3057_v53 = vld [vmem:[%s3457_s18 + $0x208] sm:$0xff]  ;;  %v3061_v60 = vld [vmem:[%s3457_s18 + $0x220] sm:$0xff] }
  0xd9   : > { %v1242_v42 = vadd.f32 %v1241_v41, %v1021_v20  ;;  %v1027_v6 = vmul.f32 %v817_v35, %v817_v35  ;;  %v1248_v46 = vadd.f32 %v1247_v36, %v1025_v38  ;;  %v824_v9 = vsub.f32 %v3052_v52, %v3885_v23  ;;  %v595_v20 = vpop.xlane.xlu1 %594  ;;  %v3055_v35 = vld [vmem:[%s3457_s18 + $0x1f8] sm:$0xff]  ;;  %v3058_v38 = vld [vmem:[%s3457_s18 + $0x210] sm:$0xff]  ;;  %v3060_v49 = vld [vmem:[%s3457_s18 + $0x228] sm:$0xff] }
  0xda   : > { %v825_v48 = vsub.f32 %v3053_v12, %v3885_v23  ;;  %v826_v29 = vsub.f32 %v3054_v63, %v3885_v23  ;;  %v1030_v57 = vmul.f32 %v820_v1, %v820_v1  ;;  %v1031_v34 = vmul.f32 %v821_v4, %v821_v4  ;;  %v3062_v12 = vld [vmem:[%s3457_s18 + $0x230] sm:$0xff]  ;;  %v3063_v63 = vld [vmem:[%s3457_s18 + $0x238] sm:$0xff] }
  0xdb   : > { %v1244_v56 = vadd.f32 %v1243_v26, %v1242_v42  ;;  %v1028_v17 = vmul.f32 %v818_v37, %v818_v37  ;;  %v1249_v18 = vadd.f32 %v1248_v46, %v1026_v27  ;;  %v1032_v54 = vmul.f32 %v822_v7, %v822_v7  ;;  %v3059_v27 = vld [vmem:[%s3457_s18 + $0x218] sm:$0xff] }
  0xdc   : > { %v1252_v45 = vsel %vm438_vm0, %v1029_v44, 0.0  ;;  %v1033_v13 = vmul.f32 %v823_v5, %v823_v5  ;;  %v1034_v21 = vmul.f32 %v824_v9, %v824_v9  ;;  %v1256_v22 = vadd.f32 %v1031_v34, %v1030_v57  ;;  %v3064_v57 = vld [vmem:[%s3457_s18 + $0x240] sm:$0xff] }
  0xdd   : > { %1245 = vadd.xlane.f32.xlu0 %v1244_v56  ;;  %v1250_v32 = vadd.f32 %v1249_v18, %v1027_v6  ;;  %v1035_v8 = vmul.f32 %v825_v48, %v825_v48  ;;  %v1036_v61 = vmul.f32 %v826_v29, %v826_v29  ;;  %v827_v40 = vsub.f32 %v3055_v35, %v3887_v31  ;;  %v3065_v56 = vld [vmem:[%s3457_s18 + $0x248] sm:$0xff] }
  0xde   : > { %v1257_v58 = vadd.f32 %v1256_v22, %v1032_v54  ;;  %v3980_v16 = vmul.f32 0.0012755102, %v595_v20  ;;  %v828_v33 = vsub.f32 %v3056_v15, %v3887_v31  ;;  %v829_v26 = vsub.f32 %v3057_v53, %v3887_v31 }
  0xdf   : > { %v1251_v28 = vadd.f32 %v1250_v32, %v1028_v17  ;;  %v3986_v37 = vmul.f32 0.0012755102, %v604_v43  ;;  %v830_v41 = vsub.f32 %v3058_v38, %v3887_v31  ;;  %v831_v44 = vsub.f32 %v3059_v27, %v3887_v31  ;;  %v3068_v43 = vld [vmem:[%s3457_s18 + $0x260] sm:$0xff] }
  0xe0   : > { %v1258_v36 = vadd.f32 %v1257_v58, %v1033_v13  ;;  %v833_v1 = vsub.f32 %v3060_v49, %v3887_v31  ;;  %v1037_v2 = vmul.f32 %v827_v40, %v827_v40  ;;  %v1038_v4 = vmul.f32 %v828_v33, %v828_v33  ;;  %v3069_v49 = vld [vmem:[%s3457_s18 + $0x268] sm:$0xff] }
  0xe1   : > { %v1253_v59 = vadd.f32 %v1252_v45, %v1251_v28  ;;  %v1261_v7 = vsel %vm438_vm0, %v1036_v61, 0.0  ;;  %v832_v5 = vsub.f32 %v3061_v60, %v3887_v31  ;;  %v1039_v42 = vmul.f32 %v829_v26, %v829_v26  ;;  %v3066_v45 = vld [vmem:[%s3457_s18 + $0x250] sm:$0xff]  ;;  %v3071_v60 = vld [vmem:[%s3457_s18 + $0x278] sm:$0xff] }
  0xe2   : > { %v1259_v6 = vadd.f32 %v1258_v36, %v1034_v21  ;;  %v1040_v46 = vmul.f32 %v830_v41, %v830_v41  ;;  %v1043_v52 = vmul.f32 %v833_v1, %v833_v1  ;;  %v1265_v9 = vadd.f32 %v1038_v4, %v1037_v2  ;;  %v3067_v21 = vld [vmem:[%s3457_s18 + $0x258] sm:$0xff]  ;;  %v622_v41 = vpop.xlane.xlu0 %621 }
  0xe3   : > { %1254 = vadd.xlane.f32.xlu1 %v1253_v59  ;;  %v834_v48 = vsub.f32 %v3062_v12, %v3897_v25  ;;  %v835_v29 = vsub.f32 %v3063_v63, %v3897_v25  ;;  %v836_v34 = vsub.f32 %v3064_v57, %v3897_v25  ;;  %v837_v17 = vsub.f32 %v3065_v56, %v3897_v25  ;;  %v3070_v59 = vld [vmem:[%s3457_s18 + $0x270] sm:$0xff]  ;;  %v3074_v63 = vld [vmem:[%s3457_s18 + $0x298] sm:$0xff] }
  0xe4   : > { %v1260_v18 = vadd.f32 %v1259_v6, %v1035_v8  ;;  %v1041_v54 = vmul.f32 %v831_v44, %v831_v44  ;;  %v1266_v20 = vadd.f32 %v1265_v9, %v1039_v42  ;;  %v838_v13 = vsub.f32 %v3066_v45, %v3897_v25  ;;  %v613_v8 = vpop.xlane.xlu1 %612  ;;  %v3073_v9 = vld [vmem:[%s3457_s18 + $0x288] sm:$0xff] }
  0xe5   : > { %v839_v22 = vsub.f32 %v3067_v21, %v3897_v25  ;;  %v840_v32 = vsub.f32 %v3068_v43, %v3897_v25  ;;  %v1044_v61 = vmul.f32 %v834_v48, %v834_v48  ;;  %v1045_v35 = vmul.f32 %v835_v29, %v835_v29  ;;  %v3076_v43 = vld [vmem:[%s3457_s18 + $0x2a0] sm:$0xff] }
  0xe6   : > { %v1262_v40 = vadd.f32 %v1261_v7, %v1260_v18  ;;  %v1042_v58 = vmul.f32 %v832_v5, %v832_v5  ;;  %v1267_v15 = vadd.f32 %v1266_v20, %v1040_v46  ;;  %v1046_v33 = vmul.f32 %v836_v34, %v836_v34  ;;  %v3072_v46 = vld [vmem:[%s3457_s18 + $0x280] sm:$0xff]  ;;  %v3075_v18 = vld [vmem:[%s3457_s18 + $0x290] sm:$0xff] }
  0xe7   : > { %v1270_v53 = vsel %vm438_vm0, %v1043_v52, 0.0  ;;  %v1047_v26 = vmul.f32 %v837_v17, %v837_v17  ;;  %v1048_v28 = vmul.f32 %v838_v13, %v838_v13  ;;  %v1274_v38 = vadd.f32 %v1045_v35, %v1044_v61  ;;  %v3077_v61 = vld [vmem:[%s3457_s18 + $0x2a8] sm:$0xff] }
  0xe8   : > { %1263 = vadd.xlane.f32.xlu0 %v1262_v40  ;;  %v1268_v27 = vadd.f32 %v1267_v15, %v1041_v54  ;;  %v1049_v44 = vmul.f32 %v839_v22, %v839_v22  ;;  %v1050_v36 = vmul.f32 %v840_v32, %v840_v32  ;;  %v841_v1 = vsub.f32 %v3069_v49, %v3905_v51  ;;  %v3078_v40 = vld [vmem:[%s3457_s18 + $0x2b0] sm:$0xff]  ;;  %v3079_v15 = vld [vmem:[%s3457_s18 + $0x2b8] sm:$0xff] }
  0xe9   : > { %v1275_v2 = vadd.f32 %v1274_v38, %v1046_v33  ;;  %v4014_v4 = vmul.f32 0.0012755102, %v613_v8  ;;  %v842_v7 = vsub.f32 %v3070_v59, %v3905_v51  ;;  %v843_v5 = vsub.f32 %v3071_v60, %v3905_v51 }
  0xea   : > { %v1269_v42 = vadd.f32 %v1268_v27, %v1042_v58  ;;  %v4020_v6 = vmul.f32 0.0012755102, %v622_v41  ;;  %v844_v52 = vsub.f32 %v3072_v46, %v3905_v51  ;;  %v845_v12 = vsub.f32 %v3073_v9, %v3905_v51  ;;  %v3081_v41 = vld [vmem:[%s3457_s18 + $0x2c8] sm:$0xff] }
  0xeb   : > { %v1276_v48 = vadd.f32 %v1275_v2, %v1047_v26  ;;  %v847_v29 = vsub.f32 %v3074_v63, %v3905_v51  ;;  %v1051_v57 = vmul.f32 %v841_v1, %v841_v1  ;;  %v1052_v34 = vmul.f32 %v842_v7, %v842_v7 }
  0xec   : > { %v1271_v56 = vadd.f32 %v1270_v53, %v1269_v42  ;;  %v1279_v17 = vsel %vm438_vm0, %v1050_v36, 0.0  ;;  %v846_v54 = vsub.f32 %v3075_v18, %v3905_v51  ;;  %v1053_v20 = vmul.f32 %v843_v5, %v843_v5  ;;  %v3082_v36 = vld [vmem:[%s3457_s18 + $0x2d0] sm:$0xff]  ;;  %v3084_v18 = vld [vmem:[%s3457_s18 + $0x2e0] sm:$0xff] }
  0xed   : > { %v1277_v45 = vadd.f32 %v1276_v48, %v1048_v28  ;;  %v1054_v13 = vmul.f32 %v844_v52, %v844_v52  ;;  %v1057_v21 = vmul.f32 %v847_v29, %v847_v29  ;;  %v1283_v22 = vadd.f32 %v1052_v34, %v1051_v57  ;;  %v3080_v28 = vld [vmem:[%s3457_s18 + $0x2c0] sm:$0xff]  ;;  %v3083_v57 = vld [vmem:[%s3457_s18 + $0x2d8] sm:$0xff] }
  0xee   : > { %1272 = vadd.xlane.f32.xlu1 %v1271_v56  ;;  %v848_v32 = vsub.f32 %v3076_v43, %v3914_v19  ;;  %v849_v35 = vsub.f32 %v3077_v61, %v3914_v19  ;;  %v850_v58 = vsub.f32 %v3078_v40, %v3914_v19  ;;  %v851_v33 = vsub.f32 %v3079_v15, %v3914_v19  ;;  %v3088_v40 = vld [vmem:[%s3457_s18 + $0x308] sm:$0xff] }
  0xef   : > { %v1278_v8 = vadd.f32 %v1277_v45, %v1049_v44  ;;  %v1055_v53 = vmul.f32 %v845_v12, %v845_v12  ;;  %v1284_v26 = vadd.f32 %v1283_v22, %v1053_v20  ;;  %v852_v38 = vsub.f32 %v3080_v28, %v3914_v19  ;;  %v631_v44 = vpop.xlane.xlu1 %630  ;;  %v640_v12 = vpop.xlane.xlu0 %639  ;;  %v3085_v20 = vld [vmem:[%s3457_s18 + $0x2e8] sm:$0xff]  ;;  %v3086_v22 = vld [vmem:[%s3457_s18 + $0x2f0] sm:$0xff] }
  0xf0   : > { %v853_v27 = vsub.f32 %v3081_v41, %v3914_v19  ;;  %v854_v49 = vsub.f32 %v3082_v36, %v3914_v19  ;;  %v1058_v1 = vmul.f32 %v848_v32, %v848_v32  ;;  %v1059_v2 = vmul.f32 %v849_v35, %v849_v35  ;;  %v3087_v32 = vld [vmem:[%s3457_s18 + $0x2f8] sm:$0xff] }
  0xf1   : > { %v1280_v59 = vadd.f32 %v1279_v17, %v1278_v8  ;;  %v1056_v7 = vmul.f32 %v846_v54, %v846_v54  ;;  %v1285_v60 = vadd.f32 %v1284_v26, %v1054_v13  ;;  %v1060_v5 = vmul.f32 %v850_v58, %v850_v58  ;;  %v3089_v26 = vld [vmem:[%s3457_s18 + $0x300] sm:$0xff] }
  0xf2   : > { %v1288_v42 = vsel %vm438_vm0, %v1057_v21, 0.0  ;;  %v1061_v46 = vmul.f32 %v851_v33, %v851_v33  ;;  %v1062_v52 = vmul.f32 %v852_v38, %v852_v38  ;;  %v1292_v9 = vadd.f32 %v1059_v2, %v1058_v1  ;;  %v3090_v1 = vld [vmem:[%s3457_s18 + $0x310] sm:$0xff] }
  0xf3   : > { %1281 = vadd.xlane.f32.xlu0 %v1280_v59  ;;  %v1286_v48 = vadd.f32 %v1285_v60, %v1055_v53  ;;  %v1063_v63 = vmul.f32 %v853_v27, %v853_v27  ;;  %v1064_v29 = vmul.f32 %v854_v49, %v854_v49  ;;  %v855_v34 = vsub.f32 %v3083_v57, %v3923_v30  ;;  %v3091_v59 = vld [vmem:[%s3457_s18 + $0x318] sm:$0xff]  ;;  %v3092_v60 = vld [vmem:[%s3457_s18 + $0x320] sm:$0xff] }
  0xf4   : > { %v1293_v56 = vadd.f32 %v1292_v9, %v1060_v5  ;;  %v4048_v17 = vmul.f32 0.0012755102, %v631_v44  ;;  %v856_v54 = vsub.f32 %v3084_v18, %v3923_v30  ;;  %v857_v45 = vsub.f32 %v3085_v20, %v3923_v30  ;;  %v3093_v44 = vld [vmem:[%s3457_s18 + $0x328] sm:$0xff] }
  0xf5   : > { %v1287_v13 = vadd.f32 %v1286_v48, %v1056_v7  ;;  %v4054_v21 = vmul.f32 0.0012755102, %v640_v12  ;;  %v858_v43 = vsub.f32 %v3086_v22, %v3923_v30  ;;  %v859_v61 = vsub.f32 %v3087_v32, %v3923_v30  ;;  %v3094_v12 = vld [vmem:[%s3457_s18 + $0x330] sm:$0xff] }
  0xf6   : > { %v1294_v35 = vadd.f32 %v1293_v56, %v1061_v46  ;;  %v861_v58 = vsub.f32 %v3088_v40, %v3923_v30  ;;  %v1065_v15 = vmul.f32 %v855_v34, %v855_v34  ;;  %v1066_v33 = vmul.f32 %v856_v54, %v856_v54  ;;  %v3096_v34 = vld [vmem:[%s3457_s18 + $0x340] sm:$0xff]  ;;  %v658_v40 = vpop.xlane.xlu0 %657 }
  0xf7   : > { %v1289_v8 = vadd.f32 %v1288_v42, %v1287_v13  ;;  %v1297_v53 = vsel %vm438_vm0, %v1064_v29, 0.0  ;;  %v860_v28 = vsub.f32 %v3089_v26, %v3923_v30  ;;  %v1067_v38 = vmul.f32 %v857_v45, %v857_v45  ;;  %v3095_v29 = vld [vmem:[%s3457_s18 + $0x338] sm:$0xff] }
  0xf8   : > { %v1295_v41 = vadd.f32 %v1294_v35, %v1062_v52  ;;  %v1068_v27 = vmul.f32 %v858_v43, %v858_v43  ;;  %v1071_v36 = vmul.f32 %v861_v58, %v861_v58  ;;  %v1301_v49 = vadd.f32 %v1066_v33, %v1065_v15 }
  0xf9   : > { %1290 = vadd.xlane.f32.xlu1 %v1289_v8  ;;  %v862_v2 = vsub.f32 %v3090_v1, %v3925_v50  ;;  %v863_v7 = vsub.f32 %v3091_v59, %v3925_v50  ;;  %v864_v5 = vsub.f32 %v3092_v60, %v3925_v50  ;;  %v865_v42 = vsub.f32 %v3093_v44, %v3925_v50  ;;  %v3097_v8 = vld [vmem:[%s3457_s18 + $0x348] sm:$0xff]  ;;  %v3102_v44 = vld [vmem:[%s3457_s18 + $0x378] sm:$0xff] }
  0xfa   : > { %v1296_v46 = vadd.f32 %v1295_v41, %v1063_v63  ;;  %v1069_v52 = vmul.f32 %v859_v61, %v859_v61  ;;  %v1302_v9 = vadd.f32 %v1301_v49, %v1067_v38  ;;  %v866_v48 = vsub.f32 %v3094_v12, %v3925_v50  ;;  %v649_v63 = vpop.xlane.xlu1 %648  ;;  %v3098_v38 = vld [vmem:[%s3457_s18 + $0x350] sm:$0xff] }
  0xfb   : > { %v867_v57 = vsub.f32 %v3095_v29, %v3925_v50  ;;  %v868_v56 = vsub.f32 %v3096_v34, %v3925_v50  ;;  %v1072_v18 = vmul.f32 %v862_v2, %v862_v2  ;;  %v1073_v54 = vmul.f32 %v863_v7, %v863_v7  ;;  %v3100_v2 = vld [vmem:[%s3457_s18 + $0x360] sm:$0xff]  ;;  %v3101_v7 = vld [vmem:[%s3457_s18 + $0x368] sm:$0xff] }
  0xfc   : > { %v1298_v20 = vadd.f32 %v1297_v53, %v1296_v46  ;;  %v1070_v45 = vmul.f32 %v860_v28, %v860_v28  ;;  %v1303_v13 = vadd.f32 %v1302_v9, %v1068_v27  ;;  %v1074_v22 = vmul.f32 %v864_v5, %v864_v5  ;;  %v3099_v27 = vld [vmem:[%s3457_s18 + $0x358] sm:$0xff] }
  0xfd   : > { %v1306_v43 = vsel %vm438_vm0, %v1071_v36, 0.0  ;;  %v1075_v32 = vmul.f32 %v865_v42, %v865_v42  ;;  %v1076_v61 = vmul.f32 %v866_v48, %v866_v48  ;;  %v1310_v35 = vadd.f32 %v1073_v54, %v1072_v18  ;;  %v3103_v48 = vld [vmem:[%s3457_s18 + $0x370] sm:$0xff] }
  0xfe   : > { %1299 = vadd.xlane.f32.xlu0 %v1298_v20  ;;  %v1304_v58 = vadd.f32 %v1303_v13, %v1069_v52  ;;  %v1077_v15 = vmul.f32 %v867_v57, %v867_v57  ;;  %v1078_v33 = vmul.f32 %v868_v56, %v868_v56  ;;  %v869_v53 = vsub.f32 %v3097_v8, %v3946_v11  ;;  %v3104_v20 = vld [vmem:[%s3457_s18 + $0x380] sm:$0xff]  ;;  %v3105_v13 = vld [vmem:[%s3457_s18 + $0x388] sm:$0xff] }
  0xff   : > { %v1311_v26 = vadd.f32 %v1310_v35, %v1074_v22  ;;  %v4082_v28 = vmul.f32 0.0012755102, %v649_v63  ;;  %v870_v41 = vsub.f32 %v3098_v38, %v3946_v11  ;;  %v871_v36 = vsub.f32 %v3099_v27, %v3946_v11  ;;  %v3106_v63 = vld [vmem:[%s3457_s18 + $0x390] sm:$0xff] }
 0x100   : > { %v1305_v49 = vadd.f32 %v1304_v58, %v1070_v45  ;;  %v4088_v1 = vmul.f32 0.0012755102, %v658_v40  ;;  %v872_v59 = vsub.f32 %v3100_v2, %v3946_v11  ;;  %v873_v60 = vsub.f32 %v3101_v7, %v3946_v11  ;;  %v3110_v38 = vld [vmem:[%s3457_s18 + $0x3b0] sm:$0xff] }
 0x101   : > { %v1312_v5 = vadd.f32 %v1311_v26, %v1075_v32  ;;  %v875_v42 = vsub.f32 %v3102_v44, %v3946_v11  ;;  %v1079_v46 = vmul.f32 %v869_v53, %v869_v53  ;;  %v1080_v52 = vmul.f32 %v870_v41, %v870_v41  ;;  %v3107_v32 = vld [vmem:[%s3457_s18 + $0x398] sm:$0xff]  ;;  %v3109_v53 = vld [vmem:[%s3457_s18 + $0x3a8] sm:$0xff] }
 0x102   : > { %v1307_v9 = vadd.f32 %v1306_v43, %v1305_v49  ;;  %v1315_v12 = vsel %vm438_vm0, %v1078_v33, 0.0  ;;  %v874_v29 = vsub.f32 %v3103_v48, %v3946_v11  ;;  %v1081_v57 = vmul.f32 %v871_v36, %v871_v36  ;;  %v3108_v33 = vld [vmem:[%s3457_s18 + $0x3a0] sm:$0xff] }
 0x103   : > { %v1313_v34 = vadd.f32 %v1312_v5, %v1076_v61  ;;  %v1082_v56 = vmul.f32 %v872_v59, %v872_v59  ;;  %v1085_v18 = vmul.f32 %v875_v42, %v875_v42  ;;  %v1319_v54 = vadd.f32 %v1080_v52, %v1079_v46  ;;  %v676_v46 = vpop.xlane.xlu0 %675 }
 0x104   : > { %1308 = vadd.xlane.f32.xlu1 %v1307_v9  ;;  %v876_v45 = vsub.f32 %v3104_v20, %v3952_v14  ;;  %v877_v22 = vsub.f32 %v3105_v13, %v3952_v14  ;;  %v878_v43 = vsub.f32 %v3106_v63, %v3952_v14  ;;  %v879_v35 = vsub.f32 %v3107_v32, %v3952_v14 }
 0x105   : > { %v1314_v61 = vadd.f32 %v1313_v34, %v1077_v15  ;;  %v1083_v40 = vmul.f32 %v873_v60, %v873_v60  ;;  %v1320_v58 = vadd.f32 %v1319_v54, %v1081_v57  ;;  %v880_v8 = vsub.f32 %v3108_v33, %v3952_v14  ;;  %v667_v15 = vpop.xlane.xlu1 %666  ;;  %v3113_v54 = vld [vmem:[%s3457_s18 + $0x3c8] sm:$0xff] }
 0x106   : > { %v881_v26 = vsub.f32 %v3109_v53, %v3952_v14  ;;  %v882_v41 = vsub.f32 %v3110_v38, %v3952_v14  ;;  %v1086_v27 = vmul.f32 %v876_v45, %v876_v45  ;;  %v1087_v36 = vmul.f32 %v877_v22, %v877_v22  ;;  %v3114_v22 = vld [vmem:[%s3457_s18 + $0x3d0] sm:$0xff] }
 0x107   : > { %v1316_v49 = vadd.f32 %v1315_v12, %v1314_v61  ;;  %v1084_v2 = vmul.f32 %v874_v29, %v874_v29  ;;  %v1321_v59 = vadd.f32 %v1320_v58, %v1082_v56  ;;  %v1088_v7 = vmul.f32 %v878_v43, %v878_v43  ;;  %v3111_v12 = vld [vmem:[%s3457_s18 + $0x3b8] sm:$0xff]  ;;  %v3112_v56 = vld [vmem:[%s3457_s18 + $0x3c0] sm:$0xff]  ;;  %v3116_v61 = vld [vmem:[%s3457_s18 + $0x3e8] sm:$0xff] }
 0x108   : > { %v1324_v60 = vsel %vm438_vm0, %v1085_v18, 0.0  ;;  %v1089_v5 = vmul.f32 %v879_v35, %v879_v35  ;;  %v1090_v44 = vmul.f32 %v880_v8, %v880_v8  ;;  %v1328_v42 = vadd.f32 %v1087_v36, %v1086_v27  ;;  %v3115_v43 = vld [vmem:[%s3457_s18 + $0x3d8] sm:$0xff] }
 0x109   : > { %1317 = vadd.xlane.f32.xlu0 %v1316_v49  ;;  %v1322_v52 = vadd.f32 %v1321_v59, %v1083_v40  ;;  %v1091_v9 = vmul.f32 %v881_v26, %v881_v26  ;;  %v1092_v48 = vmul.f32 %v882_v41, %v882_v41  ;;  %v883_v29 = vsub.f32 %v3111_v12, %v3980_v16  ;;  %v3117_v26 = vld [vmem:[%s3457_s18 + $0x3e0] sm:$0xff]  ;;  %v3118_v59 = vld [vmem:[%s3457_s18 + $0x3f0] sm:$0xff] }
 0x10a   : > { %v1329_v57 = vadd.f32 %v1328_v42, %v1088_v7  ;;  %v4116_v34 = vmul.f32 0.0012755102, %v667_v15  ;;  %v884_v18 = vsub.f32 %v3112_v56, %v3980_v16  ;;  %v885_v20 = vsub.f32 %v3113_v54, %v3980_v16  ;;  %v3119_v15 = vld [vmem:[%s3457_s18 + $0x3f8] sm:$0xff]  ;;  %v3124_v54 = vld [vmem:[%s3457_s18 + $0x420] sm:$0xff] }
 0x10b   : > { %v1323_v45 = vadd.f32 %v1322_v52, %v1084_v2  ;;  %v4122_v13 = vmul.f32 0.0012755102, %v676_v46  ;;  %v886_v63 = vsub.f32 %v3114_v22, %v3980_v16  ;;  %v887_v32 = vsub.f32 %v3115_v43, %v3980_v16  ;;  %v3121_v46 = vld [vmem:[%s3457_s18 + $0x408] sm:$0xff]  ;;  %v3123_v56 = vld [vmem:[%s3457_s18 + $0x418] sm:$0xff] }
 0x10c   : > { %v1330_v35 = vadd.f32 %v1329_v57, %v1089_v5  ;;  %v889_v40 = vsub.f32 %v3116_v61, %v3980_v16  ;;  %v1093_v58 = vmul.f32 %v883_v29, %v883_v29  ;;  %v1094_v33 = vmul.f32 %v884_v18, %v884_v18  ;;  %v3120_v5 = vld [vmem:[%s3457_s18 + $0x400] sm:$0xff]  ;;  %v3122_v29 = vld [vmem:[%s3457_s18 + $0x410] sm:$0xff] }
 0x10d   : > { %v1325_v8 = vadd.f32 %v1324_v60, %v1323_v45  ;;  %v1333_v53 = vsel %vm438_vm0, %v1092_v48, 0.0  ;;  %v888_v38 = vsub.f32 %v3117_v26, %v3980_v16  ;;  %v1095_v41 = vmul.f32 %v885_v20, %v885_v20 }
 0x10e   : > { %v1331_v27 = vadd.f32 %v1330_v35, %v1090_v44  ;;  %v1096_v36 = vmul.f32 %v886_v63, %v886_v63  ;;  %v1099_v49 = vmul.f32 %v889_v40, %v889_v40  ;;  %v1337_v2 = vadd.f32 %v1094_v33, %v1093_v58 }
 0x10f   : > { %1326 = vadd.xlane.f32.xlu1 %v1325_v8  ;;  %v890_v7 = vsub.f32 %v3118_v59, %v3986_v37  ;;  %v891_v60 = vsub.f32 %v3119_v15, %v3986_v37  ;;  %v892_v42 = vsub.f32 %v3120_v5, %v3986_v37  ;;  %v893_v52 = vsub.f32 %v3121_v46, %v3986_v37  ;;  %v694_v8 = vpop.xlane.xlu0 %693  ;;  %v3126_v59 = vld [vmem:[%s3457_s18 + $0x430] sm:$0xff] }
 0x110   : > { %v1332_v44 = vadd.f32 %v1331_v27, %v1091_v9  ;;  %v1097_v48 = vmul.f32 %v887_v32, %v887_v32  ;;  %v1338_v12 = vadd.f32 %v1337_v2, %v1095_v41  ;;  %v894_v57 = vsub.f32 %v3122_v29, %v3986_v37  ;;  %v685_v9 = vpop.xlane.xlu1 %684 }
 0x111   : > { %v895_v18 = vsub.f32 %v3123_v56, %v3986_v37  ;;  %v896_v20 = vsub.f32 %v3124_v54, %v3986_v37  ;;  %v1100_v45 = vmul.f32 %v890_v7, %v890_v7  ;;  %v1101_v22 = vmul.f32 %v891_v60, %v891_v60  ;;  %v3127_v7 = vld [vmem:[%s3457_s18 + $0x438] sm:$0xff] }
 0x112   : > { %v1334_v63 = vadd.f32 %v1333_v53, %v1332_v44  ;;  %v1098_v43 = vmul.f32 %v888_v38, %v888_v38  ;;  %v1339_v35 = vadd.f32 %v1338_v12, %v1096_v36  ;;  %v1102_v61 = vmul.f32 %v892_v42, %v892_v42  ;;  %v3125_v53 = vld [vmem:[%s3457_s18 + $0x428] sm:$0xff]  ;;  %v3128_v42 = vld [vmem:[%s3457_s18 + $0x440] sm:$0xff]  ;;  %v3130_v12 = vld [vmem:[%s3457_s18 + $0x458] sm:$0xff] }
 0x113   : > { %v1342_v32 = vsel %vm438_vm0, %v1099_v49, 0.0  ;;  %v1103_v40 = vmul.f32 %v893_v52, %v893_v52  ;;  %v1104_v58 = vmul.f32 %v894_v57, %v894_v57  ;;  %v1346_v33 = vadd.f32 %v1101_v22, %v1100_v45  ;;  %v3129_v52 = vld [vmem:[%s3457_s18 + $0x448] sm:$0xff] }
 0x114   : > { %1335 = vadd.xlane.f32.xlu0 %v1334_v63  ;;  %v1340_v26 = vadd.f32 %v1339_v35, %v1097_v48  ;;  %v1105_v41 = vmul.f32 %v895_v18, %v895_v18  ;;  %v1106_v27 = vmul.f32 %v896_v20, %v896_v20  ;;  %v897_v38 = vsub.f32 %v3125_v53, %v4014_v4  ;;  %v3131_v20 = vld [vmem:[%s3457_s18 + $0x450] sm:$0xff] }
 0x115   : > { %v1347_v36 = vadd.f32 %v1346_v33, %v1102_v61  ;;  %v4150_v2 = vmul.f32 0.0012755102, %v685_v9  ;;  %v898_v49 = vsub.f32 %v3126_v59, %v4014_v4  ;;  %v899_v15 = vsub.f32 %v3127_v7, %v4014_v4  ;;  %v3132_v9 = vld [vmem:[%s3457_s18 + $0x460] sm:$0xff]  ;;  %v3133_v33 = vld [vmem:[%s3457_s18 + $0x468] sm:$0xff] }
 0x116   : > { %v1341_v60 = vadd.f32 %v1340_v26, %v1098_v43  ;;  %v4156_v5 = vmul.f32 0.0012755102, %v694_v8  ;;  %v900_v46 = vsub.f32 %v3128_v42, %v4014_v4  ;;  %v901_v44 = vsub.f32 %v3129_v52, %v4014_v4  ;;  %v3134_v8 = vld [vmem:[%s3457_s18 + $0x470] sm:$0xff]  ;;  %v3136_v59 = vld [vmem:[%s3457_s18 + $0x480] sm:$0xff]  ;;  %v3137_v7 = vld [vmem:[%s3457_s18 + $0x488] sm:$0xff] }
 0x117   : > { %v1348_v48 = vadd.f32 %v1347_v36, %v1103_v40  ;;  %v903_v29 = vsub.f32 %v3130_v12, %v4014_v4  ;;  %v1107_v57 = vmul.f32 %v897_v38, %v897_v38  ;;  %v1108_v56 = vmul.f32 %v898_v49, %v898_v49 }
 0x118   : > { %5997 = vst [vmem:[#allocation2_spill] sm:$0xff] %v4156_v5  ;;  %v1343_v18 = vadd.f32 %v1342_v32, %v1341_v60  ;;  %v1351_v54 = vsel %vm438_vm0, %v1106_v27, 0.0  ;;  %v902_v45 = vsub.f32 %v3131_v20, %v4014_v4  ;;  %v1109_v22 = vmul.f32 %v899_v15, %v899_v15  ;;  %v3135_v27 = vld [vmem:[%s3457_s18 + $0x478] sm:$0xff]  ;;  %v3138_v60 = vld [vmem:[%s3457_s18 + $0x490] sm:$0xff]  ;;  %v703_v20 = vpop.xlane.xlu1 %702 }
 0x119   : > { %v1349_v63 = vadd.f32 %v1348_v48, %v1104_v58  ;;  %v1110_v43 = vmul.f32 %v900_v46, %v900_v46  ;;  %v1113_v35 = vmul.f32 %v903_v29, %v903_v29  ;;  %v1355_v61 = vadd.f32 %v1108_v56, %v1107_v57 }
 0x11a   : > { %1344 = vadd.xlane.f32.xlu1 %v1343_v18  ;;  %v904_v40 = vsub.f32 %v3132_v9, %v4020_v6  ;;  %v905_v32 = vsub.f32 %v3133_v33, %v4020_v6  ;;  %v906_v26 = vsub.f32 %v3134_v8, %v4020_v6  ;;  %v907_v53 = vsub.f32 %v3135_v27, %v4020_v6  ;;  %v3141_v33 = vld [vmem:[%s3457_s18 + $0x4a8] sm:$0xff] }
 0x11b   : > { %v1350_v58 = vadd.f32 %v1349_v63, %v1105_v41  ;;  %v1111_v38 = vmul.f32 %v901_v44, %v901_v44  ;;  %v1356_v36 = vadd.f32 %v1355_v61, %v1109_v22  ;;  %v908_v49 = vsub.f32 %v3136_v59, %v4020_v6  ;;  %v3139_v61 = vld [vmem:[%s3457_s18 + $0x498] sm:$0xff] }
 0x11c   : > { %v909_v15 = vsub.f32 %v3137_v7, %v4020_v6  ;;  %v910_v42 = vsub.f32 %v3138_v60, %v4020_v6  ;;  %v1114_v46 = vmul.f32 %v904_v40, %v904_v40  ;;  %v1115_v52 = vmul.f32 %v905_v32, %v905_v32  ;;  %v3142_v32 = vld [vmem:[%s3457_s18 + $0x4b0] sm:$0xff] }
 0x11d   : > { %v1352_v48 = vadd.f32 %v1351_v54, %v1350_v58  ;;  %v1112_v12 = vmul.f32 %v902_v45, %v902_v45  ;;  %v1357_v29 = vadd.f32 %v1356_v36, %v1110_v43  ;;  %v1116_v41 = vmul.f32 %v906_v26, %v906_v26  ;;  %v3140_v54 = vld [vmem:[%s3457_s18 + $0x4a0] sm:$0xff] }
 0x11e   : > { %v1360_v44 = vsel %vm438_vm0, %v1113_v35, 0.0  ;;  %v1117_v57 = vmul.f32 %v907_v53, %v907_v53  ;;  %v1118_v56 = vmul.f32 %v908_v49, %v908_v49  ;;  %v1364_v18 = vadd.f32 %v1115_v52, %v1114_v46  ;;  %v3143_v53 = vld [vmem:[%s3457_s18 + $0x4b8] sm:$0xff]  ;;  %v3145_v46 = vld [vmem:[%s3457_s18 + $0x4c0] sm:$0xff] }
 0x11f   : > { %1353 = vadd.xlane.f32.xlu0 %v1352_v48  ;;  %v1358_v22 = vadd.f32 %v1357_v29, %v1111_v38  ;;  %v1120_v63 = vmul.f32 %v910_v42, %v910_v42  ;;  %v911_v9 = vsub.f32 %v3139_v61, %v4048_v17  ;;  %v912_v45 = vsub.f32 %v3140_v54, %v4048_v17  ;;  %v3144_v38 = vld [vmem:[%s3457_s18 + $0x4c8] sm:$0xff]  ;;  %v3148_v61 = vld [vmem:[%s3457_s18 + $0x4e0] sm:$0xff] }
 0x120   : > { %v1119_v43 = vmul.f32 %v909_v15, %v909_v15  ;;  %v1365_v40 = vadd.f32 %v1364_v18, %v1116_v41  ;;  %v913_v35 = vsub.f32 %v3141_v33, %v4048_v17  ;;  %v914_v8 = vsub.f32 %v3142_v32, %v4048_v17  ;;  %v3146_v18 = vld [vmem:[%s3457_s18 + $0x4d0] sm:$0xff] }
 0x121   : > { %v1359_v26 = vadd.f32 %v1358_v22, %v1112_v12  ;;  %v4190_v27 = vmul.f32 0.0012755102, %v703_v20  ;;  %v915_v58 = vsub.f32 %v3143_v53, %v4048_v17  ;;  %v917_v36 = vsub.f32 %v3144_v38, %v4048_v17  ;;  %v3147_v22 = vld [vmem:[%s3457_s18 + $0x4d8] sm:$0xff] }
 0x122   : > { %v1366_v59 = vadd.f32 %v1365_v40, %v1117_v57  ;;  %v1121_v49 = vmul.f32 %v911_v9, %v911_v9  ;;  %v1122_v7 = vmul.f32 %v912_v45, %v912_v45  ;;  %v1123_v15 = vmul.f32 %v913_v35, %v913_v35  ;;  %v3149_v9 = vld [vmem:[%s3457_s18 + $0x4e8] sm:$0xff]  ;;  %v3150_v40 = vld [vmem:[%s3457_s18 + $0x4f0] sm:$0xff]  ;;  %v3151_v35 = vld [vmem:[%s3457_s18 + $0x4f8] sm:$0xff] }
 0x123   : > { %5998 = vst [vmem:[#allocation3_spill] sm:$0xff] %v4190_v27  ;;  %v1361_v60 = vadd.f32 %v1360_v44, %v1359_v26  ;;  %v1369_v42 = vsel %vm438_vm0, %v1120_v63, 0.0  ;;  %v916_v52 = vsub.f32 %v3145_v46, %v4048_v17  ;;  %v1124_v48 = vmul.f32 %v914_v8, %v914_v8  ;;  %v3152_v8 = vld [vmem:[%s3457_s18 + $0x500] sm:$0xff]  ;;  %v3153_v46 = vld [vmem:[%s3457_s18 + $0x508] sm:$0xff] }
 0x124   : > { %v1367_v12 = vadd.f32 %v1366_v59, %v1118_v56  ;;  %v1127_v29 = vmul.f32 %v917_v36, %v917_v36  ;;  %v1373_v41 = vadd.f32 %v1122_v7, %v1121_v49  ;;  %v918_v57 = vsub.f32 %v3146_v18, %v4054_v21  ;;  %v3154_v18 = vld [vmem:[%s3457_s18 + $0x510] sm:$0xff] }
 0x125   : > { %1362 = vadd.xlane.f32.xlu1 %v1361_v60  ;;  %v1125_v20 = vmul.f32 %v915_v58, %v915_v58  ;;  %v919_v44 = vsub.f32 %v3147_v22, %v4054_v21  ;;  %v920_v63 = vsub.f32 %v3148_v61, %v4054_v21  ;;  %v921_v54 = vsub.f32 %v3149_v9, %v4054_v21  ;;  %v3155_v22 = vld [vmem:[%s3457_s18 + $0x518] sm:$0xff] }
 0x126   : > { %v1368_v45 = vadd.f32 %v1367_v12, %v1119_v43  ;;  %v1374_v56 = vadd.f32 %v1373_v41, %v1123_v15  ;;  %v922_v33 = vsub.f32 %v3150_v40, %v4054_v21  ;;  %v923_v32 = vsub.f32 %v3151_v35, %v4054_v21 }
 0x127   : > { %v924_v26 = vsub.f32 %v3152_v8, %v4054_v21  ;;  %v1128_v53 = vmul.f32 %v918_v57, %v918_v57  ;;  %v1129_v58 = vmul.f32 %v919_v44, %v919_v44  ;;  %v1130_v38 = vmul.f32 %v920_v63, %v920_v63  ;;  %v3157_v63 = vld [vmem:[%s3457_s18 + $0x528] sm:$0xff] }
 0x128   : > { %v1370_v36 = vadd.f32 %v1369_v42, %v1368_v45  ;;  %v1126_v59 = vmul.f32 %v916_v52, %v916_v52  ;;  %v1375_v43 = vadd.f32 %v1374_v56, %v1124_v48  ;;  %v1378_v49 = vsel %vm438_vm0, %v1127_v29, 0.0  ;;  %v3156_v52 = vld [vmem:[%s3457_s18 + $0x520] sm:$0xff]  ;;  %v3158_v45 = vld [vmem:[%s3457_s18 + $0x538] sm:$0xff] }
 0x129   : > { %v1131_v7 = vmul.f32 %v921_v54, %v921_v54  ;;  %v1134_v15 = vmul.f32 %v924_v26, %v924_v26  ;;  %v1382_v60 = vadd.f32 %v1129_v58, %v1128_v53  ;;  %v925_v12 = vsub.f32 %v3153_v46, %v4082_v28  ;;  %v3159_v26 = vld [vmem:[%s3457_s18 + $0x530] sm:$0xff]  ;;  %v3161_v46 = vld [vmem:[%s3457_s18 + $0x548] sm:$0xff] }
 0x12a   : > { %1371 = vadd.xlane.f32.xlu0 %v1370_v36  ;;  %v1376_v41 = vadd.f32 %v1375_v43, %v1125_v20  ;;  %v926_v57 = vsub.f32 %v3154_v18, %v4082_v28  ;;  %v927_v42 = vsub.f32 %v3155_v22, %v4082_v28  ;;  %v928_v48 = vsub.f32 %v3156_v52, %v4082_v28  ;;  %v3160_v43 = vld [vmem:[%s3457_s18 + $0x540] sm:$0xff] }
 0x12b   : > { %v1132_v29 = vmul.f32 %v922_v33, %v922_v33  ;;  %v1133_v44 = vmul.f32 %v923_v32, %v923_v32  ;;  %v1383_v61 = vadd.f32 %v1382_v60, %v1130_v38  ;;  %v929_v9 = vsub.f32 %v3157_v63, %v4082_v28  ;;  %v3164_v22 = vld [vmem:[%s3457_s18 + $0x560] sm:$0xff] }
 0x12c   : > { %v1377_v54 = vadd.f32 %v1376_v41, %v1126_v59  ;;  %v931_v20 = vsub.f32 %v3158_v45, %v4082_v28  ;;  %v1135_v56 = vmul.f32 %v925_v12, %v925_v12  ;;  %v1136_v40 = vmul.f32 %v926_v57, %v926_v57 }
 0x12d   : > { %v1384_v35 = vadd.f32 %v1383_v61, %v1131_v7  ;;  %v1387_v8 = vsel %vm438_vm0, %v1134_v15, 0.0  ;;  %v930_v33 = vsub.f32 %v3159_v26, %v4082_v28  ;;  %v1137_v32 = vmul.f32 %v927_v42, %v927_v42  ;;  %v3162_v15 = vld [vmem:[%s3457_s18 + $0x550] sm:$0xff] }
 0x12e   : > { %v1379_v53 = vadd.f32 %v1378_v49, %v1377_v54  ;;  %v1138_v58 = vmul.f32 %v928_v48, %v928_v48  ;;  %v1141_v38 = vmul.f32 %v931_v20, %v931_v20  ;;  %v1391_v36 = vadd.f32 %v1136_v40, %v1135_v56  ;;  %v3163_v49 = vld [vmem:[%s3457_s18 + $0x558] sm:$0xff]  ;;  %v3165_v48 = vld [vmem:[%s3457_s18 + $0x568] sm:$0xff]  ;;  %v3166_v61 = vld [vmem:[%s3457_s18 + $0x570] sm:$0xff] }
 0x12f   : > { %v1385_v59 = vadd.f32 %v1384_v35, %v1132_v29  ;;  %v932_v60 = vsub.f32 %v3160_v43, %v4088_v1  ;;  %v933_v7 = vsub.f32 %v3161_v46, %v4088_v1  ;;  %v934_v12 = vsub.f32 %v3162_v15, %v4088_v1  ;;  %v3168_v43 = vld [vmem:[%s3457_s18 + $0x580] sm:$0xff]  ;;  %v3169_v46 = vld [vmem:[%s3457_s18 + $0x588] sm:$0xff] }
 0x130   : > { %1380 = vadd.xlane.f32.xlu1 %v1379_v53  ;;  %v1139_v41 = vmul.f32 %v929_v9, %v929_v9  ;;  %v1392_v18 = vadd.f32 %v1391_v36, %v1137_v32  ;;  %v935_v57 = vsub.f32 %v3163_v49, %v4088_v1  ;;  %v936_v42 = vsub.f32 %v3164_v22, %v4088_v1  ;;  %v3167_v36 = vld [vmem:[%s3457_s18 + $0x578] sm:$0xff]  ;;  %v3172_v49 = vld [vmem:[%s3457_s18 + $0x5a8] sm:$0xff]  ;;  %v3173_v22 = vld [vmem:[%s3457_s18 + $0x5a0] sm:$0xff] }
 0x131   : > { %v1386_v52 = vadd.f32 %v1385_v59, %v1133_v44  ;;  %v937_v29 = vsub.f32 %v3165_v48, %v4088_v1  ;;  %v938_v63 = vsub.f32 %v3166_v61, %v4088_v1  ;;  %v1142_v54 = vmul.f32 %v932_v60, %v932_v60 }
 0x132   : > { %v1140_v45 = vmul.f32 %v930_v33, %v930_v33  ;;  %v1393_v20 = vadd.f32 %v1392_v18, %v1138_v58  ;;  %v1143_v9 = vmul.f32 %v933_v7, %v933_v7  ;;  %v1144_v56 = vmul.f32 %v934_v12, %v934_v12 }
 0x133   : > { %v1388_v40 = vadd.f32 %v1387_v8, %v1386_v52  ;;  %v1396_v35 = vsel %vm438_vm0, %v1141_v38, 0.0  ;;  %v1145_v26 = vmul.f32 %v935_v57, %v935_v57  ;;  %v1148_v44 = vmul.f32 %v938_v63, %v938_v63  ;;  %v3170_v38 = vld [vmem:[%s3457_s18 + $0x590] sm:$0xff] }
 0x134   : > { %v1394_v32 = vadd.f32 %v1393_v20, %v1139_v41  ;;  %v1400_v53 = vadd.f32 %v1143_v9, %v1142_v54  ;;  %v939_v59 = vsub.f32 %v3167_v36, %v4116_v34  ;;  %v940_v33 = vsub.f32 %v3168_v43, %v4116_v34  ;;  %v3171_v41 = vld [vmem:[%s3457_s18 + $0x598] sm:$0xff]  ;;  %v3176_v43 = vld [vmem:[%s3457_s18 + $0x5c0] sm:$0xff] }
 0x135   : > { %1389 = vadd.xlane.f32.xlu0 %v1388_v40  ;;  %v1146_v58 = vmul.f32 %v936_v42, %v936_v42  ;;  %v1147_v60 = vmul.f32 %v937_v29, %v937_v29  ;;  %v941_v8 = vsub.f32 %v3169_v46, %v4116_v34  ;;  %v942_v7 = vsub.f32 %v3170_v38, %v4116_v34 }
 0x136   : > { %v1395_v15 = vadd.f32 %v1394_v32, %v1140_v45  ;;  %v1401_v12 = vadd.f32 %v1400_v53, %v1144_v56  ;;  %v943_v18 = vsub.f32 %v3171_v41, %v4116_v34  ;;  %v945_v57 = vsub.f32 %v3172_v49, %v4116_v34  ;;  %v3174_v56 = vld [vmem:[%s3457_s18 + $0x5b0] sm:$0xff]  ;;  %v3175_v32 = vld [vmem:[%s3457_s18 + $0x5b8] sm:$0xff] }
 0x137   : > { %v944_v42 = vsub.f32 %v3173_v22, %v4116_v34  ;;  %v1149_v52 = vmul.f32 %v939_v59, %v939_v59  ;;  %v1150_v48 = vmul.f32 %v940_v33, %v940_v33  ;;  %v1151_v29 = vmul.f32 %v941_v8, %v941_v8  ;;  %v3178_v8 = vld [vmem:[%s3457_s18 + $0x5d0] sm:$0xff]  ;;  %v3180_v22 = vld [vmem:[%s3457_s18 + $0x5d8] sm:$0xff] }
 0x138   : > { %v1397_v61 = vadd.f32 %v1396_v35, %v1395_v15  ;;  %v1402_v63 = vadd.f32 %v1401_v12, %v1145_v26  ;;  %v1405_v54 = vsel %vm438_vm0, %v1148_v44, 0.0  ;;  %v1152_v45 = vmul.f32 %v942_v7, %v942_v7  ;;  %v3177_v26 = vld [vmem:[%s3457_s18 + $0x5c8] sm:$0xff]  ;;  %v3179_v7 = vld [vmem:[%s3457_s18 + $0x5e0] sm:$0xff] }
 0x139   : > { %v1155_v20 = vmul.f32 %v945_v57, %v945_v57  ;;  %v1409_v9 = vadd.f32 %v1150_v48, %v1149_v52  ;;  %v946_v40 = vsub.f32 %v3174_v56, %v4122_v13  ;;  %v947_v53 = vsub.f32 %v3175_v32, %v4122_v13  ;;  %v3182_v56 = vld [vmem:[%s3457_s18 + $0x5f0] sm:$0xff]  ;;  %v3184_v32 = vld [vmem:[%s3457_s18 + $0x600] sm:$0xff] }
 0x13a   : > { %1398 = vadd.xlane.f32.xlu1 %v1397_v61  ;;  %v1403_v36 = vadd.f32 %v1402_v63, %v1146_v58  ;;  %v1153_v59 = vmul.f32 %v943_v18, %v943_v18  ;;  %v948_v35 = vsub.f32 %v3176_v43, %v4122_v13  ;;  %v949_v44 = vsub.f32 %v3177_v26, %v4122_v13  ;;  %v3181_v63 = vld [vmem:[%s3457_s18 + $0x5e8] sm:$0xff]  ;;  %v3186_v26 = vld [vmem:[%s3457_s18 + $0x610] sm:$0xff] }
 0x13b   : > { %v1154_v33 = vmul.f32 %v944_v42, %v944_v42  ;;  %v1410_v46 = vadd.f32 %v1409_v9, %v1151_v29  ;;  %v950_v38 = vsub.f32 %v3178_v8, %v4122_v13  ;;  %v952_v15 = vsub.f32 %v3179_v7, %v4122_v13  ;;  %v3185_v43 = vld [vmem:[%s3457_s18 + $0x608] sm:$0xff] }
 0x13c   : > { %v1404_v12 = vadd.f32 %v1403_v36, %v1147_v60  ;;  %v1156_v58 = vmul.f32 %v946_v40, %v946_v40  ;;  %v1157_v41 = vmul.f32 %v947_v53, %v947_v53  ;;  %v1158_v18 = vmul.f32 %v948_v35, %v948_v35 }
 0x13d   : > { %v1411_v49 = vadd.f32 %v1410_v46, %v1152_v45  ;;  %v1414_v57 = vsel %vm438_vm0, %v1155_v20, 0.0  ;;  %v951_v42 = vsub.f32 %v3180_v22, %v4122_v13  ;;  %v1159_v52 = vmul.f32 %v949_v44, %v949_v44  ;;  %v3183_v45 = vld [vmem:[%s3457_s18 + $0x5f8] sm:$0xff] }
 0x13e   : > { %v1406_v48 = vadd.f32 %v1405_v54, %v1404_v12  ;;  %v1162_v29 = vmul.f32 %v952_v15, %v952_v15  ;;  %v1418_v61 = vadd.f32 %v1157_v41, %v1156_v58  ;;  %v953_v60 = vsub.f32 %v3181_v63, %v4150_v2  ;;  %v3187_v46 = vld [vmem:[%s3457_s18 + $0x618] sm:$0xff] }
 0x13f   : > { %v1412_v9 = vadd.f32 %v1411_v49, %v1153_v59  ;;  %v954_v40 = vsub.f32 %v3182_v56, %v4150_v2  ;;  %v955_v20 = vsub.f32 %v3183_v45, %v4150_v2  ;;  %v956_v53 = vsub.f32 %v3184_v32, %v4150_v2  ;;  %v3192_v32 = vld [vmem:[%s3457_s18 + $0x640] sm:$0xff] }
 0x140   : > { %1407 = vadd.xlane.f32.xlu0 %v1406_v48  ;;  %v1160_v36 = vmul.f32 %v950_v38, %v950_v38  ;;  %v1419_v54 = vadd.f32 %v1418_v61, %v1158_v18  ;;  %v957_v35 = vsub.f32 %v3185_v43, %v4150_v2  ;;  %v958_v44 = vsub.f32 %v3186_v26, %v4150_v2  ;;  %v3194_v26 = vld [vmem:[%s3457_s18 + $0x650] sm:$0xff] }
 0x141   : > { %v1413_v59 = vadd.f32 %v1412_v9, %v1154_v33  ;;  %v959_v8 = vsub.f32 %v3187_v46, %v4150_v2  ;;  %v1163_v7 = vmul.f32 %v953_v60, %v953_v60  ;;  %v1164_v15 = vmul.f32 %v954_v40, %v954_v40  ;;  %v3188_v33 = vld [vmem:[%s3457_s18 + $0x620] sm:$0xff]  ;;  %v3189_v9 = vld [vmem:[%s3457_s18 + $0x628] sm:$0xff]  ;;  %v3191_v40 = vld [vmem:[%s3457_s18 + $0x638] sm:$0xff] }
 0x142   : > { %v1161_v12 = vmul.f32 %v951_v42, %v951_v42  ;;  %v1420_v58 = vadd.f32 %v1419_v54, %v1159_v52  ;;  %v1423_v38 = vsel %vm438_vm0, %v1162_v29, 0.0  ;;  %v1165_v41 = vmul.f32 %v955_v20, %v955_v20  ;;  %v3190_v42 = vld [vmem:[%s3457_s18 + $0x630] sm:$0xff] }
 0x143   : > { %v1415_v18 = vadd.f32 %v1414_v57, %v1413_v59  ;;  %v1166_v49 = vmul.f32 %v956_v53, %v956_v53  ;;  %v1167_v22 = vmul.f32 %v957_v35, %v957_v35  ;;  %v1427_v48 = vadd.f32 %v1164_v15, %v1163_v7 }
 0x144   : > { %v1421_v61 = vadd.f32 %v1420_v58, %v1160_v36  ;;  %v960_v63 = vsub.f32 %v3188_v33, %v4156_v5  ;;  %v961_v60 = vsub.f32 %v3189_v9, %v4156_v5  ;;  %v962_v52 = vsub.f32 %v3190_v42, %v4156_v5  ;;  %v3193_v36 = vld [vmem:[%s3457_s18 + $0x648] sm:$0xff] }
 0x145   : > { %1416 = vadd.xlane.f32.xlu1 %v1415_v18  ;;  %v1168_v29 = vmul.f32 %v958_v44, %v958_v44  ;;  %v1169_v56 = vmul.f32 %v959_v8, %v959_v8  ;;  %v1428_v57 = vadd.f32 %v1427_v48, %v1165_v41  ;;  %v963_v45 = vsub.f32 %v3191_v40, %v4156_v5  ;;  %v3195_v41 = vld [vmem:[%s3457_s18 + $0x658] sm:$0xff]  ;;  %v3196_v48 = vld [vmem:[%s3457_s18 + $0x660] sm:$0xff] }
 0x146   : > { %v1422_v20 = vadd.f32 %v1421_v61, %v1161_v12  ;;  %v964_v53 = vsub.f32 %v3192_v32, %v4156_v5  ;;  %v965_v54 = vsub.f32 %v3193_v36, %v4156_v5  ;;  %v1170_v43 = vmul.f32 %v960_v63, %v960_v63  ;;  %v3197_v63 = vld [vmem:[%s3457_s18 + $0x668] sm:$0xff] }
 0x147   : > { %v1429_v35 = vadd.f32 %v1428_v57, %v1166_v49  ;;  %v966_v44 = vsub.f32 %v3194_v26, %v4156_v5  ;;  %v1171_v59 = vmul.f32 %v961_v60, %v961_v60  ;;  %v1172_v46 = vmul.f32 %v962_v52, %v962_v52  ;;  %v1192_v8 = vpop.xlane.xlu0 %1191  ;;  %v3198_v60 = vld [vmem:[%s3457_s18 + $0x670] sm:$0xff] }
 0x148   : > { %v1424_v7 = vadd.f32 %v1423_v38, %v1422_v20  ;;  %v1173_v15 = vmul.f32 %v963_v45, %v963_v45  ;;  %v967_v18 = vsub.f32 %v3195_v41, %v4190_v27  ;;  %v968_v61 = vsub.f32 %v3196_v48, %v4190_v27  ;;  %v3199_v45 = vld [vmem:[%s3457_s18 + $0x678] sm:$0xff] }
 0x149   : > { %v1430_v12 = vadd.f32 %v1429_v35, %v1167_v22  ;;  %v1436_v58 = vadd.f32 %v1171_v59, %v1170_v43  ;;  %v1432_v49 = vsel %vm438_vm0, %v1169_v56, 0.0  ;;  %v1174_v33 = vmul.f32 %v964_v53, %v964_v53  ;;  %v3200_v35 = vld [vmem:[%s3457_s18 + $0x680] sm:$0xff]  ;;  %v3201_v59 = vld [vmem:[%s3457_s18 + $0x688] sm:$0xff] }
 0x14a   : > { %1425 = vadd.xlane.f32.xlu0 %v1424_v7  ;;  %v969_v9 = vsub.f32 %v3197_v63, %v4190_v27  ;;  %v970_v38 = vsub.f32 %v3198_v60, %v4190_v27  ;;  %v1175_v42 = vmul.f32 %v965_v54, %v965_v54  ;;  %v1176_v52 = vmul.f32 %v966_v44, %v966_v44 }
 0x14b   : > { %v1431_v22 = vadd.f32 %v1430_v12, %v1168_v29  ;;  %v1437_v57 = vadd.f32 %v1436_v58, %v1172_v46  ;;  %v1210_v40 = vpop.xlane.xlu0 %1209  ;;  %v971_v20 = vsub.f32 %v3199_v45, %v4190_v27  ;;  %v1177_v32 = vmul.f32 %v967_v18, %v967_v18 }
 0x14c   : > { %v1178_v36 = vmul.f32 %v968_v61, %v968_v61  ;;  %v1179_v56 = vmul.f32 %v969_v9, %v969_v9  ;;  %v972_v26 = vsub.f32 %v3200_v35, %v4190_v27  ;;  %v973_v7 = vsub.f32 %v3201_v59, %v4190_v27 }
 0x14d   : > { %v1433_v53 = vadd.f32 %v1432_v49, %v1431_v22  ;;  %v1438_v43 = vadd.f32 %v1437_v57, %v1173_v15  ;;  %v1180_v41 = vmul.f32 %v970_v38, %v970_v38  ;;  %v1484_v54 = vmul.f32 0.0012755102, %v1192_v8 }
 0x14e   : > { %v1445_v29 = vadd.f32 %v1178_v36, %v1177_v32  ;;  %v1486_v44 = vmul.f32 0.0012755102, %v1210_v40  ;;  %v1441_v12 = vsel %vm438_vm0, %v1176_v52, 0.0  ;;  %v1181_v58 = vmul.f32 %v971_v20, %v971_v20 }
 0x14f   : > { %1434 = vadd.xlane.f32.xlu1 %v1433_v53  ;;  %v1439_v46 = vadd.f32 %v1438_v43, %v1174_v33  ;;  %v1514_v48 = vadd.f32 1e-05, %v1484_v54  ;;  %v3420_v15 = vmov 0   ;;  %v1183_v9 = vmul.f32 %v973_v7, %v973_v7  ;;  %v1574_v53 = vld [vmem:[%s4324_s22] sm:$0xff]  ;;  %v1576_v43 = vld [vmem:[%s4324_s22 + $0x10] sm:$0xff] }
 0x150   : > { %v1446_v18 = vadd.f32 %v1445_v29, %v1179_v56  ;;  %v1201_v61 = vpop.xlane.xlu1 %1200  ;;  %v1516_v49 = vadd.f32 1e-05, %v1486_v44  ;;  %2967 = vset.pattern.permute.xlu0 %v3420_v15  ;;  %2968 = vset.pattern.permute.xlu1 %v3420_v15  ;;  %v1182_v38 = vmul.f32 %v972_v26, %v972_v26  ;;  %v4335_v44 = vld [vmem:[%s4331_s25] sm:$0xff]  ;;  %v4347_v15 = vld [vmem:[%s4331_s25 + $0x8] sm:$0xff] }
 0x151   : > { %v1440_v63 = vadd.f32 %v1439_v46, %v1175_v42  ;;  %v1485_v60 = vmul.f32 0.0012755102, %v1201_v61  ;;  %2969 = vrsqrt.f32 %v1514_v48  ;;  %v1450_v52 = vsel %vm438_vm0, %v1183_v9, 0.0  ;;  %v1577_v9 = vld [vmem:[%s4324_s22 + $0x18] sm:$0xff] }
 0x152   : > { %v1447_v22 = vadd.f32 %v1446_v18, %v1180_v41  ;;  %2971 = vrsqrt.f32 %v1516_v49  ;;  %v1575_v41 = vld [vmem:[%s4324_s22 + $0x8] sm:$0xff]  ;;  %v4341_v18 = vld [vmem:[%s4331_s25 + $0x10] sm:$0xff] }
 0x153   : > { %v1442_v8 = vadd.f32 %v1441_v12, %v1440_v63  ;;  %v1515_v57 = vadd.f32 1e-05, %v1485_v60 }
 0x154   : > { %v1448_v33 = vadd.f32 %v1447_v22, %v1181_v58 }
 0x155   : > { %1443 = vadd.xlane.f32.xlu0 %v1442_v8  ;;  %2973 = vrsqrt.f32 %v1515_v57  ;;  %v1219_v40 = vpop.xlane.xlu1 %1218 }
 0x156   : > { %v1449_v45 = vadd.f32 %v1448_v33, %v1182_v38  ;;  %v1487_v20 = vmul.f32 0.0012755102, %v1219_v40 }
 0x158   : > { %v1451_v32 = vadd.f32 %v1450_v52, %v1449_v45  ;;  %v1517_v42 = vadd.f32 1e-05, %v1487_v20  ;;  %v4360_v52 = vld [vmem:[%s4331_s25 + $0x18] sm:$0xff]  ;;  %v1578_v45 = vld [vmem:[%s4324_s22 + $0x20] sm:$0xff] }
 0x15a   : > { %1452 = vadd.xlane.f32.xlu1 %v1451_v32  ;;  %2975 = vrsqrt.f32 %v1517_v42 }
 0x15c   : > { %v1228_v36 = vpop.xlane.xlu0 %1227 }
 0x15d   : > { %v1488_v56 = vmul.f32 0.0012755102, %v1228_v36 }
 0x15e   : > { %v2970_v35 = vpop.eup %2969 }
 0x15f   : > { %v1518_v26 = vadd.f32 1e-05, %v1488_v56  ;;  %v2972_v59 = vpop.eup %2971  ;;  %v1634_v7 = vmul.f32 %v2970_v35, %v1574_v53  ;;  %v4369_v53 = vld [vmem:[%s4331_s25 + $0x20] sm:$0xff]  ;;  %v1579_v35 = vld [vmem:[%s4324_s22 + $0x28] sm:$0xff] }
 0x160   : > { %v1636_v54 = vmul.f32 %v2972_v59, %v1576_v43 }
 0x161   : > { %2977 = vrsqrt.f32 %v1518_v26  ;;  %v1237_v29 = vpop.xlane.xlu1 %1236  ;;  %v4338_v58 = vmul.f32 %v1634_v7, %v3812_v39 }
 0x162   : > { %v2974_v46 = vpop.eup %2973  ;;  %v1489_v12 = vmul.f32 0.0012755102, %v1237_v29  ;;  %v4344_v61 = vmul.f32 %v1636_v54, %v3810_v3 }
 0x163   : > { %v1635_v48 = vmul.f32 %v2974_v46, %v1575_v41  ;;  %v4378_v46 = vld [vmem:[%s4331_s25 + $0x28] sm:$0xff] }
 0x164   : > { %v1519_v49 = vadd.f32 1e-05, %v1489_v12 }
 0x165   : > { %v4353_v60 = vmul.f32 %v1635_v48, %v3844_v55 }
 0x166   : > { %2979 = vrsqrt.f32 %v1519_v49  ;;  %v1246_v38 = vpop.xlane.xlu0 %1245 }
 0x167   : > { %v2976_v22 = vpop.eup %2975  ;;  %v1490_v8 = vmul.f32 0.0012755102, %v1246_v38 }
 0x168   : > { %v1637_v57 = vmul.f32 %v2976_v22, %v1577_v9 }
 0x169   : > { %v1520_v33 = vadd.f32 1e-05, %v1490_v8  ;;  %v4387_v8 = vld [vmem:[%s4331_s25 + $0x30] sm:$0xff] }
 0x16a   : > { %v4363_v40 = vmul.f32 %v1637_v57, %v3840_v10 }
 0x16b   : > { %2981 = vrsqrt.f32 %v1520_v33  ;;  %1726 = vperm.xlu0 %2967, %v1634_v7   ;;  %1731 = vperm.xlu1 %2968, %v1635_v48   ;;  %v1581_v33 = vld [vmem:[%s4324_s22 + $0x38] sm:$0xff] }
 0x16c   : > { %v1255_v55 = vpop.xlane.xlu1 %1254 }
 0x16d   : > { %v1491_v32 = vmul.f32 0.0012755102, %v1255_v55 }
 0x16e   : > { %v2978_v42 = vpop.eup %2977 }
 0x16f   : > { %v1521_v36 = vadd.f32 1e-05, %v1491_v32  ;;  %1736 = vperm.xlu1 %2968, %v1636_v54   ;;  %v1638_v56 = vmul.f32 %v2978_v42, %v1578_v45  ;;  %v1580_v54 = vld [vmem:[%s4324_s22 + $0x30] sm:$0xff] }
 0x171   : > { %2983 = vrsqrt.f32 %v1521_v36  ;;  %v1264_v10 = vpop.xlane.xlu0 %1263  ;;  %v4372_v43 = vmul.f32 %v1638_v56, %v3855_v47 }
 0x172   : > { %v1492_v26 = vmul.f32 0.0012755102, %v1264_v10  ;;  %v1582_v10 = vld [vmem:[%s4324_s22 + $0x40] sm:$0xff] }
 0x173   : > { %v2980_v59 = vpop.eup %2979  ;;  %1741 = vperm.xlu1 %2968, %v1637_v57  }
 0x174   : > { %v1522_v41 = vadd.f32 1e-05, %v1492_v26  ;;  %v1639_v29 = vmul.f32 %v2980_v59, %v1579_v35 }
 0x176   : > { %2985 = vrsqrt.f32 %v1522_v41  ;;  %v4382_v12 = vmul.f32 %v1639_v29, %v3857_v62 }
 0x177   : > { %v1273_v47 = vpop.xlane.xlu1 %1272  ;;  %1746 = vperm.xlu1 %2968, %v1638_v56   ;;  %v4396_v56 = vld [vmem:[%s4331_s25 + $0x38] sm:$0xff] }
 0x178   : > { %v2982_v48 = vpop.eup %2981  ;;  %v1493_v49 = vmul.f32 0.0012755102, %v1273_v47  ;;  %v4405_v47 = vld [vmem:[%s4331_s25 + $0x40] sm:$0xff] }
 0x179   : > { %v1640_v38 = vmul.f32 %v2982_v48, %v1580_v54 }
 0x17a   : > { %v1523_v22 = vadd.f32 1e-05, %v1493_v49 }
 0x17b   : > { %1751 = vperm.xlu1 %2968, %v1639_v29   ;;  %v4390_v57 = vmul.f32 %v1640_v38, %v3865_v0 }
 0x17c   : > { %2987 = vrsqrt.f32 %v1523_v22  ;;  %v1282_v62 = vpop.xlane.xlu0 %1281 }
 0x17d   : > { %v1494_v55 = vmul.f32 0.0012755102, %v1282_v62 }
 0x17e   : > { %v2984_v32 = vpop.eup %2983 }
 0x17f   : > { %v1524_v42 = vadd.f32 1e-05, %v1494_v55  ;;  %1756 = vperm.xlu1 %2968, %v1640_v38   ;;  %v1641_v36 = vmul.f32 %v2984_v32, %v1581_v33  ;;  %v4414_v32 = vld [vmem:[%s4331_s25 + $0x48] sm:$0xff] }
 0x181   : > { %2989 = vrsqrt.f32 %v1524_v42  ;;  %v4400_v0 = vmul.f32 %v1641_v36, %v3876_v24  ;;  %v1583_v24 = vld [vmem:[%s4324_s22 + $0x48] sm:$0xff]  ;;  %v1584_v42 = vld [vmem:[%s4324_s22 + $0x50] sm:$0xff] }
 0x182   : > { %v1291_v35 = vpop.xlane.xlu1 %1290 }
 0x183   : > { %v2986_v26 = vpop.eup %2985  ;;  %v1495_v59 = vmul.f32 0.0012755102, %v1291_v35  ;;  %1761 = vperm.xlu1 %2968, %v1641_v36  }
 0x184   : > { %v1642_v29 = vmul.f32 %v2986_v26, %v1582_v10 }
 0x185   : > { %v1525_v54 = vadd.f32 1e-05, %v1495_v59 }
 0x186   : > { %v4408_v48 = vmul.f32 %v1642_v29, %v3885_v23 }
 0x187   : > { %2991 = vrsqrt.f32 %v1525_v54  ;;  %v1300_v49 = vpop.xlane.xlu0 %1299  ;;  %1766 = vperm.xlu1 %2968, %v1642_v29   ;;  %v4423_v54 = vld [vmem:[%s4331_s25 + $0x50] sm:$0xff] }
 0x188   : > { %v1496_v38 = vmul.f32 0.0012755102, %v1300_v49 }
 0x189   : > { %v2988_v62 = vpop.eup %2987 }
 0x18a   : > { %v1526_v33 = vadd.f32 1e-05, %v1496_v38  ;;  %v1643_v55 = vmul.f32 %v2988_v62, %v1583_v24 }
 0x18c   : > { %2993 = vrsqrt.f32 %v1526_v33  ;;  %1771 = vperm.xlu0 %2967, %v1643_v55   ;;  %v4418_v23 = vmul.f32 %v1643_v55, %v3887_v31  ;;  %v1585_v31 = vld [vmem:[%s4324_s22 + $0x58] sm:$0xff] }
 0x18d   : > { %v1309_v36 = vpop.xlane.xlu1 %1308 }
 0x18e   : > { %v2990_v10 = vpop.eup %2989  ;;  %v1497_v35 = vmul.f32 0.0012755102, %v1309_v36 }
 0x18f   : > { %v1644_v59 = vmul.f32 %v2990_v10, %v1584_v42  ;;  %v4432_v42 = vld [vmem:[%s4331_s25 + $0x58] sm:$0xff]  ;;  %v1586_v10 = vld [vmem:[%s4324_s22 + $0x60] sm:$0xff] }
 0x190   : > { %v1527_v29 = vadd.f32 1e-05, %v1497_v35 }
 0x191   : > { %1776 = vperm.xlu1 %2968, %v1644_v59   ;;  %v4426_v49 = vmul.f32 %v1644_v59, %v3897_v25 }
 0x192   : > { %2995 = vrsqrt.f32 %v1527_v29  ;;  %v1318_v24 = vpop.xlane.xlu0 %1317 }
 0x193   : > { %v1498_v38 = vmul.f32 0.0012755102, %v1318_v24 }
 0x194   : > { %v2992_v33 = vpop.eup %2991 }
 0x195   : > { %v1528_v55 = vadd.f32 1e-05, %v1498_v38  ;;  %v1645_v36 = vmul.f32 %v2992_v33, %v1585_v31  ;;  %v4441_v31 = vld [vmem:[%s4331_s25 + $0x60] sm:$0xff] }
 0x197   : > { %2997 = vrsqrt.f32 %v1528_v55  ;;  %1781 = vperm.xlu0 %2967, %v1645_v36   ;;  %v4436_v25 = vmul.f32 %v1645_v36, %v3905_v51  ;;  %v1587_v51 = vld [vmem:[%s4324_s22 + $0x68] sm:$0xff] }
 0x198   : > { %v1327_v35 = vpop.xlane.xlu1 %1326 }
 0x199   : > { %v2994_v59 = vpop.eup %2993  ;;  %v1499_v29 = vmul.f32 0.0012755102, %v1327_v35 }
 0x19a   : > { %v1646_v26 = vmul.f32 %v2994_v59, %v1586_v10  ;;  %v4450_v10 = vld [vmem:[%s4331_s25 + $0x68] sm:$0xff]  ;;  %v1588_v59 = vld [vmem:[%s4324_s22 + $0x70] sm:$0xff] }
 0x19b   : > { %v1529_v38 = vadd.f32 1e-05, %v1499_v29 }
 0x19c   : > { %1786 = vperm.xlu1 %2968, %v1646_v26   ;;  %v4444_v33 = vmul.f32 %v1646_v26, %v3914_v19 }
 0x19d   : > { %2999 = vrsqrt.f32 %v1529_v38  ;;  %v1336_v55 = vpop.xlane.xlu0 %1335 }
 0x19e   : > { %v1500_v36 = vmul.f32 0.0012755102, %v1336_v55 }
 0x19f   : > { %v2996_v62 = vpop.eup %2995 }
 0x1a0   : > { %v1530_v41 = vadd.f32 1e-05, %v1500_v36  ;;  %v1647_v24 = vmul.f32 %v2996_v62, %v1587_v51  ;;  %v4459_v62 = vld [vmem:[%s4331_s25 + $0x70] sm:$0xff] }
 0x1a2   : > { %3001 = vrsqrt.f32 %v1530_v41  ;;  %1791 = vperm.xlu0 %2967, %v1647_v24   ;;  %v4454_v19 = vmul.f32 %v1647_v24, %v3923_v30  ;;  %v1589_v30 = vld [vmem:[%s4324_s22 + $0x78] sm:$0xff] }
 0x1a3   : > { %v1345_v26 = vpop.xlane.xlu1 %1344 }
 0x1a4   : > { %v2998_v29 = vpop.eup %2997  ;;  %v1501_v38 = vmul.f32 0.0012755102, %v1345_v26 }
 0x1a5   : > { %v1648_v35 = vmul.f32 %v2998_v29, %v1588_v59  ;;  %v4468_v59 = vld [vmem:[%s4331_s25 + $0x78] sm:$0xff] }
 0x1a6   : > { %v1531_v22 = vadd.f32 1e-05, %v1501_v38 }
 0x1a7   : > { %1796 = vperm.xlu1 %2968, %v1648_v35   ;;  %v4462_v41 = vmul.f32 %v1648_v35, %v3925_v50  ;;  %v1590_v50 = vld [vmem:[%s4324_s22 + $0x80] sm:$0xff] }
 0x1a8   : > { %3003 = vrsqrt.f32 %v1531_v22  ;;  %v1354_v51 = vpop.xlane.xlu0 %1353 }
 0x1a9   : > { %v1502_v24 = vmul.f32 0.0012755102, %v1354_v51 }
 0x1aa   : > { %v3000_v26 = vpop.eup %2999 }
 0x1ab   : > { %v1532_v9 = vadd.f32 1e-05, %v1502_v24  ;;  %v1649_v55 = vmul.f32 %v3000_v26, %v1589_v30  ;;  %v4477_v30 = vld [vmem:[%s4331_s25 + $0x80] sm:$0xff] }
 0x1ad   : > { %3005 = vrsqrt.f32 %v1532_v9  ;;  %v4471_v29 = vmul.f32 %v1649_v55, %v3946_v11  ;;  %1801 = vperm.xlu0 %2967, %v1649_v55   ;;  %v1591_v55 = vld [vmem:[%s4324_s22 + $0x88] sm:$0xff] }
 0x1ae   : > { %v1363_v22 = vpop.xlane.xlu1 %1362 }
 0x1af   : > { %v3002_v35 = vpop.eup %3001  ;;  %v1503_v38 = vmul.f32 0.0012755102, %v1363_v22 }
 0x1b0   : > { %v1650_v36 = vmul.f32 %v3002_v35, %v1590_v50  ;;  %v4486_v50 = vld [vmem:[%s4331_s25 + $0x88] sm:$0xff] }
 0x1b1   : > { %v1533_v45 = vadd.f32 1e-05, %v1503_v38 }
 0x1b2   : > { %1806 = vperm.xlu1 %2968, %v1650_v36   ;;  %v4480_v9 = vmul.f32 %v1650_v36, %v3952_v14  ;;  %v1592_v14 = vld [vmem:[%s4324_s22 + $0x90] sm:$0xff] }
 0x1b3   : > { %3007 = vrsqrt.f32 %v1533_v45  ;;  %v1372_v11 = vpop.xlane.xlu0 %1371 }
 0x1b4   : > { %v1504_v24 = vmul.f32 0.0012755102, %v1372_v11 }
 0x1b5   : > { %v3004_v22 = vpop.eup %3003 }
 0x1b6   : > { %v1534_v20 = vadd.f32 1e-05, %v1504_v24  ;;  %v1651_v51 = vmul.f32 %v3004_v22, %v1591_v55  ;;  %v4495_v24 = vld [vmem:[%s4331_s25 + $0x90] sm:$0xff] }
 0x1b8   : > { %3009 = vrsqrt.f32 %v1534_v20  ;;  %v4489_v35 = vmul.f32 %v1651_v51, %v3980_v16  ;;  %1811 = vperm.xlu0 %2967, %v1651_v51   ;;  %v1593_v51 = vld [vmem:[%s4324_s22 + $0x98] sm:$0xff] }
 0x1b9   : > { %v1381_v45 = vpop.xlane.xlu1 %1380 }
 0x1ba   : > { %v3006_v36 = vpop.eup %3005  ;;  %v1505_v38 = vmul.f32 0.0012755102, %v1381_v45 }
 0x1bb   : > { %v1652_v26 = vmul.f32 %v3006_v36, %v1592_v14  ;;  %v4504_v14 = vld [vmem:[%s4331_s25 + $0x98] sm:$0xff] }
 0x1bc   : > { %v1535_v7 = vadd.f32 1e-05, %v1505_v38 }
 0x1bd   : > { %1816 = vperm.xlu1 %2968, %v1652_v26   ;;  %v4498_v20 = vmul.f32 %v1652_v26, %v3986_v37  ;;  %v1594_v37 = vld [vmem:[%s4324_s22 + $0xa0] sm:$0xff] }
 0x1be   : > { %3011 = vrsqrt.f32 %v1535_v7  ;;  %v1390_v16 = vpop.xlane.xlu0 %1389 }
 0x1bf   : > { %v1506_v55 = vmul.f32 0.0012755102, %v1390_v16 }
 0x1c0   : > { %v3008_v45 = vpop.eup %3007 }
 0x1c1   : > { %v1536_v3 = vadd.f32 1e-05, %v1506_v55  ;;  %v1653_v11 = vmul.f32 %v3008_v45, %v1593_v51  ;;  %v4513_v55 = vld [vmem:[%s4331_s25 + $0xa0] sm:$0xff]  ;;  %v1595_v51 = vld [vmem:[%s4324_s22 + $0xa8] sm:$0xff] }
 0x1c3   : > { %3013 = vrsqrt.f32 %v1536_v3  ;;  %v1399_v36 = vpop.xlane.xlu1 %1398  ;;  %v4507_v38 = vmul.f32 %v1653_v11, %v4014_v4  ;;  %1821 = vperm.xlu0 %2967, %v1653_v11  }
 0x1c4   : > { %v1507_v7 = vmul.f32 0.0012755102, %v1399_v36 }
 0x1c5   : > { %v3010_v26 = vpop.eup %3009 }
 0x1c6   : > { %v1537_v22 = vadd.f32 1e-05, %v1507_v7  ;;  %v1654_v39 = vmul.f32 %v3010_v26, %v1594_v37  ;;  %v4522_v37 = vld [vmem:[%s4331_s25 + $0xa8] sm:$0xff] }
 0x1c7   : > { %5999 = vst [vmem:[#allocation4_spill] sm:$0xff] %v4522_v37 }
 0x1c8   : > { %3015 = vrsqrt.f32 %v1537_v22  ;;  %1826 = vperm.xlu1 %2968, %v1654_v39   ;;  %v4516_v3 = vmul.f32 %v1654_v39, %v4020_v6  ;;  %v1596_v6 = vld [vmem:[%s4324_s22 + $0xb0] sm:$0xff] }
 0x1c9   : > { %v1408_v4 = vpop.xlane.xlu0 %1407 }
 0x1ca   : > { %v1508_v11 = vmul.f32 0.0012755102, %v1408_v4 }
 0x1cb   : > { %v3012_v36 = vpop.eup %3011 }
 0x1cc   : > { %v1538_v63 = vadd.f32 1e-05, %v1508_v11  ;;  %v1655_v7 = vmul.f32 %v3012_v36, %v1595_v51  ;;  %v4531_v11 = vld [vmem:[%s4331_s25 + $0xb0] sm:$0xff] }
 0x1cd   : > { %6001 = vst [vmem:[#allocation6_spill] sm:$0xff] %v4531_v11 }
 0x1ce   : > { %3017 = vrsqrt.f32 %v1538_v63  ;;  %v1417_v26 = vpop.xlane.xlu1 %1416  ;;  %v4525_v22 = vmul.f32 %v1655_v7, %v4048_v17  ;;  %1831 = vperm.xlu0 %2967, %v1655_v7   ;;  %v1597_v63 = vld [vmem:[%s4324_s22 + $0xb8] sm:$0xff] }
 0x1cf   : > { %v1509_v39 = vmul.f32 0.0012755102, %v1417_v26 }
 0x1d0   : > { %6000 = vst [vmem:[#allocation5_spill] sm:$0xff] %v4525_v22  ;;  %v3014_v4 = vpop.eup %3013 }
 0x1d1   : > { %v1539_v45 = vadd.f32 1e-05, %v1509_v39  ;;  %v1656_v27 = vmul.f32 %v3014_v4, %v1596_v6  ;;  %v4540_v6 = vld [vmem:[%s4331_s25 + $0xb8] sm:$0xff] }
 0x1d2   : > { %6003 = vst [vmem:[#allocation8_spill] sm:$0xff] %v4540_v6 }
 0x1d3   : > { %3019 = vrsqrt.f32 %v1539_v45  ;;  %v1426_v51 = vpop.xlane.xlu0 %1425  ;;  %1836 = vperm.xlu1 %2968, %v1656_v27   ;;  %v4535_v17 = vmul.f32 %v1656_v27, %v4054_v21  ;;  %v1598_v21 = vld [vmem:[%s4324_s22 + $0xc0] sm:$0xff] }
 0x1d4   : > { %v1510_v36 = vmul.f32 0.0012755102, %v1426_v51 }
 0x1d5   : > { %6002 = vst [vmem:[#allocation7_spill] sm:$0xff] %v4535_v17  ;;  %v3016_v7 = vpop.eup %3015 }
 0x1d6   : > { %v1540_v5 = vadd.f32 1e-05, %v1510_v36  ;;  %v1657_v39 = vmul.f32 %v3016_v7, %v1597_v63  ;;  %v4549_v63 = vld [vmem:[%s4331_s25 + $0xc0] sm:$0xff] }
 0x1d8   : > { %3021 = vrsqrt.f32 %v1540_v5  ;;  %v1435_v45 = vpop.xlane.xlu1 %1434  ;;  %v4543_v4 = vmul.f32 %v1657_v39, %v4082_v28  ;;  %1841 = vperm.xlu0 %2967, %v1657_v39   ;;  %v1599_v5 = vld [vmem:[%s4324_s22 + $0xc8] sm:$0xff] }
 0x1d9   : > { %v1511_v16 = vmul.f32 0.0012755102, %v1435_v45 }
 0x1da   : > { %6004 = vst [vmem:[#allocation9_spill] sm:$0xff] %v4543_v4 }
 0x1db   : > { %v3018_v51 = vpop.eup %3017  ;;  %v1541_v22 = vadd.f32 1e-05, %v1511_v16  ;;  %v4558_v16 = vld [vmem:[%s4331_s25 + $0xc8] sm:$0xff] }
 0x1dc   : > { %v1658_v26 = vmul.f32 %v3018_v51, %v1598_v21  ;;  %v1600_v51 = vld [vmem:[%s4324_s22 + $0xd0] sm:$0xff] }
 0x1dd   : > { %3023 = vrsqrt.f32 %v1541_v22 }
 0x1de   : > { %v1444_v36 = vpop.xlane.xlu0 %1443  ;;  %1846 = vperm.xlu1 %2968, %v1658_v26   ;;  %v4553_v28 = vmul.f32 %v1658_v26, %v4088_v1 }
 0x1df   : > { %v1512_v7 = vmul.f32 0.0012755102, %v1444_v36 }
 0x1e0   : > { %v3020_v39 = vpop.eup %3019  ;;  %v1718_v45 = vsub.f32 %v4549_v63, %v4553_v28  ;;  %v1601_v63 = vld [vmem:[%s4324_s22 + $0xd8] sm:$0xff] }
 0x1e1   : > { %v1542_v27 = vadd.f32 1e-05, %v1512_v7  ;;  %v1659_v4 = vmul.f32 %v3020_v39, %v1599_v5  ;;  %v1631_v39 = vld [vmem:[%s4331_s25 + $0xd8] sm:$0xff] }
 0x1e3   : > { %3025 = vrsqrt.f32 %v1542_v27  ;;  %v1453_v22 = vpop.xlane.xlu1 %1452  ;;  %v1689_v21 = vmul.f32 %v1659_v4, %v4116_v34  ;;  %1851 = vperm.xlu0 %2967, %v1659_v4   ;;  %v1630_v27 = vld [vmem:[%s4331_s25 + $0xd0] sm:$0xff] }
 0x1e4   : > { %v1513_v1 = vmul.f32 0.0012755102, %v1453_v22  ;;  %v1602_v22 = vld [vmem:[%s4324_s22 + $0xe0] sm:$0xff] }
 0x1e5   : > { %v3022_v26 = vpop.eup %3021  ;;  %v1719_v36 = vsub.f32 %v4558_v16, %v1689_v21  ;;  %v1603_v21 = vld [vmem:[%s4324_s22 + $0xe8] sm:$0xff] }
 0x1e6   : > { %v1543_v6 = vadd.f32 1e-05, %v1513_v1  ;;  %v1660_v37 = vmul.f32 %v3022_v26, %v1600_v51  ;;  %v6005_v1 = vsub.f32 %v4335_v44, %v4338_v58  ;;  %v6010_v44 = vsub.f32 %v4387_v8, %v4390_v57 }
 0x1e7   : > { %v6011_v58 = vsub.f32 %v4378_v46, %v4382_v12  ;;  %v6018_v46 = vsub.f32 %v4459_v62, %v4462_v41  ;;  %v6019_v12 = vsub.f32 %v4450_v10, %v4454_v19  ;;  %v6020_v57 = vsub.f32 %v4477_v30, %v4480_v9  ;;  %v6032_v62 = vld [vmem:[#allocation8_spill] sm:$0xff]  ;;  %v6033_v41 = vld [vmem:[#allocation9_spill] sm:$0xff]  ;;  %v1632_v9 = vld [vmem:[%s4331_s25 + $0xe0] sm:$0xff] }
 0x1e8   : > { %3027 = vrsqrt.f32 %v1543_v6  ;;  %1856 = vperm.xlu1 %2968, %v1660_v37   ;;  %v1690_v5 = vmul.f32 %v1660_v37, %v4122_v13  ;;  %v6006_v13 = vsub.f32 %v4341_v18, %v4344_v61  ;;  %v6008_v37 = vsub.f32 %v4369_v53, %v4372_v43 }
 0x1e9   : > { %v6012_v18 = vsub.f32 %v4405_v47, %v4408_v48  ;;  %v6013_v61 = vsub.f32 %v4396_v56, %v4400_v0  ;;  %v6016_v53 = vsub.f32 %v4441_v31, %v4444_v33  ;;  %v6017_v43 = vsub.f32 %v4432_v42, %v4436_v25  ;;  %v6027_v42 = vld [vmem:[#allocation7_spill] sm:$0xff]  ;;  %v6029_v31 = vld [vmem:[#allocation4_spill] sm:$0xff]  ;;  %v6030_v33 = vld [vmem:[#allocation5_spill] sm:$0xff] }
 0x1ea   : > { %v3024_v28 = vpop.eup %3023  ;;  %v1720_v34 = vsub.f32 %v1630_v27, %v1690_v5  ;;  %v6021_v56 = vsub.f32 %v4468_v59, %v4471_v29  ;;  %v6022_v47 = vsub.f32 %v4495_v24, %v4498_v20  ;;  %v6023_v48 = vsub.f32 %v4486_v50, %v4489_v35  ;;  %v6035_v29 = vld [vmem:[#allocation2_spill] sm:$0xff]  ;;  %v6036_v24 = vld [vmem:[#allocation3_spill] sm:$0xff] }
 0x1eb   : > { %v1661_v7 = vmul.f32 %v3024_v28, %v1601_v63  ;;  %v6031_v10 = vsub.f32 %v6029_v31, %v6030_v33  ;;  %v6034_v59 = vsub.f32 %v6032_v62, %v6033_v41  ;;  %v3202_v5 = vld [vmem:[%s3457_s18] sm:$0xff]  ;;  %v3203_v27 = vld [vmem:[%s3457_s18 + $0x8] sm:$0xff] }
 0x1ec   : > { %v3222_v41 = vld [vmem:[%s3457_s18 + $0xa0] sm:$0xff] }
 0x1ed   : > { %v1691_v4 = vmul.f32 %v1661_v7, %v4150_v2  ;;  %1861 = vperm.xlu0 %2967, %v1661_v7   ;;  %v6007_v2 = vsub.f32 %v4347_v15, %v4353_v60  ;;  %v4597_v15 = vpop.permute.xlu1 %1731  ;;  %v6014_v60 = vsub.f32 %v4423_v54, %v4426_v49  ;;  %v6026_v49 = vld [vmem:[#allocation6_spill] sm:$0xff]  ;;  %v3204_v7 = vld [vmem:[%s3457_s18 + $0x10] sm:$0xff] }
 0x1ee   : > { %v6028_v25 = vsub.f32 %v6026_v49, %v6027_v42  ;;  %v3219_v42 = vld [vmem:[%s3457_s18 + $0x88] sm:$0xff] }
 0x1ef   : > { %v1721_v17 = vsub.f32 %v1631_v39, %v1691_v4  ;;  %v3205_v39 = vld [vmem:[%s3457_s18 + $0x18] sm:$0xff] }
 0x1f0   : > { %v3026_v11 = vpop.eup %3025 }
 0x1f1   : > { %v1662_v16 = vmul.f32 %v3026_v11, %v1602_v22  ;;  %v6009_v11 = vsub.f32 %v4360_v52, %v4363_v40  ;;  %v6015_v52 = vsub.f32 %v4414_v32, %v4418_v23  ;;  %v4605_v40 = vpop.permute.xlu1 %1736  ;;  %v6024_v32 = vsub.f32 %v4513_v55, %v4516_v3  ;;  %v1727_v55 = vpop.permute.xlu0 %1726  ;;  %v3206_v22 = vld [vmem:[%s3457_s18 + $0x20] sm:$0xff] }
 0x1f2   : > { %v6025_v23 = vsub.f32 %v4504_v14, %v4507_v38  ;;  %v1633_v14 = vld [vmem:[%s4331_s25 + $0xe8] sm:$0xff]  ;;  %v4674_v28 = vmul.f32 %v3203_v27, %v1727_v55  ;;  %v4680_v4 = vmul.f32 %v3205_v39, %v1727_v55 }
 0x1f3   : > { %1866 = vperm.xlu1 %2968, %v1662_v16   ;;  %v1692_v30 = vmul.f32 %v1662_v16, %v6035_v29  ;;  %v4683_v16 = vmul.f32 %v3206_v22, %v1727_v55  ;;  %v3223_v29 = vld [vmem:[%s3457_s18 + $0xa8] sm:$0xff]  ;;  %v3230_v22 = vld [vmem:[%s3457_s18 + $0xe0] sm:$0xff] }
 0x1f5   : > { %v3028_v51 = vpop.eup %3027  ;;  %v4619_v8 = vpop.permute.xlu1 %1741  ;;  %v1722_v35 = vsub.f32 %v1632_v9, %v1692_v30  ;;  %v3224_v9 = vld [vmem:[%s3457_s18 + $0xb0] sm:$0xff] }
 0x1f6   : > { %v1663_v6 = vmul.f32 %v3028_v51, %v1603_v21  ;;  %v3207_v21 = vld [vmem:[%s3457_s18 + $0x28] sm:$0xff]  ;;  %v4753_v30 = vmul.f32 %v3223_v29, %v4619_v8 }
 0x1f7   : > { %2086 = vperm.xlu1 %2968, %v6005_v1   ;;  %v4686_v51 = vmul.f32 %v3207_v21, %v1727_v55 }
 0x1f8   : > { %1871 = vperm.xlu0 %2967, %v1663_v6   ;;  %v1693_v20 = vmul.f32 %v1663_v6, %v6036_v24  ;;  %v3208_v6 = vld [vmem:[%s3457_s18 + $0x30] sm:$0xff]  ;;  %v3225_v24 = vld [vmem:[%s3457_s18 + $0xb8] sm:$0xff] }
 0x1f9   : > { %v4627_v0 = vpop.permute.xlu1 %1746  ;;  %v4689_v1 = vmul.f32 %v3208_v6, %v1727_v55  ;;  %v3231_v6 = vld [vmem:[%s3457_s18 + $0xe8] sm:$0xff] }
 0x1fa   : > { %v1723_v38 = vsub.f32 %v1633_v14, %v1693_v20  ;;  %v4761_v20 = vmul.f32 %v3225_v24, %v4619_v8  ;;  %v3226_v14 = vld [vmem:[%s3457_s18 + $0xc0] sm:$0xff]  ;;  %v4781_v21 = vmul.f32 %v3230_v22, %v4627_v0 }
 0x1fb   : > { %2096 = vperm.xlu1 %2968, %v6006_v13   ;;  %v3209_v13 = vld [vmem:[%s3457_s18 + $0x38] sm:$0xff] }
 0x1fc   : > { %2091 = vperm.xlu0 %2967, %v6007_v2   ;;  %v4693_v2 = vmul.f32 %v3209_v13, %v4597_v15  ;;  %6037 = vst [vmem:[#allocation6_spill] sm:$0xff] %v4781_v21  ;;  %v4785_v13 = vmul.f32 %v3231_v6, %v4627_v0  ;;  %v3243_v6 = vld [vmem:[%s3457_s18 + $0x148] sm:$0xff] }
 0x1fd   : > { %v4641_v54 = vpop.permute.xlu1 %1751 }
 0x1fe   : > { %6038 = vst [vmem:[#allocation7_spill] sm:$0xff] %v4785_v13 }
 0x1ff   : > { %2106 = vperm.xlu1 %2968, %v6008_v37   ;;  %v3210_v37 = vld [vmem:[%s3457_s18 + $0x40] sm:$0xff] }
 0x200   : > { %2101 = vperm.xlu0 %2967, %v6009_v11   ;;  %v4697_v11 = vmul.f32 %v3210_v37, %v4597_v15  ;;  %v3232_v37 = vld [vmem:[%s3457_s18 + $0xf0] sm:$0xff] }
 0x201   : > { %v4649_v19 = vpop.permute.xlu1 %1756 }
 0x203   : > { %2116 = vperm.xlu1 %2968, %v6010_v44   ;;  %v3211_v44 = vld [vmem:[%s3457_s18 + $0x48] sm:$0xff] }
 0x204   : > { %2111 = vperm.xlu0 %2967, %v6011_v58   ;;  %v4701_v58 = vmul.f32 %v3211_v44, %v4597_v15  ;;  %v4789_v44 = vmul.f32 %v3232_v37, %v4627_v0  ;;  %v4835_v37 = vmul.f32 %v3243_v6, %v4641_v54  ;;  %v3249_v6 = vld [vmem:[%s3457_s18 + $0x178] sm:$0xff] }
 0x205   : > { %v4656_v50 = vpop.permute.xlu1 %1761 }
 0x206   : > { %6039 = vst [vmem:[#allocation4_spill] sm:$0xff] %v4789_v44 }
 0x207   : > { %2126 = vperm.xlu1 %2968, %v6012_v18   ;;  %v3212_v18 = vld [vmem:[%s3457_s18 + $0x50] sm:$0xff] }
 0x208   : > { %2121 = vperm.xlu0 %2967, %v6013_v61   ;;  %v4705_v61 = vmul.f32 %v3212_v18, %v4597_v15  ;;  %v3233_v18 = vld [vmem:[%s3457_s18 + $0xf8] sm:$0xff] }
 0x209   : > { %v4660_v3 = vpop.permute.xlu1 %1766 }
 0x20b   : > { %2136 = vperm.xlu1 %2968, %v6014_v60  }
 0x20c   : > { %2131 = vperm.xlu0 %2967, %v6015_v52   ;;  %v3213_v52 = vld [vmem:[%s3457_s18 + $0x58] sm:$0xff] }
 0x20d   : > { %v4664_v26 = vpop.permute.xlu1 %1776 }
 0x20f   : > { %2146 = vperm.xlu1 %2968, %v6016_v53   ;;  %v4711_v53 = vmul.f32 %v3213_v52, %v4597_v15  ;;  %v3234_v52 = vld [vmem:[%s3457_s18 + $0x100] sm:$0xff] }
 0x210   : > { %2141 = vperm.xlu0 %2967, %v6017_v43   ;;  %v3214_v43 = vld [vmem:[%s3457_s18 + $0x60] sm:$0xff] }
 0x213   : > { %2156 = vperm.xlu1 %2968, %v6018_v46   ;;  %v4715_v46 = vmul.f32 %v3214_v43, %v4597_v15  ;;  %v4797_v43 = vmul.f32 %v3234_v52, %v4627_v0 }
 0x214   : > { %2151 = vperm.xlu0 %2967, %v6019_v12   ;;  %v3215_v12 = vld [vmem:[%s3457_s18 + $0x68] sm:$0xff] }
 0x215   : > { %6041 = vst [vmem:[#allocation8_spill] sm:$0xff] %v4797_v43 }
 0x217   : > { %2166 = vperm.xlu1 %2968, %v6020_v57   ;;  %v4668_v63 = vpop.permute.xlu1 %1786  ;;  %v4719_v57 = vmul.f32 %v3215_v12, %v4597_v15  ;;  %v4735_v15 = vmul.f32 %v3219_v42, %v4605_v40  ;;  %v3235_v12 = vld [vmem:[%s3457_s18 + $0x108] sm:$0xff] }
 0x218   : > { %2161 = vperm.xlu0 %2967, %v6021_v56   ;;  %v3216_v56 = vld [vmem:[%s3457_s18 + $0x70] sm:$0xff] }
 0x21b   : > { %2176 = vperm.xlu1 %2968, %v6022_v47   ;;  %v4723_v47 = vmul.f32 %v3216_v56, %v4605_v40  ;;  %v4801_v56 = vmul.f32 %v3235_v12, %v4627_v0 }
 0x21c   : > { %2171 = vperm.xlu0 %2967, %v6023_v48   ;;  %v3217_v48 = vld [vmem:[%s3457_s18 + $0x78] sm:$0xff] }
 0x21d   : > { %6042 = vst [vmem:[#allocation9_spill] sm:$0xff] %v4801_v56  ;;  %v3260_v56 = vld [vmem:[%s3457_s18 + $0x1d0] sm:$0xff] }
 0x21f   : > { %2186 = vperm.xlu1 %2968, %v6024_v32   ;;  %v4727_v32 = vmul.f32 %v3217_v48, %v4605_v40  ;;  %v3236_v48 = vld [vmem:[%s3457_s18 + $0x110] sm:$0xff] }
 0x220   : > { %2181 = vperm.xlu0 %2967, %v6025_v23   ;;  %v3218_v23 = vld [vmem:[%s3457_s18 + $0x80] sm:$0xff] }
 0x221   : > { %v4731_v49 = vmul.f32 %v3218_v23, %v4605_v40  ;;  %v4805_v23 = vmul.f32 %v3236_v48, %v4627_v0  ;;  %v3245_v48 = vld [vmem:[%s3457_s18 + $0x158] sm:$0xff] }
 0x222   : > { %v4741_v33 = vpop.permute.xlu1 %1796 }
 0x223   : > { %2196 = vperm.xlu1 %2968, %v6028_v25   ;;  %v3220_v25 = vld [vmem:[%s3457_s18 + $0x90] sm:$0xff]  ;;  %6043 = vst [vmem:[#allocation2_spill] sm:$0xff] %v4805_v23  ;;  %v3259_v23 = vld [vmem:[%s3457_s18 + $0x1c8] sm:$0xff] }
 0x224   : > { %2191 = vperm.xlu0 %2967, %v6031_v10   ;;  %v4739_v31 = vmul.f32 %v3220_v25, %v4605_v40  ;;  %v3221_v10 = vld [vmem:[%s3457_s18 + $0x98] sm:$0xff] }
 0x225   : > { %v4745_v62 = vmul.f32 %v3221_v10, %v4605_v40  ;;  %v3237_v25 = vld [vmem:[%s3457_s18 + $0x118] sm:$0xff] }
 0x226   : > { %v4811_v10 = vmul.f32 %v3237_v25, %v4641_v54  ;;  %v4845_v25 = vmul.f32 %v3245_v48, %v4649_v19  ;;  %v3250_v48 = vld [vmem:[%s3457_s18 + $0x180] sm:$0xff] }
 0x227   : > { %2206 = vperm.xlu1 %2968, %v1718_v45   ;;  %v4662_v45 = vpop.permute.xlu0 %1771 }
 0x228   : > { %2201 = vperm.xlu0 %2967, %v6034_v59   ;;  %v4749_v59 = vmul.f32 %v3222_v41, %v4605_v40  ;;  %v4765_v40 = vmul.f32 %v3226_v14, %v4619_v8  ;;  %v3238_v41 = vld [vmem:[%s3457_s18 + $0x120] sm:$0xff]  ;;  %6045 = vst [vmem:[#allocation10_spill] sm:$0xff] %v4845_v25 }
 0x229   : > { %v4815_v29 = vmul.f32 %v3238_v41, %v4641_v54  ;;  %v3246_v41 = vld [vmem:[%s3457_s18 + $0x160] sm:$0xff] }
 0x22b   : > { %2216 = vperm.xlu1 %2968, %v1720_v34   ;;  %v4677_v34 = vmul.f32 %v3204_v7, %v1727_v55  ;;  %v3229_v7 = vld [vmem:[%s3457_s18 + $0xd8] sm:$0xff] }
 0x22c   : > { %2211 = vperm.xlu0 %2967, %v1719_v36   ;;  %v4666_v36 = vpop.permute.xlu0 %1781  ;;  %v4777_v39 = vmul.f32 %v3229_v7, %v4619_v8  ;;  %v3242_v7 = vld [vmem:[%s3457_s18 + $0x140] sm:$0xff] }
 0x22d   : > { %v4831_v22 = vmul.f32 %v3242_v7, %v4641_v54  ;;  %v4841_v12 = vpop.permute.xlu1 %1806 }
 0x22f   : > { %2226 = vperm.xlu1 %2968, %v1722_v35   ;;  %v4757_v35 = vmul.f32 %v3224_v9, %v4619_v8  ;;  %v3239_v9 = vld [vmem:[%s3457_s18 + $0x128] sm:$0xff] }
 0x230   : > { %2221 = vperm.xlu0 %2967, %v1721_v17   ;;  %v4671_v17 = vmul.f32 %v3202_v5, %v1727_v55  ;;  %v4707_v60 = vpop.permute.xlu0 %1791  ;;  %v3228_v5 = vld [vmem:[%s3457_s18 + $0xd0] sm:$0xff]  ;;  %v4819_v24 = vmul.f32 %v3239_v9, %v4641_v54  ;;  %v4849_v9 = vmul.f32 %v3246_v41, %v4649_v19  ;;  %v4865_v41 = vmul.f32 %v3250_v48, %v4649_v19 }
 0x231   : > { %v4773_v27 = vmul.f32 %v3228_v5, %v4619_v8 }
 0x232   : > { %6046 = vst [vmem:[#allocation11_spill] sm:$0xff] %v4849_v9  ;;  %6050 = vst [vmem:[#allocation15_spill] sm:$0xff] %v4865_v41  ;;  %v3251_v9 = vld [vmem:[%s3457_s18 + $0x188] sm:$0xff] }
 0x234   : > { %2231 = vperm.xlu0 %2967, %v1723_v38   ;;  %v3227_v38 = vld [vmem:[%s3457_s18 + $0xc8] sm:$0xff]  ;;  %v4807_v42 = vpop.permute.xlu0 %1801 }
 0x235   : > { %v4769_v55 = vmul.f32 %v3227_v38, %v4619_v8  ;;  %v4793_v8 = vmul.f32 %v3233_v18, %v4627_v0  ;;  %v3240_v0 = vld [vmem:[%s3457_s18 + $0x130] sm:$0xff]  ;;  %v3241_v38 = vld [vmem:[%s3457_s18 + $0x138] sm:$0xff] }
 0x236   : > { %v4823_v14 = vmul.f32 %v3240_v0, %v4641_v54  ;;  %v4827_v5 = vmul.f32 %v3241_v38, %v4641_v54  ;;  %v3244_v18 = vld [vmem:[%s3457_s18 + $0x150] sm:$0xff]  ;;  %v3247_v54 = vld [vmem:[%s3457_s18 + $0x168] sm:$0xff] }
 0x237   : > { %6040 = vst [vmem:[#allocation5_spill] sm:$0xff] %v4793_v8  ;;  %v4839_v52 = vmul.f32 %v3244_v18, %v4649_v19  ;;  %v4853_v0 = vmul.f32 %v3247_v54, %v4649_v19  ;;  %v3248_v38 = vld [vmem:[%s3457_s18 + $0x170] sm:$0xff]  ;;  %v4861_v18 = vmul.f32 %v3249_v6, %v4649_v19  ;;  %v4869_v54 = vmul.f32 %v3251_v9, %v4656_v50  ;;  %v3254_v6 = vld [vmem:[%s3457_s18 + $0x1a0] sm:$0xff]  ;;  %v3265_v8 = vld [vmem:[%s3457_s18 + $0x1f8] sm:$0xff] }
 0x238   : > { %v4857_v7 = vmul.f32 %v3248_v38, %v4649_v19  ;;  %v3255_v19 = vld [vmem:[%s3457_s18 + $0x1a8] sm:$0xff]  ;;  %v3256_v9 = vld [vmem:[%s3457_s18 + $0x1b0] sm:$0xff]  ;;  %v4907_v43 = vpop.permute.xlu0 %1811 }
 0x239   : > { %6044 = vst [vmem:[#allocation3_spill] sm:$0xff] %v4839_v52  ;;  %6047 = vst [vmem:[#allocation12_spill] sm:$0xff] %v4853_v0  ;;  %v3252_v0 = vld [vmem:[%s3457_s18 + $0x190] sm:$0xff]  ;;  %v4885_v48 = vmul.f32 %v3255_v19, %v4656_v50  ;;  %v4889_v41 = vmul.f32 %v3256_v9, %v4656_v50  ;;  %v3258_v52 = vld [vmem:[%s3457_s18 + $0x1c0] sm:$0xff]  ;;  %v4901_v19 = vmul.f32 %v3259_v23, %v4660_v3 }
 0x23a   : > { %6048 = vst [vmem:[#allocation13_spill] sm:$0xff] %v4857_v7  ;;  %6049 = vst [vmem:[#allocation14_spill] sm:$0xff] %v4861_v18  ;;  %v4873_v38 = vmul.f32 %v3252_v0, %v4656_v50  ;;  %v3253_v7 = vld [vmem:[%s3457_s18 + $0x198] sm:$0xff]  ;;  %v4881_v18 = vmul.f32 %v3254_v6, %v4656_v50  ;;  %v4897_v6 = vmul.f32 %v3258_v52, %v4660_v3  ;;  %v3262_v52 = vld [vmem:[%s3457_s18 + $0x1e0] sm:$0xff] }
 0x23b   : > { %v4877_v25 = vmul.f32 %v3253_v7, %v4656_v50  ;;  %v3257_v0 = vld [vmem:[%s3457_s18 + $0x1b8] sm:$0xff]  ;;  %6052 = vst [vmem:[#allocation17_spill] sm:$0xff] %v4901_v19  ;;  %v4905_v9 = vmul.f32 %v3260_v56, %v4660_v3  ;;  %v3263_v23 = vld [vmem:[%s3457_s18 + $0x1e8] sm:$0xff]  ;;  %v3264_v56 = vld [vmem:[%s3457_s18 + $0x1f0] sm:$0xff] }
 0x23c   : > { %v4893_v7 = vmul.f32 %v3257_v0, %v4656_v50  ;;  %6051 = vst [vmem:[#allocation16_spill] sm:$0xff] %v4897_v6  ;;  %v3261_v50 = vld [vmem:[%s3457_s18 + $0x1d8] sm:$0xff]  ;;  %v4915_v6 = vmul.f32 %v3262_v52, %v4660_v3  ;;  %v4919_v19 = vmul.f32 %v3263_v23, %v4660_v3 }
 0x23d   : > { %6053 = vst [vmem:[#allocation18_spill] sm:$0xff] %v4905_v9  ;;  %v4911_v0 = vmul.f32 %v3261_v50, %v4660_v3  ;;  %v4923_v9 = vmul.f32 %v3264_v56, %v4660_v3  ;;  %v4927_v50 = vmul.f32 %v3265_v8, %v4662_v45  ;;  %v4941_v56 = vpop.permute.xlu1 %1816  ;;  %v3269_v8 = vld [vmem:[%s3457_s18 + $0x218] sm:$0xff] }
 0x23e   : > { %6055 = vst [vmem:[#allocation20_spill] sm:$0xff] %v4915_v6  ;;  %6056 = vst [vmem:[#allocation21_spill] sm:$0xff] %v4919_v19  ;;  %v3267_v6 = vld [vmem:[%s3457_s18 + $0x208] sm:$0xff]  ;;  %v3268_v19 = vld [vmem:[%s3457_s18 + $0x210] sm:$0xff] }
 0x23f   : > { %6054 = vst [vmem:[#allocation19_spill] sm:$0xff] %v4911_v0  ;;  %6057 = vst [vmem:[#allocation22_spill] sm:$0xff] %v4923_v9  ;;  %v3266_v0 = vld [vmem:[%s3457_s18 + $0x200] sm:$0xff]  ;;  %v4935_v23 = vmul.f32 %v3267_v6, %v4662_v45  ;;  %v4939_v3 = vmul.f32 %v3268_v19, %v4662_v45  ;;  %v4945_v9 = vmul.f32 %v3269_v8, %v4662_v45  ;;  %v3271_v6 = vld [vmem:[%s3457_s18 + $0x228] sm:$0xff] }
 0x240   : > { %v4931_v52 = vmul.f32 %v3266_v0, %v4662_v45  ;;  %v3270_v0 = vld [vmem:[%s3457_s18 + $0x220] sm:$0xff]  ;;  %v4953_v13 = vmul.f32 %v3271_v6, %v4662_v45  ;;  %v3272_v19 = vld [vmem:[%s3457_s18 + $0x230] sm:$0xff] }
 0x241   : > { %6058 = vst [vmem:[#allocation23_spill] sm:$0xff] %v4939_v3  ;;  %6059 = vst [vmem:[#allocation24_spill] sm:$0xff] %v4945_v9  ;;  %v4949_v44 = vmul.f32 %v3270_v0, %v4662_v45  ;;  %v4957_v21 = vmul.f32 %v3272_v19, %v4664_v26  ;;  %v3273_v3 = vld [vmem:[%s3457_s18 + $0x238] sm:$0xff]  ;;  %v3274_v9 = vld [vmem:[%s3457_s18 + $0x240] sm:$0xff] }
 0x242   : > { %6061 = vst [vmem:[#allocation26_spill] sm:$0xff] %v4953_v13  ;;  %v4961_v8 = vmul.f32 %v3273_v3, %v4664_v26  ;;  %v4965_v0 = vmul.f32 %v3274_v9, %v4664_v26  ;;  %v3276_v6 = vld [vmem:[%s3457_s18 + $0x250] sm:$0xff]  ;;  %v3279_v9 = vld [vmem:[%s3457_s18 + $0x258] sm:$0xff] }
 0x243   : > { %6060 = vst [vmem:[#allocation25_spill] sm:$0xff] %v4949_v44  ;;  %6062 = vst [vmem:[#allocation27_spill] sm:$0xff] %v4957_v21  ;;  %v3275_v44 = vld [vmem:[%s3457_s18 + $0x248] sm:$0xff]  ;;  %v4973_v19 = vmul.f32 %v3276_v6, %v4664_v26  ;;  %v3278_v3 = vld [vmem:[%s3457_s18 + $0x270] sm:$0xff] }
 0x244   : > { %6063 = vst [vmem:[#allocation28_spill] sm:$0xff] %v4961_v8  ;;  %6064 = vst [vmem:[#allocation29_spill] sm:$0xff] %v4965_v0  ;;  %v4969_v45 = vmul.f32 %v3275_v44, %v4664_v26  ;;  %v3277_v21 = vld [vmem:[%s3457_s18 + $0x268] sm:$0xff]  ;;  %v4981_v8 = vmul.f32 %v3278_v3, %v4666_v36  ;;  %v4985_v0 = vmul.f32 %v3279_v9, %v4664_v26  ;;  %v3280_v44 = vld [vmem:[%s3457_s18 + $0x260] sm:$0xff] }
 0x245   : > { %6066 = vst [vmem:[#allocation31_spill] sm:$0xff] %v4973_v19  ;;  %v4977_v13 = vmul.f32 %v3277_v21, %v4666_v36  ;;  %v3281_v6 = vld [vmem:[%s3457_s18 + $0x278] sm:$0xff]  ;;  %v3282_v19 = vld [vmem:[%s3457_s18 + $0x280] sm:$0xff] }
 0x246   : > { %6065 = vst [vmem:[#allocation30_spill] sm:$0xff] %v4969_v45  ;;  %6067 = vst [vmem:[#allocation32_spill] sm:$0xff] %v4981_v8  ;;  %v4989_v45 = vmul.f32 %v3280_v44, %v4664_v26  ;;  %v4993_v21 = vmul.f32 %v3281_v6, %v4666_v36  ;;  %v4997_v3 = vmul.f32 %v3282_v19, %v4666_v36  ;;  %v3283_v8 = vld [vmem:[%s3457_s18 + $0x288] sm:$0xff]  ;;  %v5007_v44 = vpop.permute.xlu0 %1821  ;;  %v3285_v6 = vld [vmem:[%s3457_s18 + $0x298] sm:$0xff] }
 0x247   : > { %6068 = vst [vmem:[#allocation33_spill] sm:$0xff] %v4985_v0  ;;  %v5001_v9 = vmul.f32 %v3283_v8, %v4666_v36  ;;  %v3284_v0 = vld [vmem:[%s3457_s18 + $0x290] sm:$0xff]  ;;  %v3286_v19 = vld [vmem:[%s3457_s18 + $0x2a0] sm:$0xff]  ;;  %v3287_v8 = vld [vmem:[%s3457_s18 + $0x2a8] sm:$0xff] }
 0x248   : > { %6069 = vst [vmem:[#allocation34_spill] sm:$0xff] %v4989_v45  ;;  %6070 = vst [vmem:[#allocation35_spill] sm:$0xff] %v4993_v21  ;;  %v5005_v26 = vmul.f32 %v3284_v0, %v4666_v36  ;;  %v5011_v45 = vmul.f32 %v3285_v6, %v4666_v36  ;;  %v3288_v0 = vld [vmem:[%s3457_s18 + $0x2b0] sm:$0xff]  ;;  %v3289_v21 = vld [vmem:[%s3457_s18 + $0x2b8] sm:$0xff] }
 0x249   : > { %6071 = vst [vmem:[#allocation36_spill] sm:$0xff] %v4997_v3  ;;  %6072 = vst [vmem:[#allocation37_spill] sm:$0xff] %v5001_v9  ;;  %v5015_v3 = vmul.f32 %v3286_v19, %v4668_v63  ;;  %v5019_v9 = vmul.f32 %v3287_v8, %v4668_v63  ;;  %v5027_v36 = vmul.f32 %v3289_v21, %v4668_v63  ;;  %v3290_v6 = vld [vmem:[%s3457_s18 + $0x2c0] sm:$0xff]  ;;  %v3293_v21 = vld [vmem:[%s3457_s18 + $0x2d8] sm:$0xff] }
 0x24a   : > { %6073 = vst [vmem:[#allocation38_spill] sm:$0xff] %v5005_v26  ;;  %6074 = vst [vmem:[#allocation39_spill] sm:$0xff] %v5011_v45  ;;  %v5023_v26 = vmul.f32 %v3288_v0, %v4668_v63  ;;  %v5031_v19 = vmul.f32 %v3290_v6, %v4668_v63  ;;  %v3294_v6 = vld [vmem:[%s3457_s18 + $0x2e0] sm:$0xff] }
 0x24b   : > { %6075 = vst [vmem:[#allocation40_spill] sm:$0xff] %v5015_v3  ;;  %6076 = vst [vmem:[#allocation41_spill] sm:$0xff] %v5019_v9  ;;  %v3291_v3 = vld [vmem:[%s3457_s18 + $0x2c8] sm:$0xff]  ;;  %v3292_v9 = vld [vmem:[%s3457_s18 + $0x2d0] sm:$0xff] }
 0x24c   : > { %6077 = vst [vmem:[#allocation42_spill] sm:$0xff] %v5023_v26  ;;  %6078 = vst [vmem:[#allocation43_spill] sm:$0xff] %v5027_v36  ;;  %v5035_v8 = vmul.f32 %v3291_v3, %v4668_v63  ;;  %v5039_v0 = vmul.f32 %v3292_v9, %v4668_v63  ;;  %v5041_v26 = vpop.permute.xlu1 %1826  ;;  %v5045_v36 = vmul.f32 %v3293_v21, %v4707_v60  ;;  %v3295_v3 = vld [vmem:[%s3457_s18 + $0x2e8] sm:$0xff]  ;;  %v3296_v63 = vld [vmem:[%s3457_s18 + $0x2f0] sm:$0xff] }
 0x24d   : > { %6079 = vst [vmem:[#allocation44_spill] sm:$0xff] %v5031_v19  ;;  %v5049_v19 = vmul.f32 %v3294_v6, %v4707_v60  ;;  %v5057_v9 = vmul.f32 %v3296_v63, %v4707_v60 }
 0x24e   : > { %6080 = vst [vmem:[#allocation45_spill] sm:$0xff] %v5035_v8  ;;  %6081 = vst [vmem:[#allocation46_spill] sm:$0xff] %v5039_v0  ;;  %v5053_v8 = vmul.f32 %v3295_v3, %v4707_v60  ;;  %v3297_v0 = vld [vmem:[%s3457_s18 + $0x2f8] sm:$0xff] }
 0x24f   : > { %6082 = vst [vmem:[#allocation47_spill] sm:$0xff] %v5045_v36  ;;  %6083 = vst [vmem:[#allocation48_spill] sm:$0xff] %v5049_v19  ;;  %v5061_v21 = vmul.f32 %v3297_v0, %v4707_v60  ;;  %v3298_v36 = vld [vmem:[%s3457_s18 + $0x300] sm:$0xff]  ;;  %v3299_v19 = vld [vmem:[%s3457_s18 + $0x308] sm:$0xff] }
 0x250   : > { %6084 = vst [vmem:[#allocation49_spill] sm:$0xff] %v5053_v8  ;;  %6085 = vst [vmem:[#allocation50_spill] sm:$0xff] %v5057_v9  ;;  %v5065_v6 = vmul.f32 %v3298_v36, %v4707_v60  ;;  %v5069_v3 = vmul.f32 %v3299_v19, %v4707_v60  ;;  %v3300_v8 = vld [vmem:[%s3457_s18 + $0x310] sm:$0xff]  ;;  %v3301_v9 = vld [vmem:[%s3457_s18 + $0x318] sm:$0xff] }
 0x251   : > { %6086 = vst [vmem:[#allocation51_spill] sm:$0xff] %v5061_v21  ;;  %v5073_v63 = vmul.f32 %v3300_v8, %v4741_v33  ;;  %v5077_v45 = vmul.f32 %v3301_v9, %v4741_v33  ;;  %v3302_v0 = vld [vmem:[%s3457_s18 + $0x320] sm:$0xff]  ;;  %v3303_v36 = vld [vmem:[%s3457_s18 + $0x328] sm:$0xff]  ;;  %v3304_v60 = vld [vmem:[%s3457_s18 + $0x330] sm:$0xff] }
 0x252   : > { %6087 = vst [vmem:[#allocation52_spill] sm:$0xff] %v5065_v6  ;;  %v5081_v21 = vmul.f32 %v3302_v0, %v4741_v33  ;;  %v5085_v6 = vmul.f32 %v3303_v36, %v4741_v33  ;;  %v5089_v19 = vmul.f32 %v3304_v60, %v4741_v33  ;;  %v3305_v8 = vld [vmem:[%s3457_s18 + $0x348] sm:$0xff] }
 0x253   : > { %6088 = vst [vmem:[#allocation53_spill] sm:$0xff] %v5073_v63  ;;  %6089 = vst [vmem:[#allocation54_spill] sm:$0xff] %v5077_v45  ;;  %v5093_v9 = vmul.f32 %v3305_v8, %v4807_v42  ;;  %v3306_v45 = vld [vmem:[%s3457_s18 + $0x350] sm:$0xff]  ;;  %v3309_v8 = vld [vmem:[%s3457_s18 + $0x358] sm:$0xff] }
 0x254   : > { %6090 = vst [vmem:[#allocation55_spill] sm:$0xff] %v5081_v21  ;;  %6091 = vst [vmem:[#allocation56_spill] sm:$0xff] %v5085_v6  ;;  %v5097_v0 = vmul.f32 %v3306_v45, %v4807_v42  ;;  %v3307_v21 = vld [vmem:[%s3457_s18 + $0x338] sm:$0xff]  ;;  %v3308_v6 = vld [vmem:[%s3457_s18 + $0x340] sm:$0xff]  ;;  %v5111_v63 = vmul.f32 %v3309_v8, %v4807_v42 }
 0x255   : > { %6092 = vst [vmem:[#allocation57_spill] sm:$0xff] %v5089_v19  ;;  %6093 = vst [vmem:[#allocation58_spill] sm:$0xff] %v5093_v9  ;;  %v5101_v36 = vmul.f32 %v3307_v21, %v4741_v33  ;;  %v5105_v60 = vmul.f32 %v3308_v6, %v4741_v33  ;;  %v5107_v19 = vpop.permute.xlu0 %1831  ;;  %v3310_v45 = vld [vmem:[%s3457_s18 + $0x360] sm:$0xff]  ;;  %v3311_v21 = vld [vmem:[%s3457_s18 + $0x368] sm:$0xff] }
 0x256   : > { %6094 = vst [vmem:[#allocation59_spill] sm:$0xff] %v5097_v0  ;;  %6097 = vst [vmem:[#allocation62_spill] sm:$0xff] %v5111_v63  ;;  %v5115_v0 = vmul.f32 %v3310_v45, %v4807_v42  ;;  %v3312_v33 = vld [vmem:[%s3457_s18 + $0x370] sm:$0xff]  ;;  %v3314_v63 = vld [vmem:[%s3457_s18 + $0x380] sm:$0xff] }
 0x257   : > { %6095 = vst [vmem:[#allocation60_spill] sm:$0xff] %v5101_v36  ;;  %6096 = vst [vmem:[#allocation61_spill] sm:$0xff] %v5105_v60  ;;  %v5119_v36 = vmul.f32 %v3311_v21, %v4807_v42  ;;  %v5123_v6 = vmul.f32 %v3312_v33, %v4807_v42  ;;  %v3313_v60 = vld [vmem:[%s3457_s18 + $0x378] sm:$0xff]  ;;  %v5131_v45 = vmul.f32 %v3314_v63, %v4841_v12  ;;  %v3318_v63 = vld [vmem:[%s3457_s18 + $0x3a0] sm:$0xff] }
 0x258   : > { %6098 = vst [vmem:[#allocation63_spill] sm:$0xff] %v5115_v0  ;;  %v5127_v8 = vmul.f32 %v3313_v60, %v4807_v42  ;;  %v3315_v0 = vld [vmem:[%s3457_s18 + $0x388] sm:$0xff]  ;;  %v3317_v42 = vld [vmem:[%s3457_s18 + $0x398] sm:$0xff] }
 0x259   : > { %6099 = vst [vmem:[#allocation64_spill] sm:$0xff] %v5119_v36  ;;  %6100 = vst [vmem:[#allocation65_spill] sm:$0xff] %v5123_v6  ;;  %v5135_v21 = vmul.f32 %v3315_v0, %v4841_v12  ;;  %v3316_v36 = vld [vmem:[%s3457_s18 + $0x390] sm:$0xff]  ;;  %v5141_v6 = vpop.permute.xlu1 %1836  ;;  %v5145_v60 = vmul.f32 %v3317_v42, %v4841_v12  ;;  %v3319_v0 = vld [vmem:[%s3457_s18 + $0x3a8] sm:$0xff] }
 0x25a   : > { %6101 = vst [vmem:[#allocation66_spill] sm:$0xff] %v5127_v8  ;;  %6102 = vst [vmem:[#allocation67_spill] sm:$0xff] %v5131_v45  ;;  %v5139_v33 = vmul.f32 %v3316_v36, %v4841_v12  ;;  %v5149_v45 = vmul.f32 %v3318_v63, %v4841_v12  ;;  %v3320_v36 = vld [vmem:[%s3457_s18 + $0x3b0] sm:$0xff]  ;;  %v3321_v8 = vld [vmem:[%s3457_s18 + $0x3b8] sm:$0xff] }
 0x25b   : > { %6103 = vst [vmem:[#allocation68_spill] sm:$0xff] %v5135_v21  ;;  %6105 = vst [vmem:[#allocation70_spill] sm:$0xff] %v5145_v60  ;;  %v5153_v21 = vmul.f32 %v3319_v0, %v4841_v12  ;;  %v5161_v9 = vmul.f32 %v3321_v8, %v4907_v43  ;;  %v3322_v42 = vld [vmem:[%s3457_s18 + $0x3c0] sm:$0xff]  ;;  %v3323_v63 = vld [vmem:[%s3457_s18 + $0x3c8] sm:$0xff] }
 0x25c   : > { %6104 = vst [vmem:[#allocation69_spill] sm:$0xff] %v5139_v33  ;;  %6106 = vst [vmem:[#allocation71_spill] sm:$0xff] %v5149_v45  ;;  %v5157_v33 = vmul.f32 %v3320_v36, %v4841_v12  ;;  %v5165_v60 = vmul.f32 %v3322_v42, %v4907_v43  ;;  %v5169_v45 = vmul.f32 %v3323_v63, %v4907_v43  ;;  %v3324_v0 = vld [vmem:[%s3457_s18 + $0x3d0] sm:$0xff]  ;;  %v3325_v12 = vld [vmem:[%s3457_s18 + $0x3d8] sm:$0xff] }
 0x25d   : > { %6107 = vst [vmem:[#allocation72_spill] sm:$0xff] %v5153_v21  ;;  %v5173_v21 = vmul.f32 %v3324_v0, %v4907_v43  ;;  %v5177_v8 = vmul.f32 %v3325_v12, %v4907_v43  ;;  %v3326_v36 = vld [vmem:[%s3457_s18 + $0x3e0] sm:$0xff]  ;;  %v3329_v12 = vld [vmem:[%s3457_s18 + $0x3f8] sm:$0xff] }
 0x25e   : > { %6108 = vst [vmem:[#allocation73_spill] sm:$0xff] %v5157_v33  ;;  %6109 = vst [vmem:[#allocation74_spill] sm:$0xff] %v5165_v60  ;;  %v5181_v42 = vmul.f32 %v3326_v36, %v4907_v43  ;;  %v3327_v33 = vld [vmem:[%s3457_s18 + $0x3e8] sm:$0xff]  ;;  %v3330_v36 = vld [vmem:[%s3457_s18 + $0x400] sm:$0xff] }
 0x25f   : > { %6110 = vst [vmem:[#allocation75_spill] sm:$0xff] %v5169_v45  ;;  %6111 = vst [vmem:[#allocation76_spill] sm:$0xff] %v5173_v21  ;;  %v5185_v63 = vmul.f32 %v3327_v33, %v4907_v43  ;;  %v3328_v45 = vld [vmem:[%s3457_s18 + $0x3f0] sm:$0xff]  ;;  %v5191_v21 = vpop.permute.xlu0 %1841  ;;  %v3331_v43 = vld [vmem:[%s3457_s18 + $0x408] sm:$0xff] }
 0x260   : > { %6112 = vst [vmem:[#allocation77_spill] sm:$0xff] %v5177_v8  ;;  %6113 = vst [vmem:[#allocation78_spill] sm:$0xff] %v5181_v42  ;;  %v5189_v0 = vmul.f32 %v3328_v45, %v4941_v56  ;;  %v5195_v8 = vmul.f32 %v3329_v12, %v4941_v56  ;;  %v5199_v42 = vmul.f32 %v3330_v36, %v4941_v56  ;;  %v3332_v45 = vld [vmem:[%s3457_s18 + $0x410] sm:$0xff]  ;;  %v3335_v36 = vld [vmem:[%s3457_s18 + $0x418] sm:$0xff] }
 0x261   : > { %6114 = vst [vmem:[#allocation79_spill] sm:$0xff] %v5185_v63  ;;  %v5203_v33 = vmul.f32 %v3331_v43, %v4941_v56  ;;  %v3333_v63 = vld [vmem:[%s3457_s18 + $0x428] sm:$0xff]  ;;  %v3334_v12 = vld [vmem:[%s3457_s18 + $0x430] sm:$0xff]  ;;  %v3336_v43 = vld [vmem:[%s3457_s18 + $0x420] sm:$0xff] }
 0x262   : > { %6115 = vst [vmem:[#allocation80_spill] sm:$0xff] %v5189_v0  ;;  %6116 = vst [vmem:[#allocation81_spill] sm:$0xff] %v5195_v8  ;;  %v5207_v0 = vmul.f32 %v3332_v45, %v4941_v56  ;;  %v5211_v60 = vmul.f32 %v3333_v63, %v5007_v44  ;;  %v5215_v8 = vmul.f32 %v3334_v12, %v5007_v44  ;;  %v3337_v45 = vld [vmem:[%s3457_s18 + $0x438] sm:$0xff] }
 0x263   : > { %6117 = vst [vmem:[#allocation82_spill] sm:$0xff] %v5199_v42  ;;  %6118 = vst [vmem:[#allocation83_spill] sm:$0xff] %v5203_v33  ;;  %v5219_v42 = vmul.f32 %v3335_v36, %v4941_v56  ;;  %v5223_v33 = vmul.f32 %v3336_v43, %v4941_v56  ;;  %v5227_v63 = vmul.f32 %v3337_v45, %v5007_v44  ;;  %v5241_v43 = vpop.permute.xlu1 %1846  ;;  %v3341_v45 = vld [vmem:[%s3457_s18 + $0x458] sm:$0xff] }
 0x264   : > { %6119 = vst [vmem:[#allocation84_spill] sm:$0xff] %v5207_v0  ;;  %6120 = vst [vmem:[#allocation85_spill] sm:$0xff] %v5211_v60  ;;  %v3338_v0 = vld [vmem:[%s3457_s18 + $0x440] sm:$0xff]  ;;  %v3403_v60 = vld [vmem:[%s3457_s18 + $0x648] sm:$0xff] }
 0x265   : > { %6121 = vst [vmem:[#allocation86_spill] sm:$0xff] %v5215_v8  ;;  %6122 = vst [vmem:[#allocation87_spill] sm:$0xff] %v5219_v42  ;;  %v5231_v12 = vmul.f32 %v3338_v0, %v5007_v44  ;;  %v3339_v8 = vld [vmem:[%s3457_s18 + $0x448] sm:$0xff]  ;;  %v3340_v42 = vld [vmem:[%s3457_s18 + $0x450] sm:$0xff] }
 0x266   : > { %6123 = vst [vmem:[#allocation88_spill] sm:$0xff] %v5223_v33  ;;  %6124 = vst [vmem:[#allocation89_spill] sm:$0xff] %v5227_v63  ;;  %v5235_v36 = vmul.f32 %v3339_v8, %v5007_v44  ;;  %v5239_v56 = vmul.f32 %v3340_v42, %v5007_v44  ;;  %v5245_v33 = vmul.f32 %v3341_v45, %v5007_v44  ;;  %v3342_v0 = vld [vmem:[%s3457_s18 + $0x460] sm:$0xff]  ;;  %v3343_v8 = vld [vmem:[%s3457_s18 + $0x468] sm:$0xff] }
 0x267   : > { %6125 = vst [vmem:[#allocation90_spill] sm:$0xff] %v5231_v12  ;;  %v5249_v12 = vmul.f32 %v3342_v0, %v5041_v26  ;;  %v3344_v42 = vld [vmem:[%s3457_s18 + $0x470] sm:$0xff]  ;;  %v3345_v63 = vld [vmem:[%s3457_s18 + $0x478] sm:$0xff]  ;;  %v3346_v45 = vld [vmem:[%s3457_s18 + $0x480] sm:$0xff] }
 0x268   : > { %6126 = vst [vmem:[#allocation91_spill] sm:$0xff] %v5235_v36  ;;  %6127 = vst [vmem:[#allocation92_spill] sm:$0xff] %v5239_v56  ;;  %v5253_v36 = vmul.f32 %v3343_v8, %v5041_v26  ;;  %v5257_v56 = vmul.f32 %v3344_v42, %v5041_v26  ;;  %v5261_v44 = vmul.f32 %v3345_v63, %v5041_v26  ;;  %v3349_v42 = vld [vmem:[%s3457_s18 + $0x498] sm:$0xff]  ;;  %v3350_v63 = vld [vmem:[%s3457_s18 + $0x4a0] sm:$0xff] }
 0x269   : > { %6128 = vst [vmem:[#allocation93_spill] sm:$0xff] %v5245_v33  ;;  %6129 = vst [vmem:[#allocation94_spill] sm:$0xff] %v5249_v12  ;;  %v5265_v0 = vmul.f32 %v3346_v45, %v5041_v26  ;;  %v3347_v12 = vld [vmem:[%s3457_s18 + $0x488] sm:$0xff] }
 0x26a   : > { %6130 = vst [vmem:[#allocation95_spill] sm:$0xff] %v5253_v36  ;;  %6131 = vst [vmem:[#allocation96_spill] sm:$0xff] %v5257_v56  ;;  %v5269_v8 = vmul.f32 %v3347_v12, %v5041_v26  ;;  %v3348_v36 = vld [vmem:[%s3457_s18 + $0x490] sm:$0xff]  ;;  %v5277_v56 = vmul.f32 %v3349_v42, %v5107_v19  ;;  %v3351_v45 = vld [vmem:[%s3457_s18 + $0x4a8] sm:$0xff] }
 0x26b   : > { %6132 = vst [vmem:[#allocation97_spill] sm:$0xff] %v5261_v44  ;;  %6133 = vst [vmem:[#allocation98_spill] sm:$0xff] %v5265_v0  ;;  %v5273_v33 = vmul.f32 %v3348_v36, %v5041_v26  ;;  %v5281_v44 = vmul.f32 %v3350_v63, %v5107_v19  ;;  %v5285_v0 = vmul.f32 %v3351_v45, %v5107_v19  ;;  %v3352_v12 = vld [vmem:[%s3457_s18 + $0x4b0] sm:$0xff]  ;;  %v3353_v36 = vld [vmem:[%s3457_s18 + $0x4b8] sm:$0xff] }
 0x26c   : > { %6134 = vst [vmem:[#allocation99_spill] sm:$0xff] %v5269_v8  ;;  %6136 = vst [vmem:[#allocation101_spill] sm:$0xff] %v5277_v56  ;;  %v5289_v26 = vmul.f32 %v3352_v12, %v5107_v19  ;;  %v5293_v42 = vmul.f32 %v3353_v36, %v5107_v19  ;;  %v3355_v8 = vld [vmem:[%s3457_s18 + $0x4c8] sm:$0xff] }
 0x26d   : > { %6135 = vst [vmem:[#allocation100_spill] sm:$0xff] %v5273_v33  ;;  %6137 = vst [vmem:[#allocation102_spill] sm:$0xff] %v5281_v44  ;;  %v3354_v33 = vld [vmem:[%s3457_s18 + $0x4c0] sm:$0xff]  ;;  %v5301_v45 = vmul.f32 %v3355_v8, %v5107_v19  ;;  %v3356_v44 = vld [vmem:[%s3457_s18 + $0x4d0] sm:$0xff] }
 0x26e   : > { %6138 = vst [vmem:[#allocation103_spill] sm:$0xff] %v5285_v0  ;;  %6139 = vst [vmem:[#allocation104_spill] sm:$0xff] %v5289_v26  ;;  %v5297_v63 = vmul.f32 %v3354_v33, %v5107_v19  ;;  %v1852_v0 = vpop.permute.xlu0 %1851  ;;  %v5305_v12 = vmul.f32 %v3356_v44, %v5141_v6  ;;  %v3357_v26 = vld [vmem:[%s3457_s18 + $0x4d8] sm:$0xff]  ;;  %v3360_v8 = vld [vmem:[%s3457_s18 + $0x4f0] sm:$0xff] }
 0x26f   : > { %6140 = vst [vmem:[#allocation105_spill] sm:$0xff] %v5293_v42  ;;  %6142 = vst [vmem:[#allocation107_spill] sm:$0xff] %v5301_v45  ;;  %v5309_v36 = vmul.f32 %v3357_v26, %v5141_v6  ;;  %v3358_v42 = vld [vmem:[%s3457_s18 + $0x4e0] sm:$0xff]  ;;  %v5321_v45 = vmul.f32 %v3360_v8, %v5141_v6  ;;  %v3361_v44 = vld [vmem:[%s3457_s18 + $0x508] sm:$0xff] }
 0x270   : > { %6141 = vst [vmem:[#allocation106_spill] sm:$0xff] %v5297_v63  ;;  %6143 = vst [vmem:[#allocation108_spill] sm:$0xff] %v5305_v12  ;;  %v5313_v33 = vmul.f32 %v3358_v42, %v5141_v6  ;;  %v3359_v63 = vld [vmem:[%s3457_s18 + $0x4e8] sm:$0xff]  ;;  %v5325_v26 = vmul.f32 %v3361_v44, %v5191_v21  ;;  %v3365_v12 = vld [vmem:[%s3457_s18 + $0x518] sm:$0xff] }
 0x271   : > { %6144 = vst [vmem:[#allocation109_spill] sm:$0xff] %v5309_v36  ;;  %v5317_v19 = vmul.f32 %v3359_v63, %v5141_v6  ;;  %6147 = vst [vmem:[#allocation112_spill] sm:$0xff] %v5321_v45  ;;  %v3362_v36 = vld [vmem:[%s3457_s18 + $0x510] sm:$0xff]  ;;  %v1857_v45 = vpop.permute.xlu1 %1856  ;;  %v5341_v44 = vmul.f32 %v3365_v12, %v5191_v21 }
 0x272   : > { %6145 = vst [vmem:[#allocation110_spill] sm:$0xff] %v5313_v33  ;;  %6148 = vst [vmem:[#allocation113_spill] sm:$0xff] %v5325_v26  ;;  %v5329_v42 = vmul.f32 %v3362_v36, %v5191_v21  ;;  %v3363_v33 = vld [vmem:[%s3457_s18 + $0x4f8] sm:$0xff]  ;;  %v3366_v26 = vld [vmem:[%s3457_s18 + $0x520] sm:$0xff] }
 0x273   : > { %6146 = vst [vmem:[#allocation111_spill] sm:$0xff] %v5317_v19  ;;  %v5333_v63 = vmul.f32 %v3363_v33, %v5141_v6  ;;  %v3364_v19 = vld [vmem:[%s3457_s18 + $0x500] sm:$0xff]  ;;  %6152 = vst [vmem:[#allocation117_spill] sm:$0xff] %v5341_v44  ;;  %v5345_v36 = vmul.f32 %v3366_v26, %v5191_v21 }
 0x274   : > { %6149 = vst [vmem:[#allocation114_spill] sm:$0xff] %v5329_v42  ;;  %v5337_v8 = vmul.f32 %v3364_v19, %v5141_v6  ;;  %v3367_v42 = vld [vmem:[%s3457_s18 + $0x528] sm:$0xff]  ;;  %v3369_v19 = vld [vmem:[%s3457_s18 + $0x538] sm:$0xff] }
 0x275   : > { %6150 = vst [vmem:[#allocation115_spill] sm:$0xff] %v5333_v63  ;;  %6153 = vst [vmem:[#allocation118_spill] sm:$0xff] %v5345_v36  ;;  %v5349_v33 = vmul.f32 %v3367_v42, %v5191_v21  ;;  %v3368_v63 = vld [vmem:[%s3457_s18 + $0x530] sm:$0xff]  ;;  %v5357_v12 = vmul.f32 %v3369_v19, %v5191_v21  ;;  %v3371_v36 = vld [vmem:[%s3457_s18 + $0x548] sm:$0xff] }
 0x276   : > { %6151 = vst [vmem:[#allocation116_spill] sm:$0xff] %v5337_v8  ;;  %v5353_v6 = vmul.f32 %v3368_v63, %v5191_v21  ;;  %v3370_v8 = vld [vmem:[%s3457_s18 + $0x540] sm:$0xff]  ;;  %v5365_v42 = vmul.f32 %v3371_v36, %v5241_v43  ;;  %v3376_v36 = vld [vmem:[%s3457_s18 + $0x570] sm:$0xff] }
 0x277   : > { %6154 = vst [vmem:[#allocation119_spill] sm:$0xff] %v5349_v33  ;;  %6156 = vst [vmem:[#allocation121_spill] sm:$0xff] %v5357_v12  ;;  %v5361_v26 = vmul.f32 %v3370_v8, %v5241_v43  ;;  %v3372_v33 = vld [vmem:[%s3457_s18 + $0x550] sm:$0xff]  ;;  %v3374_v21 = vld [vmem:[%s3457_s18 + $0x560] sm:$0xff]  ;;  %v1862_v12 = vpop.permute.xlu0 %1861 }
 0x278   : > { %6155 = vst [vmem:[#allocation120_spill] sm:$0xff] %v5353_v6  ;;  %6158 = vst [vmem:[#allocation123_spill] sm:$0xff] %v5365_v42  ;;  %v5369_v63 = vmul.f32 %v3372_v33, %v5241_v43  ;;  %v3373_v6 = vld [vmem:[%s3457_s18 + $0x558] sm:$0xff]  ;;  %v5377_v19 = vmul.f32 %v3374_v21, %v5241_v43  ;;  %v3375_v8 = vld [vmem:[%s3457_s18 + $0x568] sm:$0xff]  ;;  %v5385_v42 = vmul.f32 %v3376_v36, %v5241_v43 }
 0x279   : > { %6157 = vst [vmem:[#allocation122_spill] sm:$0xff] %v5361_v26  ;;  %v5373_v44 = vmul.f32 %v3373_v6, %v5241_v43  ;;  %v5381_v26 = vmul.f32 %v3375_v8, %v5241_v43  ;;  %v3377_v33 = vld [vmem:[%s3457_s18 + $0x578] sm:$0xff]  ;;  %v3378_v6 = vld [vmem:[%s3457_s18 + $0x580] sm:$0xff]  ;;  %v3379_v21 = vld [vmem:[%s3457_s18 + $0x588] sm:$0xff] }
 0x27a   : > { %6159 = vst [vmem:[#allocation124_spill] sm:$0xff] %v5369_v63  ;;  %6161 = vst [vmem:[#allocation126_spill] sm:$0xff] %v5377_v19  ;;  %v5388_v63 = vmul.f32 %v3377_v33, %v1852_v0  ;;  %v5394_v19 = vmul.f32 %v3379_v21, %v1852_v0  ;;  %v3380_v8 = vld [vmem:[%s3457_s18 + $0x590] sm:$0xff]  ;;  %v3381_v43 = vld [vmem:[%s3457_s18 + $0x598] sm:$0xff] }
 0x27b   : > { %6160 = vst [vmem:[#allocation125_spill] sm:$0xff] %v5373_v44  ;;  %6162 = vst [vmem:[#allocation127_spill] sm:$0xff] %v5381_v26  ;;  %v5391_v44 = vmul.f32 %v3378_v6, %v1852_v0  ;;  %v5397_v26 = vmul.f32 %v3380_v8, %v1852_v0  ;;  %v5400_v36 = vmul.f32 %v3381_v43, %v1852_v0  ;;  %v3382_v33 = vld [vmem:[%s3457_s18 + $0x5a0] sm:$0xff]  ;;  %v3383_v6 = vld [vmem:[%s3457_s18 + $0x5a8] sm:$0xff] }
 0x27c   : > { %6163 = vst [vmem:[#allocation128_spill] sm:$0xff] %v5385_v42  ;;  %6164 = vst [vmem:[#allocation129_spill] sm:$0xff] %v5388_v63  ;;  %v5403_v42 = vmul.f32 %v3382_v33, %v1852_v0  ;;  %v3384_v21 = vld [vmem:[%s3457_s18 + $0x5b0] sm:$0xff]  ;;  %v3385_v8 = vld [vmem:[%s3457_s18 + $0x5b8] sm:$0xff] }
 0x27d   : > { %6165 = vst [vmem:[#allocation130_spill] sm:$0xff] %v5391_v44  ;;  %6166 = vst [vmem:[#allocation131_spill] sm:$0xff] %v5394_v19  ;;  %v5406_v44 = vmul.f32 %v3383_v6, %v1852_v0  ;;  %v5409_v19 = vmul.f32 %v3384_v21, %v1857_v45  ;;  %v3386_v63 = vld [vmem:[%s3457_s18 + $0x5c0] sm:$0xff]  ;;  %v1867_v6 = vpop.permute.xlu1 %1866  ;;  %v3389_v21 = vld [vmem:[%s3457_s18 + $0x5e8] sm:$0xff] }
 0x27e   : > { %6167 = vst [vmem:[#allocation132_spill] sm:$0xff] %v5397_v26  ;;  %6168 = vst [vmem:[#allocation133_spill] sm:$0xff] %v5400_v36  ;;  %v5412_v26 = vmul.f32 %v3385_v8, %v1857_v45  ;;  %v5415_v43 = vmul.f32 %v3386_v63, %v1857_v45  ;;  %v3387_v36 = vld [vmem:[%s3457_s18 + $0x5c8] sm:$0xff]  ;;  %v3390_v8 = vld [vmem:[%s3457_s18 + $0x5f0] sm:$0xff] }
 0x27f   : > { %6169 = vst [vmem:[#allocation134_spill] sm:$0xff] %v5403_v42  ;;  %6170 = vst [vmem:[#allocation135_spill] sm:$0xff] %v5406_v44  ;;  %v5418_v33 = vmul.f32 %v3387_v36, %v1857_v45  ;;  %v3388_v42 = vld [vmem:[%s3457_s18 + $0x5d0] sm:$0xff]  ;;  %v3391_v63 = vld [vmem:[%s3457_s18 + $0x5d8] sm:$0xff] }
 0x280   : > { %6171 = vst [vmem:[#allocation136_spill] sm:$0xff] %v5409_v19  ;;  %6172 = vst [vmem:[#allocation137_spill] sm:$0xff] %v5412_v26  ;;  %v5421_v0 = vmul.f32 %v3388_v42, %v1857_v45  ;;  %v5424_v19 = vmul.f32 %v3389_v21, %v1862_v12  ;;  %v5427_v26 = vmul.f32 %v3390_v8, %v1862_v12  ;;  %v3392_v36 = vld [vmem:[%s3457_s18 + $0x5e0] sm:$0xff]  ;;  %v3393_v42 = vld [vmem:[%s3457_s18 + $0x5f8] sm:$0xff] }
 0x281   : > { %6173 = vst [vmem:[#allocation138_spill] sm:$0xff] %v5415_v43  ;;  %6174 = vst [vmem:[#allocation139_spill] sm:$0xff] %v5418_v33  ;;  %v5430_v43 = vmul.f32 %v3391_v63, %v1857_v45  ;;  %v5433_v33 = vmul.f32 %v3392_v36, %v1857_v45  ;;  %v3394_v44 = vld [vmem:[%s3457_s18 + $0x600] sm:$0xff]  ;;  %v3395_v21 = vld [vmem:[%s3457_s18 + $0x608] sm:$0xff] }
 0x282   : > { %6175 = vst [vmem:[#allocation140_spill] sm:$0xff] %v5421_v0  ;;  %6176 = vst [vmem:[#allocation141_spill] sm:$0xff] %v5424_v19  ;;  %v5436_v0 = vmul.f32 %v3393_v42, %v1862_v12  ;;  %v5439_v56 = vmul.f32 %v3394_v44, %v1862_v12  ;;  %v5442_v19 = vmul.f32 %v3395_v21, %v1862_v12  ;;  %v3396_v8 = vld [vmem:[%s3457_s18 + $0x610] sm:$0xff]  ;;  %v3397_v63 = vld [vmem:[%s3457_s18 + $0x618] sm:$0xff] }
 0x283   : > { %6177 = vst [vmem:[#allocation142_spill] sm:$0xff] %v5427_v26  ;;  %6178 = vst [vmem:[#allocation143_spill] sm:$0xff] %v5430_v43  ;;  %v5445_v26 = vmul.f32 %v3396_v8, %v1862_v12  ;;  %v5448_v43 = vmul.f32 %v3397_v63, %v1862_v12  ;;  %v3398_v45 = vld [vmem:[%s3457_s18 + $0x620] sm:$0xff]  ;;  %v3399_v42 = vld [vmem:[%s3457_s18 + $0x628] sm:$0xff]  ;;  %v5466_v12 = vmul.f32 %v3403_v60, %v1867_v6 }
 0x284   : > { %6179 = vst [vmem:[#allocation144_spill] sm:$0xff] %v5433_v33  ;;  %6180 = vst [vmem:[#allocation145_spill] sm:$0xff] %v5436_v0  ;;  %v5451_v36 = vmul.f32 %v3398_v45, %v1867_v6  ;;  %v5454_v33 = vmul.f32 %v3399_v42, %v1867_v6  ;;  %v3400_v44 = vld [vmem:[%s3457_s18 + $0x630] sm:$0xff]  ;;  %v2087_v0 = vpop.permute.xlu1 %2086  ;;  %v3401_v21 = vld [vmem:[%s3457_s18 + $0x638] sm:$0xff]  ;;  %v5471_v42 = vpop.permute.xlu0 %1871 }
 0x285   : > { %6181 = vst [vmem:[#allocation146_spill] sm:$0xff] %v5439_v56  ;;  %6182 = vst [vmem:[#allocation147_spill] sm:$0xff] %v5442_v19  ;;  %v5457_v56 = vmul.f32 %v3400_v44, %v1867_v6  ;;  %v5460_v19 = vmul.f32 %v3401_v21, %v1867_v6  ;;  %v3402_v8 = vld [vmem:[%s3457_s18 + $0x640] sm:$0xff]  ;;  %v3404_v63 = vld [vmem:[%s3457_s18 + $0x650] sm:$0xff]  ;;  %v2234_v44 = vadd.f32 %v2087_v0, %v4671_v17 }
 0x286   : > { %6183 = vst [vmem:[#allocation148_spill] sm:$0xff] %v5445_v26  ;;  %6184 = vst [vmem:[#allocation149_spill] sm:$0xff] %v5454_v33  ;;  %v5463_v26 = vmul.f32 %v3402_v8, %v1867_v6  ;;  %v5469_v45 = vmul.f32 %v3404_v63, %v1867_v6  ;;  %v2236_v33 = vadd.f32 %v2087_v0, %v4677_v34 }
 0x287   : > { %6185 = vst [vmem:[#allocation150_spill] sm:$0xff] %v5457_v56  ;;  %6186 = vst [vmem:[#allocation151_spill] sm:$0xff] %v5460_v19  ;;  %v2235_v56 = vadd.f32 %v2087_v0, %v4674_v28  ;;  %v2237_v21 = vadd.f32 %v2087_v0, %v4680_v4  ;;  %v2238_v8 = vadd.f32 %v2087_v0, %v4683_v16  ;;  %v2444_v63 = vmax.f32 %v2234_v44, 0.0 }
 0x288   : > { %6187 = vst [vmem:[#allocation152_spill] sm:$0xff] %v5463_v26  ;;  %6188 = vst [vmem:[#allocation153_spill] sm:$0xff] %v5466_v12  ;;  %v2239_v60 = vadd.f32 %v2087_v0, %v4686_v51  ;;  %v2240_v12 = vadd.f32 %v2087_v0, %v4689_v1  ;;  %v3405_v26 = vld [vmem:[%s3457_s18 + $0x658] sm:$0xff]  ;;  %v2446_v17 = vmax.f32 %v2236_v33, 0.0  ;;  %v2097_v16 = vpop.permute.xlu1 %2096  ;;  %v3406_v51 = vld [vmem:[%s3457_s18 + $0x660] sm:$0xff] }
 0x289   : > { %6189 = vst [vmem:[#allocation154_spill] sm:$0xff] %v5469_v45  ;;  %v5482_v6 = vmul.f32 %v3405_v26, %v5471_v42  ;;  %v2445_v45 = vmax.f32 %v2235_v56, 0.0  ;;  %v2447_v19 = vmax.f32 %v2237_v21, 0.0  ;;  %v2448_v28 = vmax.f32 %v2238_v8, 0.0  ;;  %v2092_v56 = vpop.permute.xlu0 %2091  ;;  %2654 = vst [vmem:[%s5489_s28] sm:$0xff] %v2444_v63 }
 0x28a   : > { %v2449_v34 = vmax.f32 %v2239_v60, 0.0  ;;  %v2450_v4 = vmax.f32 %v2240_v12, 0.0  ;;  %v5493_v1 = vmul.f32 %v3406_v51, %v5471_v42  ;;  %2656 = vst [vmem:[%s5489_s28 + $0x10] sm:$0xff] %v2446_v17  ;;  %v5500_v26 = vadd.f32 %v2097_v16, %v4723_v47 }
 0x28b   : > { %2655 = vst [vmem:[%s5489_s28 + $0x8] sm:$0xff] %v2445_v45  ;;  %2657 = vst [vmem:[%s5489_s28 + $0x18] sm:$0xff] %v2447_v19  ;;  %v5503_v33 = vadd.f32 %v2097_v16, %v4727_v32  ;;  %v5506_v0 = vadd.f32 %v2097_v16, %v4731_v49  ;;  %v5509_v12 = vadd.f32 %v2097_v16, %v4735_v15 }
 0x28c   : > { %v2241_v44 = vadd.f32 %v2092_v56, %v4693_v2  ;;  %v2242_v21 = vadd.f32 %v2092_v56, %v4697_v11  ;;  %v2243_v45 = vadd.f32 %v2092_v56, %v4701_v58  ;;  %v2244_v19 = vadd.f32 %v2092_v56, %v4705_v61  ;;  %2658 = vst [vmem:[%s5489_s28 + $0x20] sm:$0xff] %v2448_v28 }
 0x28d   : > { %2659 = vst [vmem:[%s5489_s28 + $0x28] sm:$0xff] %v2449_v34  ;;  %2660 = vst.msk [vmem:[%s5489_s28 + $0x30] sm:$0xff] %vm438_vm0, %v2450_v4  ;;  %v2245_v47 = vadd.f32 %v2092_v56, %v4711_v53  ;;  %v2246_v32 = vadd.f32 %v2092_v56, %v4715_v46  ;;  %v2247_v2 = vadd.f32 %v2092_v56, %v4719_v57  ;;  %v2102_v17 = vpop.permute.xlu0 %2101 }
 0x28e   : > { %v5523_v11 = vadd.f32 %v2097_v16, %v4739_v31  ;;  %v2451_v58 = vmax.f32 %v2241_v44, 0.0  ;;  %v2452_v49 = vmax.f32 %v2242_v21, 0.0  ;;  %v2453_v61 = vmax.f32 %v2243_v45, 0.0 }
 0x28f   : > { %v2454_v15 = vmax.f32 %v2244_v19, 0.0  ;;  %v2455_v8 = vmax.f32 %v2245_v47, 0.0  ;;  %v2456_v60 = vmax.f32 %v2246_v32, 0.0  ;;  %v2457_v63 = vmax.f32 %v2247_v2, 0.0 }
 0x290   : > { %v5526_v53 = vadd.f32 %v2097_v16, %v4745_v62  ;;  %2661 = vst [vmem:[%s5489_s28 + $0x38] sm:$0xff] %v2451_v58  ;;  %2662 = vst [vmem:[%s5489_s28 + $0x40] sm:$0xff] %v2452_v49  ;;  %v2255_v46 = vadd.f32 %v2102_v17, %v4753_v30  ;;  %v2256_v57 = vadd.f32 %v2102_v17, %v4757_v35 }
 0x291   : > { %2663 = vst [vmem:[%s5489_s28 + $0x48] sm:$0xff] %v2453_v61  ;;  %2664 = vst [vmem:[%s5489_s28 + $0x50] sm:$0xff] %v2454_v15  ;;  %v2257_v31 = vadd.f32 %v2102_v17, %v4761_v20  ;;  %v2258_v28 = vadd.f32 %v2102_v17, %v4765_v40  ;;  %v2259_v62 = vadd.f32 %v2102_v17, %v4769_v55  ;;  %v2112_v45 = vpop.permute.xlu0 %2111  ;;  %v2458_v55 = vmax.f32 %v5500_v26, 0.0 }
 0x292   : > { %2665 = vst [vmem:[%s5489_s28 + $0x58] sm:$0xff] %v2455_v8  ;;  %2666 = vst [vmem:[%s5489_s28 + $0x60] sm:$0xff] %v2456_v60  ;;  %v2260_v34 = vadd.f32 %v2102_v17, %v4773_v27  ;;  %v2261_v30 = vadd.f32 %v2102_v17, %v4777_v39  ;;  %v5544_v35 = vadd.f32 %v2097_v16, %v4749_v59  ;;  %v2465_v20 = vmax.f32 %v2255_v46, 0.0 }
 0x293   : > { %2667 = vst.msk [vmem:[%s5489_s28 + $0x68] sm:$0xff] %vm438_vm0, %v2457_v63  ;;  %v2466_v4 = vmax.f32 %v2256_v57, 0.0  ;;  %v2467_v40 = vmax.f32 %v2257_v31, 0.0  ;;  %v2468_v51 = vmax.f32 %v2258_v28, 0.0  ;;  %v2469_v56 = vmax.f32 %v2259_v62, 0.0  ;;  %2668 = vst [vmem:[%s5489_s28 + $0x70] sm:$0xff] %v2458_v55  ;;  %v2107_v57 = vpop.permute.xlu1 %2106 }
 0x294   : > { %v2470_v44 = vmax.f32 %v2260_v34, 0.0  ;;  %v2471_v21 = vmax.f32 %v2261_v30, 0.0  ;;  %2675 = vst [vmem:[%s5489_s28 + $0xa8] sm:$0xff] %v2465_v20  ;;  %v2269_v59 = vadd.f32 %v2112_v45, %v4811_v10  ;;  %v2270_v27 = vadd.f32 %v2112_v45, %v4815_v29  ;;  %v6190_v34 = vld [vmem:[#allocation23_spill] sm:$0xff]  ;;  %v6191_v20 = vld [vmem:[#allocation24_spill] sm:$0xff] }
 0x295   : > { %2676 = vst [vmem:[%s5489_s28 + $0xb0] sm:$0xff] %v2466_v4  ;;  %2677 = vst [vmem:[%s5489_s28 + $0xb8] sm:$0xff] %v2467_v40  ;;  %v2271_v39 = vadd.f32 %v2112_v45, %v4819_v24  ;;  %v2272_v16 = vadd.f32 %v2112_v45, %v4823_v14  ;;  %v2273_v26 = vadd.f32 %v2112_v45, %v4827_v5  ;;  %v2459_v29 = vmax.f32 %v5503_v33, 0.0  ;;  %v2122_v49 = vpop.permute.xlu0 %2121 }
 0x296   : > { %2678 = vst [vmem:[%s5489_s28 + $0xc0] sm:$0xff] %v2468_v51  ;;  %2679 = vst [vmem:[%s5489_s28 + $0xc8] sm:$0xff] %v2469_v56  ;;  %v2274_v19 = vadd.f32 %v2112_v45, %v4831_v22  ;;  %v2275_v10 = vadd.f32 %v2112_v45, %v4835_v37  ;;  %v2479_v24 = vmax.f32 %v2269_v59, 0.0  ;;  %v2480_v14 = vmax.f32 %v2270_v27, 0.0  ;;  %v6194_v56 = vld [vmem:[#allocation6_spill] sm:$0xff] }
 0x297   : > { %2680 = vst [vmem:[%s5489_s28 + $0xd0] sm:$0xff] %v2470_v44  ;;  %2681 = vst.msk [vmem:[%s5489_s28 + $0xd8] sm:$0xff] %vm438_vm0, %v2471_v21  ;;  %v2481_v47 = vmax.f32 %v2271_v39, 0.0  ;;  %v2482_v32 = vmax.f32 %v2272_v16, 0.0  ;;  %v2483_v2 = vmax.f32 %v2273_v26, 0.0  ;;  %v2460_v22 = vmax.f32 %v5506_v0, 0.0 }
 0x298   : > { %v2484_v58 = vmax.f32 %v2274_v19, 0.0  ;;  %v2485_v5 = vmax.f32 %v2275_v10, 0.0  ;;  %2669 = vst [vmem:[%s5489_s28 + $0x78] sm:$0xff] %v2459_v29  ;;  %2689 = vst [vmem:[%s5489_s28 + $0x118] sm:$0xff] %v2479_v24  ;;  %v2283_v37 = vadd.f32 %v2122_v49, %v4869_v54  ;;  %v2284_v33 = vadd.f32 %v2122_v49, %v4873_v38  ;;  %v6195_v39 = vld [vmem:[#allocation7_spill] sm:$0xff]  ;;  %v6196_v26 = vld [vmem:[#allocation4_spill] sm:$0xff] }
 0x299   : > { %2690 = vst [vmem:[%s5489_s28 + $0x120] sm:$0xff] %v2480_v14  ;;  %2691 = vst [vmem:[%s5489_s28 + $0x128] sm:$0xff] %v2481_v47  ;;  %v2285_v61 = vadd.f32 %v2122_v49, %v4877_v25  ;;  %v2286_v15 = vadd.f32 %v2122_v49, %v4881_v18  ;;  %v2287_v0 = vadd.f32 %v2122_v49, %v4885_v48  ;;  %v2461_v54 = vmax.f32 %v5509_v12, 0.0  ;;  %v6197_v10 = vld [vmem:[#allocation5_spill] sm:$0xff]  ;;  %v6198_v24 = vld [vmem:[#allocation8_spill] sm:$0xff] }
 0x29a   : > { %2692 = vst [vmem:[%s5489_s28 + $0x130] sm:$0xff] %v2482_v32  ;;  %2693 = vst [vmem:[%s5489_s28 + $0x138] sm:$0xff] %v2483_v2  ;;  %v2288_v8 = vadd.f32 %v2122_v49, %v4889_v41  ;;  %v2289_v60 = vadd.f32 %v2122_v49, %v4893_v7  ;;  %v2493_v25 = vmax.f32 %v2283_v37, 0.0  ;;  %v2494_v18 = vmax.f32 %v2284_v33, 0.0  ;;  %v2132_v7 = vpop.permute.xlu0 %2131  ;;  %v6199_v47 = vld [vmem:[#allocation9_spill] sm:$0xff]  ;;  %v6200_v2 = vld [vmem:[#allocation2_spill] sm:$0xff] }
 0x29b   : > { %2694 = vst [vmem:[%s5489_s28 + $0x140] sm:$0xff] %v2484_v58  ;;  %2695 = vst.msk [vmem:[%s5489_s28 + $0x148] sm:$0xff] %vm438_vm0, %v2485_v5  ;;  %v2495_v38 = vmax.f32 %v2285_v61, 0.0  ;;  %v2496_v63 = vmax.f32 %v2286_v15, 0.0  ;;  %v2497_v17 = vmax.f32 %v2287_v0, 0.0  ;;  %v2462_v41 = vmax.f32 %v5523_v11, 0.0  ;;  %v2117_v61 = vpop.permute.xlu1 %2116 }
 0x29c   : > { %2670 = vst [vmem:[%s5489_s28 + $0x80] sm:$0xff] %v2460_v22  ;;  %v2498_v46 = vmax.f32 %v2288_v8, 0.0  ;;  %v2499_v48 = vmax.f32 %v2289_v60, 0.0  ;;  %2671 = vst [vmem:[%s5489_s28 + $0x88] sm:$0xff] %v2461_v54  ;;  %v2463_v12 = vmax.f32 %v5526_v53, 0.0  ;;  %v2464_v31 = vmax.f32 %v5544_v35, 0.0 }
 0x29d   : > { %2703 = vst [vmem:[%s5489_s28 + $0x188] sm:$0xff] %v2493_v25  ;;  %2704 = vst [vmem:[%s5489_s28 + $0x190] sm:$0xff] %v2494_v18  ;;  %v2297_v28 = vadd.f32 %v2132_v7, %v4927_v50  ;;  %v2298_v62 = vadd.f32 %v2132_v7, %v4931_v52  ;;  %v2299_v11 = vadd.f32 %v2132_v7, %v4935_v23  ;;  %v6192_v53 = vld [vmem:[#allocation25_spill] sm:$0xff]  ;;  %v6193_v50 = vld [vmem:[#allocation26_spill] sm:$0xff] }
 0x29e   : > { %2705 = vst [vmem:[%s5489_s28 + $0x198] sm:$0xff] %v2495_v38  ;;  %2706 = vst [vmem:[%s5489_s28 + $0x1a0] sm:$0xff] %v2496_v63  ;;  %v2300_v30 = vadd.f32 %v2132_v7, %v6190_v34  ;;  %v2301_v4 = vadd.f32 %v2132_v7, %v6191_v20  ;;  %v2302_v40 = vadd.f32 %v2132_v7, %v6192_v53  ;;  %v2142_v59 = vpop.permute.xlu0 %2141  ;;  %v6201_v60 = vld [vmem:[#allocation32_spill] sm:$0xff]  ;;  %v6202_v25 = vld [vmem:[#allocation35_spill] sm:$0xff] }
 0x29f   : > { %2707 = vst [vmem:[%s5489_s28 + $0x1a8] sm:$0xff] %v2497_v17  ;;  %2708 = vst [vmem:[%s5489_s28 + $0x1b0] sm:$0xff] %v2498_v46  ;;  %v2303_v52 = vadd.f32 %v2132_v7, %v6193_v50  ;;  %v2507_v35 = vmax.f32 %v2297_v28, 0.0  ;;  %v2508_v51 = vmax.f32 %v2298_v62, 0.0  ;;  %v2262_v23 = vadd.f32 %v2107_v57, %v6194_v56  ;;  %v6203_v38 = vld [vmem:[#allocation36_spill] sm:$0xff]  ;;  %v6204_v17 = vld [vmem:[#allocation37_spill] sm:$0xff] }
 0x2a0   : > { %2709 = vst.msk [vmem:[%s5489_s28 + $0x1b8] sm:$0xff] %vm438_vm0, %v2499_v48  ;;  %2672 = vst [vmem:[%s5489_s28 + $0x90] sm:$0xff] %v2462_v41  ;;  %v2509_v44 = vmax.f32 %v2299_v11, 0.0  ;;  %v2510_v21 = vmax.f32 %v2300_v30, 0.0  ;;  %v2511_v45 = vmax.f32 %v2301_v4, 0.0  ;;  %v2512_v55 = vmax.f32 %v2302_v40, 0.0 }
 0x2a1   : > { %2673 = vst [vmem:[%s5489_s28 + $0x98] sm:$0xff] %v2463_v12  ;;  %2674 = vst.msk [vmem:[%s5489_s28 + $0xa0] sm:$0xff] %vm438_vm0, %v2464_v31  ;;  %v2513_v27 = vmax.f32 %v2303_v52, 0.0  ;;  %v2263_v16 = vadd.f32 %v2107_v57, %v6195_v39  ;;  %v2264_v19 = vadd.f32 %v2107_v57, %v6196_v26  ;;  %v2265_v29 = vadd.f32 %v2107_v57, %v6197_v10  ;;  %v6205_v48 = vld [vmem:[#allocation38_spill] sm:$0xff]  ;;  %v6206_v41 = vld [vmem:[#allocation39_spill] sm:$0xff]  ;;  %v2127_v10 = vpop.permute.xlu1 %2126 }
 0x2a2   : > { %2717 = vst [vmem:[%s5489_s28 + $0x1f8] sm:$0xff] %v2507_v35  ;;  %2718 = vst [vmem:[%s5489_s28 + $0x200] sm:$0xff] %v2508_v51  ;;  %v2266_v14 = vadd.f32 %v2107_v57, %v6198_v24  ;;  %v2267_v32 = vadd.f32 %v2107_v57, %v6199_v47  ;;  %v2268_v58 = vadd.f32 %v2107_v57, %v6200_v2  ;;  %v2472_v5 = vmax.f32 %v2262_v23, 0.0  ;;  %v6207_v31 = vld [vmem:[#allocation3_spill] sm:$0xff]  ;;  %v2152_v20 = vpop.permute.xlu0 %2151  ;;  %v6208_v53 = vld [vmem:[#allocation10_spill] sm:$0xff] }
 0x2a3   : > { %2719 = vst [vmem:[%s5489_s28 + $0x208] sm:$0xff] %v2509_v44  ;;  %2720 = vst [vmem:[%s5489_s28 + $0x210] sm:$0xff] %v2510_v21  ;;  %v2473_v49 = vmax.f32 %v2263_v16, 0.0  ;;  %v2474_v22 = vmax.f32 %v2264_v19, 0.0  ;;  %v2475_v37 = vmax.f32 %v2265_v29, 0.0  ;;  %v2311_v33 = vadd.f32 %v2142_v59, %v4977_v13  ;;  %v6209_v50 = vld [vmem:[#allocation11_spill] sm:$0xff] }
 0x2a4   : > { %2721 = vst [vmem:[%s5489_s28 + $0x218] sm:$0xff] %v2511_v45  ;;  %2722 = vst [vmem:[%s5489_s28 + $0x220] sm:$0xff] %v2512_v55  ;;  %v2476_v15 = vmax.f32 %v2266_v14, 0.0  ;;  %v2477_v0 = vmax.f32 %v2267_v32, 0.0  ;;  %v2478_v8 = vmax.f32 %v2268_v58, 0.0  ;;  %v2312_v54 = vadd.f32 %v2142_v59, %v6201_v60  ;;  %v6210_v35 = vld [vmem:[#allocation12_spill] sm:$0xff] }
 0x2a5   : > { %2723 = vst.msk [vmem:[%s5489_s28 + $0x228] sm:$0xff] %vm438_vm0, %v2513_v27  ;;  %2682 = vst [vmem:[%s5489_s28 + $0xe0] sm:$0xff] %v2472_v5  ;;  %v2313_v18 = vadd.f32 %v2142_v59, %v6202_v25  ;;  %v2314_v63 = vadd.f32 %v2142_v59, %v6203_v38  ;;  %v2315_v46 = vadd.f32 %v2142_v59, %v6204_v17  ;;  %v2521_v57 = vmax.f32 %v2311_v33, 0.0  ;;  %v6211_v56 = vld [vmem:[#allocation13_spill] sm:$0xff]  ;;  %v6212_v44 = vld [vmem:[#allocation14_spill] sm:$0xff] }
 0x2a6   : > { %2683 = vst [vmem:[%s5489_s28 + $0xe8] sm:$0xff] %v2473_v49  ;;  %2684 = vst [vmem:[%s5489_s28 + $0xf0] sm:$0xff] %v2474_v22  ;;  %v2316_v13 = vadd.f32 %v2142_v59, %v6205_v48  ;;  %v2317_v7 = vadd.f32 %v2142_v59, %v6206_v41  ;;  %v2522_v12 = vmax.f32 %v2312_v54, 0.0  ;;  %v2276_v28 = vadd.f32 %v2117_v61, %v6207_v31  ;;  %v6213_v45 = vld [vmem:[#allocation15_spill] sm:$0xff]  ;;  %v6215_v47 = vld [vmem:[#allocation48_spill] sm:$0xff]  ;;  %v2162_v17 = vpop.permute.xlu0 %2161 }
 0x2a7   : > { %2685 = vst [vmem:[%s5489_s28 + $0xf8] sm:$0xff] %v2475_v37  ;;  %2686 = vst [vmem:[%s5489_s28 + $0x100] sm:$0xff] %v2476_v15  ;;  %v2523_v62 = vmax.f32 %v2313_v18, 0.0  ;;  %v2524_v11 = vmax.f32 %v2314_v63, 0.0  ;;  %v2525_v34 = vmax.f32 %v2315_v46, 0.0  ;;  %v2277_v40 = vadd.f32 %v2117_v61, %v6208_v53  ;;  %v6214_v26 = vld [vmem:[#allocation47_spill] sm:$0xff] }
 0x2a8   : > { %2687 = vst [vmem:[%s5489_s28 + $0x108] sm:$0xff] %v2477_v0  ;;  %2688 = vst.msk [vmem:[%s5489_s28 + $0x110] sm:$0xff] %vm438_vm0, %v2478_v8  ;;  %v2526_v30 = vmax.f32 %v2316_v13, 0.0  ;;  %v2527_v4 = vmax.f32 %v2317_v7, 0.0  ;;  %v2278_v52 = vadd.f32 %v2117_v61, %v6209_v50  ;;  %v2279_v51 = vadd.f32 %v2117_v61, %v6210_v35  ;;  %v6216_v2 = vld [vmem:[#allocation49_spill] sm:$0xff]  ;;  %v6217_v5 = vld [vmem:[#allocation50_spill] sm:$0xff] }
 0x2a9   : > { %2731 = vst [vmem:[%s5489_s28 + $0x268] sm:$0xff] %v2521_v57  ;;  %2732 = vst [vmem:[%s5489_s28 + $0x270] sm:$0xff] %v2522_v12  ;;  %v2280_v23 = vadd.f32 %v2117_v61, %v6211_v56  ;;  %v2281_v21 = vadd.f32 %v2117_v61, %v6212_v44  ;;  %v2282_v55 = vadd.f32 %v2117_v61, %v6213_v45  ;;  %v2486_v59 = vmax.f32 %v2276_v28, 0.0  ;;  %v6218_v22 = vld [vmem:[#allocation51_spill] sm:$0xff]  ;;  %v6219_v33 = vld [vmem:[#allocation52_spill] sm:$0xff] }
 0x2aa   : > { %2733 = vst [vmem:[%s5489_s28 + $0x278] sm:$0xff] %v2523_v62  ;;  %2734 = vst [vmem:[%s5489_s28 + $0x280] sm:$0xff] %v2524_v11  ;;  %v2487_v27 = vmax.f32 %v2277_v40, 0.0  ;;  %v2488_v39 = vmax.f32 %v2278_v52, 0.0  ;;  %v2489_v16 = vmax.f32 %v2279_v51, 0.0  ;;  %v2325_v19 = vadd.f32 %v2152_v20, %v6214_v26  ;;  %v6220_v60 = vld [vmem:[#allocation16_spill] sm:$0xff]  ;;  %v2137_v52 = vpop.permute.xlu1 %2136 }
 0x2ab   : > { %2735 = vst [vmem:[%s5489_s28 + $0x288] sm:$0xff] %v2525_v34  ;;  %2736 = vst [vmem:[%s5489_s28 + $0x290] sm:$0xff] %v2526_v30  ;;  %v2490_v29 = vmax.f32 %v2280_v23, 0.0  ;;  %v2491_v24 = vmax.f32 %v2281_v21, 0.0  ;;  %v2492_v14 = vmax.f32 %v2282_v55, 0.0  ;;  %v2326_v32 = vadd.f32 %v2152_v20, %v6215_v47  ;;  %v6221_v48 = vld [vmem:[#allocation17_spill] sm:$0xff] }
 0x2ac   : > { %2737 = vst.msk [vmem:[%s5489_s28 + $0x298] sm:$0xff] %vm438_vm0, %v2527_v4  ;;  %2696 = vst [vmem:[%s5489_s28 + $0x150] sm:$0xff] %v2486_v59  ;;  %v2327_v58 = vadd.f32 %v2152_v20, %v6216_v2  ;;  %v2328_v49 = vadd.f32 %v2152_v20, %v6217_v5  ;;  %v2329_v37 = vadd.f32 %v2152_v20, %v6218_v22  ;;  %v2535_v0 = vmax.f32 %v2325_v19, 0.0  ;;  %v6222_v41 = vld [vmem:[#allocation18_spill] sm:$0xff]  ;;  %v6223_v7 = vld [vmem:[#allocation19_spill] sm:$0xff] }
 0x2ad   : > { %2697 = vst [vmem:[%s5489_s28 + $0x158] sm:$0xff] %v2487_v27  ;;  %2698 = vst [vmem:[%s5489_s28 + $0x160] sm:$0xff] %v2488_v39  ;;  %v2330_v61 = vadd.f32 %v2152_v20, %v6219_v33  ;;  %v2331_v15 = vadd.f32 %v2152_v20, %v5069_v3  ;;  %v2536_v8 = vmax.f32 %v2326_v32, 0.0  ;;  %v2290_v54 = vadd.f32 %v2127_v10, %v6220_v60  ;;  %v6224_v12 = vld [vmem:[#allocation20_spill] sm:$0xff]  ;;  %v6225_v28 = vld [vmem:[#allocation21_spill] sm:$0xff] }
 0x2ae   : > { %2699 = vst [vmem:[%s5489_s28 + $0x168] sm:$0xff] %v2489_v16  ;;  %2700 = vst [vmem:[%s5489_s28 + $0x170] sm:$0xff] %v2490_v29  ;;  %v2537_v25 = vmax.f32 %v2327_v58, 0.0  ;;  %v2538_v18 = vmax.f32 %v2328_v49, 0.0  ;;  %v2539_v38 = vmax.f32 %v2329_v37, 0.0  ;;  %v2291_v13 = vadd.f32 %v2127_v10, %v6221_v48  ;;  %v6226_v11 = vld [vmem:[#allocation22_spill] sm:$0xff]  ;;  %v2172_v49 = vpop.permute.xlu0 %2171 }
 0x2af   : > { %2701 = vst [vmem:[%s5489_s28 + $0x178] sm:$0xff] %v2491_v24  ;;  %2702 = vst.msk [vmem:[%s5489_s28 + $0x180] sm:$0xff] %vm438_vm0, %v2492_v14  ;;  %v2540_v63 = vmax.f32 %v2330_v61, 0.0  ;;  %v2541_v46 = vmax.f32 %v2331_v15, 0.0  ;;  %v2292_v3 = vadd.f32 %v2127_v10, %v6222_v41  ;;  %v2293_v57 = vadd.f32 %v2127_v10, %v6223_v7  ;;  %v6227_v40 = vld [vmem:[#allocation58_spill] sm:$0xff]  ;;  %v6228_v23 = vld [vmem:[#allocation59_spill] sm:$0xff] }
 0x2b0   : > { %2745 = vst [vmem:[%s5489_s28 + $0x2d8] sm:$0xff] %v2535_v0  ;;  %2746 = vst [vmem:[%s5489_s28 + $0x2e0] sm:$0xff] %v2536_v8  ;;  %v2294_v31 = vadd.f32 %v2127_v10, %v6224_v12  ;;  %v2295_v62 = vadd.f32 %v2127_v10, %v6225_v28  ;;  %v2296_v34 = vadd.f32 %v2127_v10, %v6226_v11  ;;  %v2500_v30 = vmax.f32 %v2290_v54, 0.0  ;;  %v6229_v21 = vld [vmem:[#allocation62_spill] sm:$0xff]  ;;  %v6230_v55 = vld [vmem:[#allocation63_spill] sm:$0xff] }
 0x2b1   : > { %2747 = vst [vmem:[%s5489_s28 + $0x2e8] sm:$0xff] %v2537_v25  ;;  %2748 = vst [vmem:[%s5489_s28 + $0x2f0] sm:$0xff] %v2538_v18  ;;  %v2501_v20 = vmax.f32 %v2291_v13, 0.0  ;;  %v2502_v4 = vmax.f32 %v2292_v3, 0.0  ;;  %v2503_v53 = vmax.f32 %v2293_v57, 0.0  ;;  %v2339_v50 = vadd.f32 %v2162_v17, %v6227_v40  ;;  %v6231_v27 = vld [vmem:[#allocation64_spill] sm:$0xff]  ;;  %v2147_v3 = vpop.permute.xlu1 %2146 }
 0x2b2   : > { %2749 = vst [vmem:[%s5489_s28 + $0x2f8] sm:$0xff] %v2539_v38  ;;  %2750 = vst [vmem:[%s5489_s28 + $0x300] sm:$0xff] %v2540_v63  ;;  %v2504_v35 = vmax.f32 %v2294_v31, 0.0  ;;  %v2505_v51 = vmax.f32 %v2295_v62, 0.0  ;;  %v2506_v56 = vmax.f32 %v2296_v34, 0.0  ;;  %v2340_v44 = vadd.f32 %v2162_v17, %v6228_v23  ;;  %v6232_v16 = vld [vmem:[#allocation65_spill] sm:$0xff] }
 0x2b3   : > { %2751 = vst.msk [vmem:[%s5489_s28 + $0x308] sm:$0xff] %vm438_vm0, %v2541_v46  ;;  %2710 = vst [vmem:[%s5489_s28 + $0x1c0] sm:$0xff] %v2500_v30  ;;  %v2341_v45 = vadd.f32 %v2162_v17, %v6229_v21  ;;  %v2342_v59 = vadd.f32 %v2162_v17, %v6230_v55  ;;  %v2343_v39 = vadd.f32 %v2162_v17, %v6231_v27  ;;  %v6233_v19 = vld [vmem:[#allocation66_spill] sm:$0xff]  ;;  %v2549_v29 = vmax.f32 %v2339_v50, 0.0  ;;  %v6234_v14 = vld [vmem:[#allocation27_spill] sm:$0xff]  ;;  %v2182_v55 = vpop.permute.xlu0 %2181 }
 0x2b4   : > { %2711 = vst [vmem:[%s5489_s28 + $0x1c8] sm:$0xff] %v2501_v20  ;;  %2712 = vst [vmem:[%s5489_s28 + $0x1d0] sm:$0xff] %v2502_v4  ;;  %v2344_v26 = vadd.f32 %v2162_v17, %v6232_v16  ;;  %v2345_v10 = vadd.f32 %v2162_v17, %v6233_v19  ;;  %v2550_v24 = vmax.f32 %v2340_v44, 0.0  ;;  %v2304_v47 = vadd.f32 %v2137_v52, %v6234_v14  ;;  %v6235_v37 = vld [vmem:[#allocation28_spill] sm:$0xff]  ;;  %v6236_v61 = vld [vmem:[#allocation29_spill] sm:$0xff] }
 0x2b5   : > { %2713 = vst [vmem:[%s5489_s28 + $0x1d8] sm:$0xff] %v2503_v53  ;;  %2714 = vst [vmem:[%s5489_s28 + $0x1e0] sm:$0xff] %v2504_v35  ;;  %v2551_v32 = vmax.f32 %v2341_v45, 0.0  ;;  %v2552_v2 = vmax.f32 %v2342_v59, 0.0  ;;  %v2553_v58 = vmax.f32 %v2343_v39, 0.0  ;;  %v2305_v33 = vadd.f32 %v2137_v52, %v6235_v37  ;;  %v6237_v0 = vld [vmem:[#allocation30_spill] sm:$0xff] }
 0x2b6   : > { %2715 = vst [vmem:[%s5489_s28 + $0x1e8] sm:$0xff] %v2505_v51  ;;  %2716 = vst.msk [vmem:[%s5489_s28 + $0x1f0] sm:$0xff] %vm438_vm0, %v2506_v56  ;;  %v2554_v5 = vmax.f32 %v2344_v26, 0.0  ;;  %v2555_v22 = vmax.f32 %v2345_v10, 0.0  ;;  %v2306_v15 = vadd.f32 %v2137_v52, %v6236_v61  ;;  %v2307_v8 = vadd.f32 %v2137_v52, %v6237_v0  ;;  %v6238_v60 = vld [vmem:[#allocation31_spill] sm:$0xff]  ;;  %v6239_v25 = vld [vmem:[#allocation33_spill] sm:$0xff]  ;;  %v2157_v61 = vpop.permute.xlu1 %2156 }
 0x2b7   : > { %2759 = vst [vmem:[%s5489_s28 + $0x348] sm:$0xff] %v2549_v29  ;;  %2760 = vst [vmem:[%s5489_s28 + $0x350] sm:$0xff] %v2550_v24  ;;  %v2308_v54 = vadd.f32 %v2137_v52, %v6238_v60  ;;  %v2309_v18 = vadd.f32 %v2137_v52, %v6239_v25  ;;  %v6240_v38 = vld [vmem:[#allocation34_spill] sm:$0xff]  ;;  %v2514_v17 = vmax.f32 %v2304_v47, 0.0  ;;  %v2515_v46 = vmax.f32 %v2305_v33, 0.0  ;;  %v6242_v62 = vld [vmem:[#allocation75_spill] sm:$0xff] }
 0x2b8   : > { %2761 = vst [vmem:[%s5489_s28 + $0x358] sm:$0xff] %v2551_v32  ;;  %2762 = vst [vmem:[%s5489_s28 + $0x360] sm:$0xff] %v2552_v2  ;;  %v2310_v63 = vadd.f32 %v2137_v52, %v6240_v38  ;;  %v2516_v48 = vmax.f32 %v2306_v15, 0.0  ;;  %v2517_v13 = vmax.f32 %v2307_v8, 0.0  ;;  %v2353_v41 = vadd.f32 %v2172_v49, %v5161_v9  ;;  %v6241_v31 = vld [vmem:[#allocation74_spill] sm:$0xff]  ;;  %v6243_v34 = vld [vmem:[#allocation76_spill] sm:$0xff] }
 0x2b9   : > { %2763 = vst [vmem:[%s5489_s28 + $0x368] sm:$0xff] %v2553_v58  ;;  %2764 = vst [vmem:[%s5489_s28 + $0x370] sm:$0xff] %v2554_v5  ;;  %v2518_v7 = vmax.f32 %v2308_v54, 0.0  ;;  %v2519_v57 = vmax.f32 %v2309_v18, 0.0  ;;  %v2354_v28 = vadd.f32 %v2172_v49, %v6241_v31  ;;  %v2355_v11 = vadd.f32 %v2172_v49, %v6242_v62  ;;  %v6244_v20 = vld [vmem:[#allocation77_spill] sm:$0xff]  ;;  %v6245_v53 = vld [vmem:[#allocation78_spill] sm:$0xff] }
 0x2ba   : > { %2765 = vst.msk [vmem:[%s5489_s28 + $0x378] sm:$0xff] %vm438_vm0, %v2555_v22  ;;  %v2520_v12 = vmax.f32 %v2310_v63, 0.0  ;;  %2724 = vst [vmem:[%s5489_s28 + $0x230] sm:$0xff] %v2514_v17  ;;  %v2356_v30 = vadd.f32 %v2172_v49, %v6243_v34  ;;  %v2357_v4 = vadd.f32 %v2172_v49, %v6244_v20  ;;  %v2358_v9 = vadd.f32 %v2172_v49, %v6245_v53  ;;  %v6246_v40 = vld [vmem:[#allocation79_spill] sm:$0xff]  ;;  %v6247_v51 = vld [vmem:[#allocation40_spill] sm:$0xff] }
 0x2bb   : > { %2725 = vst [vmem:[%s5489_s28 + $0x238] sm:$0xff] %v2515_v46  ;;  %2726 = vst [vmem:[%s5489_s28 + $0x240] sm:$0xff] %v2516_v48  ;;  %v2359_v50 = vadd.f32 %v2172_v49, %v6246_v40  ;;  %v2563_v52 = vmax.f32 %v2353_v41, 0.0  ;;  %v2564_v35 = vmax.f32 %v2354_v28, 0.0  ;;  %v2318_v56 = vadd.f32 %v2147_v3, %v6247_v51  ;;  %v6248_v27 = vld [vmem:[#allocation41_spill] sm:$0xff]  ;;  %v6249_v16 = vld [vmem:[#allocation42_spill] sm:$0xff] }
 0x2bc   : > { %2727 = vst [vmem:[%s5489_s28 + $0x248] sm:$0xff] %v2517_v13  ;;  %2728 = vst [vmem:[%s5489_s28 + $0x250] sm:$0xff] %v2518_v7  ;;  %v2565_v23 = vmax.f32 %v2355_v11, 0.0  ;;  %v2566_v44 = vmax.f32 %v2356_v30, 0.0  ;;  %v2567_v21 = vmax.f32 %v2357_v4, 0.0  ;;  %v2568_v45 = vmax.f32 %v2358_v9, 0.0  ;;  %v2192_v30 = vpop.permute.xlu0 %2191 }
 0x2bd   : > { %2729 = vst [vmem:[%s5489_s28 + $0x258] sm:$0xff] %v2519_v57  ;;  %2730 = vst.msk [vmem:[%s5489_s28 + $0x260] sm:$0xff] %vm438_vm0, %v2520_v12  ;;  %v2569_v59 = vmax.f32 %v2359_v50, 0.0  ;;  %v2319_v39 = vadd.f32 %v2147_v3, %v6248_v27  ;;  %v2320_v26 = vadd.f32 %v2147_v3, %v6249_v16  ;;  %v6250_v19 = vld [vmem:[#allocation43_spill] sm:$0xff]  ;;  %v6251_v29 = vld [vmem:[#allocation44_spill] sm:$0xff]  ;;  %v2528_v58 = vmax.f32 %v2318_v56, 0.0 }
 0x2be   : > { %2773 = vst [vmem:[%s5489_s28 + $0x3b8] sm:$0xff] %v2563_v52  ;;  %2774 = vst [vmem:[%s5489_s28 + $0x3c0] sm:$0xff] %v2564_v35  ;;  %v2321_v10 = vadd.f32 %v2147_v3, %v6250_v19  ;;  %v2322_v24 = vadd.f32 %v2147_v3, %v6251_v29  ;;  %v6252_v14 = vld [vmem:[#allocation45_spill] sm:$0xff]  ;;  %v6253_v32 = vld [vmem:[#allocation46_spill] sm:$0xff] }
 0x2bf   : > { %2775 = vst [vmem:[%s5489_s28 + $0x3c8] sm:$0xff] %v2565_v23  ;;  %2776 = vst [vmem:[%s5489_s28 + $0x3d0] sm:$0xff] %v2566_v44  ;;  %v2323_v47 = vadd.f32 %v2147_v3, %v6252_v14  ;;  %v2324_v2 = vadd.f32 %v2147_v3, %v6253_v32  ;;  %v2529_v5 = vmax.f32 %v2319_v39, 0.0  ;;  %v2530_v49 = vmax.f32 %v2320_v26, 0.0  ;;  %v6254_v37 = vld [vmem:[#allocation85_spill] sm:$0xff]  ;;  %v6255_v60 = vld [vmem:[#allocation86_spill] sm:$0xff]  ;;  %v2167_v26 = vpop.permute.xlu1 %2166 }
 0x2c0   : > { %2777 = vst [vmem:[%s5489_s28 + $0x3d8] sm:$0xff] %v2567_v21  ;;  %2778 = vst [vmem:[%s5489_s28 + $0x3e0] sm:$0xff] %v2568_v45  ;;  %v2531_v22 = vmax.f32 %v2321_v10, 0.0  ;;  %v2367_v33 = vadd.f32 %v2182_v55, %v6254_v37  ;;  %v2532_v15 = vmax.f32 %v2322_v24, 0.0  ;;  %v2368_v54 = vadd.f32 %v2182_v55, %v6255_v60  ;;  %v6256_v25 = vld [vmem:[#allocation89_spill] sm:$0xff]  ;;  %v6257_v38 = vld [vmem:[#allocation90_spill] sm:$0xff] }
 0x2c1   : > { %2779 = vst.msk [vmem:[%s5489_s28 + $0x3e8] sm:$0xff] %vm438_vm0, %v2569_v59  ;;  %v2533_v0 = vmax.f32 %v2323_v47, 0.0  ;;  %v2534_v8 = vmax.f32 %v2324_v2, 0.0  ;;  %2738 = vst [vmem:[%s5489_s28 + $0x2a0] sm:$0xff] %v2528_v58  ;;  %v2369_v18 = vadd.f32 %v2182_v55, %v6256_v25  ;;  %v2370_v63 = vadd.f32 %v2182_v55, %v6257_v38  ;;  %v6258_v17 = vld [vmem:[#allocation91_spill] sm:$0xff]  ;;  %v6259_v48 = vld [vmem:[#allocation92_spill] sm:$0xff] }
 0x2c2   : > { %2739 = vst [vmem:[%s5489_s28 + $0x2a8] sm:$0xff] %v2529_v5  ;;  %2740 = vst [vmem:[%s5489_s28 + $0x2b0] sm:$0xff] %v2530_v49  ;;  %v2371_v46 = vadd.f32 %v2182_v55, %v6258_v17  ;;  %v2372_v13 = vadd.f32 %v2182_v55, %v6259_v48  ;;  %v6260_v41 = vld [vmem:[#allocation93_spill] sm:$0xff]  ;;  %v2577_v7 = vmax.f32 %v2367_v33, 0.0  ;;  %v2578_v57 = vmax.f32 %v2368_v54, 0.0  ;;  %v6262_v4 = vld [vmem:[#allocation54_spill] sm:$0xff] }
 0x2c3   : > { %2741 = vst [vmem:[%s5489_s28 + $0x2b8] sm:$0xff] %v2531_v22  ;;  %2742 = vst [vmem:[%s5489_s28 + $0x2c0] sm:$0xff] %v2532_v15  ;;  %v2373_v3 = vadd.f32 %v2182_v55, %v6260_v41  ;;  %v6261_v12 = vld [vmem:[#allocation53_spill] sm:$0xff]  ;;  %v2579_v28 = vmax.f32 %v2369_v18, 0.0  ;;  %v2580_v62 = vmax.f32 %v2370_v63, 0.0  ;;  %v2333_v53 = vadd.f32 %v2157_v61, %v6262_v4  ;;  %v6263_v9 = vld [vmem:[#allocation55_spill] sm:$0xff]  ;;  %v2202_v63 = vpop.permute.xlu0 %2201 }
 0x2c4   : > { %2743 = vst [vmem:[%s5489_s28 + $0x2c8] sm:$0xff] %v2533_v0  ;;  %2744 = vst.msk [vmem:[%s5489_s28 + $0x2d0] sm:$0xff] %vm438_vm0, %v2534_v8  ;;  %v2332_v31 = vadd.f32 %v2157_v61, %v6261_v12  ;;  %v2581_v11 = vmax.f32 %v2371_v46, 0.0  ;;  %v2582_v34 = vmax.f32 %v2372_v13, 0.0  ;;  %v2334_v40 = vadd.f32 %v2157_v61, %v6263_v9  ;;  %v6264_v50 = vld [vmem:[#allocation56_spill] sm:$0xff]  ;;  %v6265_v35 = vld [vmem:[#allocation57_spill] sm:$0xff] }
 0x2c5   : > { %v2583_v20 = vmax.f32 %v2373_v3, 0.0  ;;  %2787 = vst [vmem:[%s5489_s28 + $0x428] sm:$0xff] %v2577_v7  ;;  %2788 = vst [vmem:[%s5489_s28 + $0x430] sm:$0xff] %v2578_v57  ;;  %v2335_v52 = vadd.f32 %v2157_v61, %v6264_v50  ;;  %v2336_v51 = vadd.f32 %v2157_v61, %v6265_v35  ;;  %v6266_v56 = vld [vmem:[#allocation60_spill] sm:$0xff]  ;;  %v6267_v44 = vld [vmem:[#allocation61_spill] sm:$0xff]  ;;  %v2543_v55 = vmax.f32 %v2333_v53, 0.0 }
 0x2c6   : > { %2789 = vst [vmem:[%s5489_s28 + $0x438] sm:$0xff] %v2579_v28  ;;  %2790 = vst [vmem:[%s5489_s28 + $0x440] sm:$0xff] %v2580_v62  ;;  %v2337_v23 = vadd.f32 %v2157_v61, %v6266_v56  ;;  %v2338_v21 = vadd.f32 %v2157_v61, %v6267_v44  ;;  %v2542_v45 = vmax.f32 %v2332_v31, 0.0  ;;  %v2544_v59 = vmax.f32 %v2334_v40, 0.0  ;;  %v6268_v39 = vld [vmem:[#allocation101_spill] sm:$0xff]  ;;  %v6269_v24 = vld [vmem:[#allocation102_spill] sm:$0xff] }
 0x2c7   : > { %2791 = vst [vmem:[%s5489_s28 + $0x448] sm:$0xff] %v2581_v11  ;;  %2792 = vst [vmem:[%s5489_s28 + $0x450] sm:$0xff] %v2582_v34  ;;  %v2545_v27 = vmax.f32 %v2335_v52, 0.0  ;;  %v2381_v16 = vadd.f32 %v2192_v30, %v6268_v39  ;;  %v2546_v19 = vmax.f32 %v2336_v51, 0.0  ;;  %v2382_v14 = vadd.f32 %v2192_v30, %v6269_v24  ;;  %v6270_v47 = vld [vmem:[#allocation103_spill] sm:$0xff]  ;;  %v6271_v2 = vld [vmem:[#allocation104_spill] sm:$0xff] }
 0x2c8   : > { %2793 = vst.msk [vmem:[%s5489_s28 + $0x458] sm:$0xff] %vm438_vm0, %v2583_v20  ;;  %v2547_v10 = vmax.f32 %v2337_v23, 0.0  ;;  %v2548_v29 = vmax.f32 %v2338_v21, 0.0  ;;  %2752 = vst [vmem:[%s5489_s28 + $0x310] sm:$0xff] %v2542_v45  ;;  %v2383_v32 = vadd.f32 %v2192_v30, %v6270_v47  ;;  %v2384_v58 = vadd.f32 %v2192_v30, %v6271_v2  ;;  %v6272_v5 = vld [vmem:[#allocation105_spill] sm:$0xff]  ;;  %v6273_v22 = vld [vmem:[#allocation106_spill] sm:$0xff] }
 0x2c9   : > { %2753 = vst [vmem:[%s5489_s28 + $0x318] sm:$0xff] %v2543_v55  ;;  %2754 = vst [vmem:[%s5489_s28 + $0x320] sm:$0xff] %v2544_v59  ;;  %v2385_v49 = vadd.f32 %v2192_v30, %v6272_v5  ;;  %v2386_v37 = vadd.f32 %v2192_v30, %v6273_v22  ;;  %v6274_v33 = vld [vmem:[#allocation107_spill] sm:$0xff]  ;;  %v2591_v15 = vmax.f32 %v2381_v16, 0.0  ;;  %v2592_v0 = vmax.f32 %v2382_v14, 0.0  ;;  %v6276_v46 = vld [vmem:[#allocation68_spill] sm:$0xff] }
 0x2ca   : > { %2755 = vst [vmem:[%s5489_s28 + $0x328] sm:$0xff] %v2545_v27  ;;  %2756 = vst [vmem:[%s5489_s28 + $0x330] sm:$0xff] %v2546_v19  ;;  %v2387_v61 = vadd.f32 %v2192_v30, %v6274_v33  ;;  %v6275_v8 = vld [vmem:[#allocation67_spill] sm:$0xff]  ;;  %v2593_v54 = vmax.f32 %v2383_v32, 0.0  ;;  %v2594_v25 = vmax.f32 %v2384_v58, 0.0  ;;  %v2347_v48 = vadd.f32 %v2167_v26, %v6276_v46  ;;  %v6277_v13 = vld [vmem:[#allocation69_spill] sm:$0xff]  ;;  %v2177_v30 = vpop.permute.xlu1 %2176  ;;  %v2212_v58 = vpop.permute.xlu0 %2211 }
 0x2cb   : > { %2757 = vst [vmem:[%s5489_s28 + $0x338] sm:$0xff] %v2547_v10  ;;  %2758 = vst.msk [vmem:[%s5489_s28 + $0x340] sm:$0xff] %vm438_vm0, %v2548_v29  ;;  %v2346_v60 = vadd.f32 %v2167_v26, %v6275_v8  ;;  %v2595_v18 = vmax.f32 %v2385_v49, 0.0  ;;  %v2596_v38 = vmax.f32 %v2386_v37, 0.0  ;;  %v2348_v41 = vadd.f32 %v2167_v26, %v6277_v13  ;;  %v6278_v3 = vld [vmem:[#allocation70_spill] sm:$0xff]  ;;  %v6279_v57 = vld [vmem:[#allocation71_spill] sm:$0xff] }
 0x2cc   : > { %v2597_v17 = vmax.f32 %v2387_v61, 0.0  ;;  %2801 = vst [vmem:[%s5489_s28 + $0x498] sm:$0xff] %v2591_v15  ;;  %2802 = vst [vmem:[%s5489_s28 + $0x4a0] sm:$0xff] %v2592_v0  ;;  %v2349_v7 = vadd.f32 %v2167_v26, %v6278_v3  ;;  %v2350_v12 = vadd.f32 %v2167_v26, %v6279_v57  ;;  %v6280_v31 = vld [vmem:[#allocation72_spill] sm:$0xff]  ;;  %v6281_v62 = vld [vmem:[#allocation73_spill] sm:$0xff]  ;;  %v2557_v20 = vmax.f32 %v2347_v48, 0.0 }
 0x2cd   : > { %2803 = vst [vmem:[%s5489_s28 + $0x4a8] sm:$0xff] %v2593_v54  ;;  %2804 = vst [vmem:[%s5489_s28 + $0x4b0] sm:$0xff] %v2594_v25  ;;  %v2351_v28 = vadd.f32 %v2167_v26, %v6280_v31  ;;  %v2352_v11 = vadd.f32 %v2167_v26, %v6281_v62  ;;  %v2556_v34 = vmax.f32 %v2346_v60, 0.0  ;;  %v2558_v4 = vmax.f32 %v2348_v41, 0.0  ;;  %v6282_v9 = vld [vmem:[#allocation113_spill] sm:$0xff]  ;;  %v6283_v51 = vld [vmem:[#allocation114_spill] sm:$0xff] }
 0x2ce   : > { %2805 = vst [vmem:[%s5489_s28 + $0x4b8] sm:$0xff] %v2595_v18  ;;  %2806 = vst [vmem:[%s5489_s28 + $0x4c0] sm:$0xff] %v2596_v38  ;;  %v2559_v53 = vmax.f32 %v2349_v7, 0.0  ;;  %v2395_v40 = vadd.f32 %v2202_v63, %v6282_v9  ;;  %v2560_v50 = vmax.f32 %v2350_v12, 0.0  ;;  %v2396_v56 = vadd.f32 %v2202_v63, %v6283_v51  ;;  %v6284_v23 = vld [vmem:[#allocation117_spill] sm:$0xff]  ;;  %v6285_v21 = vld [vmem:[#allocation118_spill] sm:$0xff]  ;;  %v2187_v0 = vpop.permute.xlu1 %2186 }
 0x2cf   : > { %2807 = vst.msk [vmem:[%s5489_s28 + $0x4c8] sm:$0xff] %vm438_vm0, %v2597_v17  ;;  %v2561_v52 = vmax.f32 %v2351_v28, 0.0  ;;  %v2562_v35 = vmax.f32 %v2352_v11, 0.0  ;;  %2766 = vst [vmem:[%s5489_s28 + $0x380] sm:$0xff] %v2556_v34  ;;  %v2397_v44 = vadd.f32 %v2202_v63, %v6284_v23  ;;  %v2398_v45 = vadd.f32 %v2202_v63, %v6285_v21  ;;  %v6286_v55 = vld [vmem:[#allocation119_spill] sm:$0xff]  ;;  %v6287_v27 = vld [vmem:[#allocation120_spill] sm:$0xff] }
 0x2d0   : > { %2767 = vst [vmem:[%s5489_s28 + $0x388] sm:$0xff] %v2557_v20  ;;  %2768 = vst [vmem:[%s5489_s28 + $0x390] sm:$0xff] %v2558_v4  ;;  %v2399_v59 = vadd.f32 %v2202_v63, %v6286_v55  ;;  %v2400_v39 = vadd.f32 %v2202_v63, %v6287_v27  ;;  %v6288_v16 = vld [vmem:[#allocation121_spill] sm:$0xff]  ;;  %v2605_v19 = vmax.f32 %v2395_v40, 0.0  ;;  %v2606_v10 = vmax.f32 %v2396_v56, 0.0  ;;  %v6289_v29 = vld [vmem:[#allocation80_spill] sm:$0xff] }
 0x2d1   : > { %2769 = vst [vmem:[%s5489_s28 + $0x398] sm:$0xff] %v2559_v53  ;;  %2770 = vst [vmem:[%s5489_s28 + $0x3a0] sm:$0xff] %v2560_v50  ;;  %v2401_v26 = vadd.f32 %v2202_v63, %v6288_v16  ;;  %v2360_v24 = vadd.f32 %v2177_v30, %v6289_v29  ;;  %v2607_v14 = vmax.f32 %v2397_v44, 0.0  ;;  %v2608_v47 = vmax.f32 %v2398_v45, 0.0  ;;  %v6290_v49 = vld [vmem:[#allocation81_spill] sm:$0xff]  ;;  %v6291_v37 = vld [vmem:[#allocation82_spill] sm:$0xff]  ;;  %v2222_v45 = vpop.permute.xlu0 %2221 }
 0x2d2   : > { %2771 = vst [vmem:[%s5489_s28 + $0x3a8] sm:$0xff] %v2561_v52  ;;  %2772 = vst.msk [vmem:[%s5489_s28 + $0x3b0] sm:$0xff] %vm438_vm0, %v2562_v35  ;;  %v2609_v32 = vmax.f32 %v2399_v59, 0.0  ;;  %v2610_v2 = vmax.f32 %v2400_v39, 0.0  ;;  %v2361_v22 = vadd.f32 %v2177_v30, %v6290_v49  ;;  %v2362_v33 = vadd.f32 %v2177_v30, %v6291_v37  ;;  %v6292_v61 = vld [vmem:[#allocation83_spill] sm:$0xff]  ;;  %v6293_v8 = vld [vmem:[#allocation84_spill] sm:$0xff]  ;;  %v2197_v55 = vpop.permute.xlu1 %2196 }
 0x2d3   : > { %v2611_v5 = vmax.f32 %v2401_v26, 0.0  ;;  %2815 = vst [vmem:[%s5489_s28 + $0x508] sm:$0xff] %v2605_v19  ;;  %2816 = vst [vmem:[%s5489_s28 + $0x510] sm:$0xff] %v2606_v10  ;;  %v2363_v15 = vadd.f32 %v2177_v30, %v6292_v61  ;;  %v2364_v60 = vadd.f32 %v2177_v30, %v6293_v8  ;;  %v6294_v54 = vld [vmem:[#allocation87_spill] sm:$0xff]  ;;  %v6295_v18 = vld [vmem:[#allocation88_spill] sm:$0xff]  ;;  %v2570_v63 = vmax.f32 %v2360_v24, 0.0 }
 0x2d4   : > { %2817 = vst [vmem:[%s5489_s28 + $0x518] sm:$0xff] %v2607_v14  ;;  %2818 = vst [vmem:[%s5489_s28 + $0x520] sm:$0xff] %v2608_v47  ;;  %v2365_v25 = vadd.f32 %v2177_v30, %v6294_v54  ;;  %v2366_v38 = vadd.f32 %v2177_v30, %v6295_v18  ;;  %v2571_v17 = vmax.f32 %v2361_v22, 0.0  ;;  %v2572_v46 = vmax.f32 %v2362_v33, 0.0  ;;  %v6296_v13 = vld [vmem:[#allocation129_spill] sm:$0xff]  ;;  %v6297_v12 = vld [vmem:[#allocation130_spill] sm:$0xff] }
 0x2d5   : > { %2819 = vst [vmem:[%s5489_s28 + $0x528] sm:$0xff] %v2609_v32  ;;  %2820 = vst [vmem:[%s5489_s28 + $0x530] sm:$0xff] %v2610_v2  ;;  %v2573_v48 = vmax.f32 %v2363_v15, 0.0  ;;  %v2409_v41 = vadd.f32 %v2212_v58, %v6296_v13  ;;  %v2574_v3 = vmax.f32 %v2364_v60, 0.0  ;;  %v2410_v31 = vadd.f32 %v2212_v58, %v6297_v12  ;;  %v6298_v28 = vld [vmem:[#allocation131_spill] sm:$0xff]  ;;  %v6299_v11 = vld [vmem:[#allocation132_spill] sm:$0xff] }
 0x2d6   : > { %2821 = vst.msk [vmem:[%s5489_s28 + $0x538] sm:$0xff] %vm438_vm0, %v2611_v5  ;;  %v2575_v7 = vmax.f32 %v2365_v25, 0.0  ;;  %v2576_v57 = vmax.f32 %v2366_v38, 0.0  ;;  %2780 = vst [vmem:[%s5489_s28 + $0x3f0] sm:$0xff] %v2570_v63  ;;  %v2411_v62 = vadd.f32 %v2212_v58, %v6298_v28  ;;  %v2412_v34 = vadd.f32 %v2212_v58, %v6299_v11  ;;  %v6300_v30 = vld [vmem:[#allocation133_spill] sm:$0xff]  ;;  %v6301_v4 = vld [vmem:[#allocation134_spill] sm:$0xff]  ;;  %v5877_v12 = vpop.permute.xlu1 %2206 }
 0x2d7   : > { %2781 = vst [vmem:[%s5489_s28 + $0x3f8] sm:$0xff] %v2571_v17  ;;  %2782 = vst [vmem:[%s5489_s28 + $0x400] sm:$0xff] %v2572_v46  ;;  %v2413_v20 = vadd.f32 %v2212_v58, %v6300_v30  ;;  %v2414_v53 = vadd.f32 %v2212_v58, %v6301_v4  ;;  %v6302_v9 = vld [vmem:[#allocation135_spill] sm:$0xff]  ;;  %v2619_v50 = vmax.f32 %v2409_v41, 0.0  ;;  %v2620_v52 = vmax.f32 %v2410_v31, 0.0  ;;  %v6303_v35 = vld [vmem:[#allocation94_spill] sm:$0xff] }
 0x2d8   : > { %2783 = vst [vmem:[%s5489_s28 + $0x408] sm:$0xff] %v2573_v48  ;;  %2784 = vst [vmem:[%s5489_s28 + $0x410] sm:$0xff] %v2574_v3  ;;  %v2415_v40 = vadd.f32 %v2212_v58, %v6302_v9  ;;  %v2374_v51 = vadd.f32 %v2187_v0, %v6303_v35  ;;  %v2621_v56 = vmax.f32 %v2411_v62, 0.0  ;;  %v2622_v23 = vmax.f32 %v2412_v34, 0.0  ;;  %v6304_v27 = vld [vmem:[#allocation95_spill] sm:$0xff]  ;;  %v6305_v16 = vld [vmem:[#allocation96_spill] sm:$0xff] }
 0x2d9   : > { %2785 = vst [vmem:[%s5489_s28 + $0x418] sm:$0xff] %v2575_v7  ;;  %2786 = vst.msk [vmem:[%s5489_s28 + $0x420] sm:$0xff] %vm438_vm0, %v2576_v57  ;;  %v2623_v44 = vmax.f32 %v2413_v20, 0.0  ;;  %v2624_v21 = vmax.f32 %v2414_v53, 0.0  ;;  %v2375_v39 = vadd.f32 %v2187_v0, %v6304_v27  ;;  %v2376_v26 = vadd.f32 %v2187_v0, %v6305_v16  ;;  %v6306_v19 = vld [vmem:[#allocation97_spill] sm:$0xff]  ;;  %v6307_v29 = vld [vmem:[#allocation98_spill] sm:$0xff] }
 0x2da   : > { %v2625_v59 = vmax.f32 %v2415_v40, 0.0  ;;  %2829 = vst [vmem:[%s5489_s28 + $0x578] sm:$0xff] %v2619_v50  ;;  %2830 = vst [vmem:[%s5489_s28 + $0x580] sm:$0xff] %v2620_v52  ;;  %v2377_v10 = vadd.f32 %v2187_v0, %v6306_v19  ;;  %v2378_v24 = vadd.f32 %v2187_v0, %v6307_v29  ;;  %v6308_v14 = vld [vmem:[#allocation99_spill] sm:$0xff]  ;;  %v6309_v32 = vld [vmem:[#allocation100_spill] sm:$0xff]  ;;  %v2584_v58 = vmax.f32 %v2374_v51, 0.0 }
 0x2db   : > { %2831 = vst [vmem:[%s5489_s28 + $0x588] sm:$0xff] %v2621_v56  ;;  %2832 = vst [vmem:[%s5489_s28 + $0x590] sm:$0xff] %v2622_v23  ;;  %v2379_v47 = vadd.f32 %v2187_v0, %v6308_v14  ;;  %v2380_v2 = vadd.f32 %v2187_v0, %v6309_v32  ;;  %v2585_v5 = vmax.f32 %v2375_v39, 0.0  ;;  %v2586_v49 = vmax.f32 %v2376_v26, 0.0  ;;  %v6310_v37 = vld [vmem:[#allocation141_spill] sm:$0xff]  ;;  %v6311_v60 = vld [vmem:[#allocation142_spill] sm:$0xff] }
 0x2dc   : > { %2833 = vst [vmem:[%s5489_s28 + $0x598] sm:$0xff] %v2623_v44  ;;  %2834 = vst [vmem:[%s5489_s28 + $0x5a0] sm:$0xff] %v2624_v21  ;;  %v2587_v22 = vmax.f32 %v2377_v10, 0.0  ;;  %v2423_v33 = vadd.f32 %v2222_v45, %v6310_v37  ;;  %v2588_v61 = vmax.f32 %v2378_v24, 0.0  ;;  %v2424_v54 = vadd.f32 %v2222_v45, %v6311_v60  ;;  %v6312_v0 = vld [vmem:[#allocation145_spill] sm:$0xff]  ;;  %v6313_v18 = vld [vmem:[#allocation146_spill] sm:$0xff]  ;;  %v2232_v44 = vpop.permute.xlu0 %2231 }
 0x2dd   : > { %2835 = vst.msk [vmem:[%s5489_s28 + $0x5a8] sm:$0xff] %vm438_vm0, %v2625_v59  ;;  %v2589_v15 = vmax.f32 %v2379_v47, 0.0  ;;  %v2590_v8 = vmax.f32 %v2380_v2, 0.0  ;;  %2794 = vst [vmem:[%s5489_s28 + $0x460] sm:$0xff] %v2584_v58  ;;  %v2425_v25 = vadd.f32 %v2222_v45, %v6312_v0  ;;  %v2426_v38 = vadd.f32 %v2222_v45, %v6313_v18  ;;  %v6314_v63 = vld [vmem:[#allocation147_spill] sm:$0xff]  ;;  %v6315_v46 = vld [vmem:[#allocation148_spill] sm:$0xff] }
 0x2de   : > { %2795 = vst [vmem:[%s5489_s28 + $0x468] sm:$0xff] %v2585_v5  ;;  %2796 = vst [vmem:[%s5489_s28 + $0x470] sm:$0xff] %v2586_v49  ;;  %v2427_v17 = vadd.f32 %v2222_v45, %v6314_v63  ;;  %v2428_v48 = vadd.f32 %v2222_v45, %v6315_v46  ;;  %v2429_v13 = vadd.f32 %v2222_v45, %v5448_v43  ;;  %v2633_v41 = vmax.f32 %v2423_v33, 0.0  ;;  %v6316_v7 = vld [vmem:[#allocation108_spill] sm:$0xff]  ;;  %v6317_v30 = vld [vmem:[#allocation109_spill] sm:$0xff]  ;;  %v2217_v5 = vpop.permute.xlu1 %2216 }
 0x2df   : > { %2797 = vst [vmem:[%s5489_s28 + $0x478] sm:$0xff] %v2587_v22  ;;  %2798 = vst [vmem:[%s5489_s28 + $0x480] sm:$0xff] %v2588_v61  ;;  %v2634_v3 = vmax.f32 %v2424_v54, 0.0  ;;  %v2388_v57 = vadd.f32 %v2197_v55, %v6316_v7  ;;  %v2635_v31 = vmax.f32 %v2425_v25, 0.0  ;;  %v2636_v28 = vmax.f32 %v2426_v38, 0.0  ;;  %v6318_v43 = vld [vmem:[#allocation110_spill] sm:$0xff] }
 0x2e0   : > { %2799 = vst [vmem:[%s5489_s28 + $0x488] sm:$0xff] %v2589_v15  ;;  %2800 = vst.msk [vmem:[%s5489_s28 + $0x490] sm:$0xff] %vm438_vm0, %v2590_v8  ;;  %v2637_v62 = vmax.f32 %v2427_v17, 0.0  ;;  %v2638_v11 = vmax.f32 %v2428_v48, 0.0  ;;  %v2639_v34 = vmax.f32 %v2429_v13, 0.0  ;;  %v2389_v20 = vadd.f32 %v2197_v55, %v6317_v30  ;;  %v6319_v53 = vld [vmem:[#allocation111_spill] sm:$0xff] }
 0x2e1   : > { %2843 = vst [vmem:[%s5489_s28 + $0x5e8] sm:$0xff] %v2633_v41  ;;  %2844 = vst [vmem:[%s5489_s28 + $0x5f0] sm:$0xff] %v2634_v3  ;;  %v2390_v4 = vadd.f32 %v2197_v55, %v6318_v43  ;;  %v2391_v9 = vadd.f32 %v2197_v55, %v6319_v53  ;;  %v6320_v40 = vld [vmem:[#allocation112_spill] sm:$0xff]  ;;  %v6321_v52 = vld [vmem:[#allocation115_spill] sm:$0xff]  ;;  %v2598_v23 = vmax.f32 %v2388_v57, 0.0  ;;  %v2437_v58 = vadd.f32 %v2232_v44, %v5482_v6 }
 0x2e2   : > { %2845 = vst [vmem:[%s5489_s28 + $0x5f8] sm:$0xff] %v2635_v31  ;;  %2846 = vst [vmem:[%s5489_s28 + $0x600] sm:$0xff] %v2636_v28  ;;  %v2392_v50 = vadd.f32 %v2197_v55, %v6320_v40  ;;  %v2393_v35 = vadd.f32 %v2197_v55, %v6321_v52  ;;  %v6322_v51 = vld [vmem:[#allocation116_spill] sm:$0xff]  ;;  %v2599_v21 = vmax.f32 %v2389_v20, 0.0  ;;  %v3407_v27 = vld [vmem:[%s3457_s18 + $0x668] sm:$0xff]  ;;  %v2438_v49 = vadd.f32 %v2232_v44, %v5493_v1  ;;  %v2227_v43 = vpop.permute.xlu1 %2226 }
 0x2e3   : > { %2847 = vst [vmem:[%s5489_s28 + $0x608] sm:$0xff] %v2637_v62  ;;  %2848 = vst [vmem:[%s5489_s28 + $0x610] sm:$0xff] %v2638_v11  ;;  %v2394_v56 = vadd.f32 %v2197_v55, %v6322_v51  ;;  %v2600_v45 = vmax.f32 %v2390_v4, 0.0  ;;  %v2601_v59 = vmax.f32 %v2391_v9, 0.0  ;;  %v2079_v39 = vmul.f32 %v3407_v27, %v5471_v42  ;;  %v3408_v55 = vld [vmem:[%s3457_s18 + $0x670] sm:$0xff]  ;;  %v3409_v29 = vld [vmem:[%s3457_s18 + $0x678] sm:$0xff] }
 0x2e4   : > { %2849 = vst.msk [vmem:[%s5489_s28 + $0x618] sm:$0xff] %vm438_vm0, %v2639_v34  ;;  %v2602_v16 = vmax.f32 %v2392_v50, 0.0  ;;  %v2603_v26 = vmax.f32 %v2393_v35, 0.0  ;;  %2808 = vst [vmem:[%s5489_s28 + $0x4d0] sm:$0xff] %v2598_v23  ;;  %v2080_v10 = vmul.f32 %v3408_v55, %v5471_v42  ;;  %v2081_v24 = vmul.f32 %v3409_v29, %v5471_v42  ;;  %v3410_v14 = vld [vmem:[%s3457_s18 + $0x680] sm:$0xff]  ;;  %v3411_v32 = vld [vmem:[%s3457_s18 + $0x688] sm:$0xff] }
 0x2e5   : > { %v2604_v19 = vmax.f32 %v2394_v56, 0.0  ;;  %2809 = vst [vmem:[%s5489_s28 + $0x4d8] sm:$0xff] %v2599_v21  ;;  %2810 = vst [vmem:[%s5489_s28 + $0x4e0] sm:$0xff] %v2600_v45  ;;  %v2082_v47 = vmul.f32 %v3410_v14, %v5471_v42  ;;  %v2083_v2 = vmul.f32 %v3411_v32, %v5471_v42  ;;  %v2439_v22 = vadd.f32 %v2232_v44, %v2079_v39  ;;  %v6323_v33 = vld [vmem:[#allocation122_spill] sm:$0xff]  ;;  %v6324_v25 = vld [vmem:[#allocation123_spill] sm:$0xff] }
 0x2e6   : > { %2811 = vst [vmem:[%s5489_s28 + $0x4e8] sm:$0xff] %v2601_v59  ;;  %2812 = vst [vmem:[%s5489_s28 + $0x4f0] sm:$0xff] %v2602_v16  ;;  %v2440_v37 = vadd.f32 %v2232_v44, %v2080_v10  ;;  %v2402_v61 = vadd.f32 %v5877_v12, %v6323_v33  ;;  %v2441_v15 = vadd.f32 %v2232_v44, %v2081_v24  ;;  %v2647_v6 = vmax.f32 %v2437_v58, 0.0  ;;  %v6325_v17 = vld [vmem:[#allocation124_spill] sm:$0xff]  ;;  %v6326_v48 = vld [vmem:[#allocation125_spill] sm:$0xff] }
 0x2e7   : > { %2813 = vst [vmem:[%s5489_s28 + $0x4f8] sm:$0xff] %v2603_v26  ;;  %2814 = vst.msk [vmem:[%s5489_s28 + $0x500] sm:$0xff] %vm438_vm0, %v2604_v19  ;;  %v2442_v42 = vadd.f32 %v2232_v44, %v2082_v47  ;;  %v2443_v8 = vadd.f32 %v2232_v44, %v2083_v2  ;;  %v2648_v60 = vmax.f32 %v2438_v49, 0.0  ;;  %v2649_v54 = vmax.f32 %v2439_v22, 0.0  ;;  %v6327_v41 = vld [vmem:[#allocation126_spill] sm:$0xff]  ;;  %v6328_v7 = vld [vmem:[#allocation127_spill] sm:$0xff] }
 0x2e8   : > { %v2650_v0 = vmax.f32 %v2440_v37, 0.0  ;;  %v2403_v1 = vadd.f32 %v5877_v12, %v6324_v25  ;;  %v2651_v18 = vmax.f32 %v2441_v15, 0.0  ;;  %2857 = vst [vmem:[%s5489_s28 + $0x658] sm:$0xff] %v2647_v6  ;;  %v2404_v46 = vadd.f32 %v5877_v12, %v6325_v17  ;;  %v6329_v31 = vld [vmem:[#allocation128_spill] sm:$0xff]  ;;  %v6332_v52 = vld [vmem:[#allocation138_spill] sm:$0xff]  ;;  %v6333_v51 = vld [vmem:[#allocation139_spill] sm:$0xff] }
 0x2e9   : > { %v2652_v38 = vmax.f32 %v2442_v42, 0.0  ;;  %v2653_v63 = vmax.f32 %v2443_v8, 0.0  ;;  %2858 = vst [vmem:[%s5489_s28 + $0x660] sm:$0xff] %v2648_v60  ;;  %2859 = vst [vmem:[%s5489_s28 + $0x668] sm:$0xff] %v2649_v54  ;;  %v2405_v13 = vadd.f32 %v5877_v12, %v6326_v48  ;;  %v2406_v3 = vadd.f32 %v5877_v12, %v6327_v41  ;;  %v6330_v30 = vld [vmem:[#allocation136_spill] sm:$0xff]  ;;  %v6335_v21 = vld [vmem:[#allocation143_spill] sm:$0xff] }
 0x2ea   : > { %2860 = vst [vmem:[%s5489_s28 + $0x670] sm:$0xff] %v2650_v0  ;;  %v2407_v57 = vadd.f32 %v5877_v12, %v6328_v7  ;;  %v2408_v28 = vadd.f32 %v5877_v12, %v6329_v31  ;;  %2861 = vst [vmem:[%s5489_s28 + $0x678] sm:$0xff] %v2651_v18  ;;  %v2612_v62 = vmax.f32 %v2402_v61, 0.0  ;;  %v2613_v11 = vmax.f32 %v2403_v1, 0.0  ;;  %v6331_v12 = vld [vmem:[#allocation137_spill] sm:$0xff]  ;;  %v6334_v23 = vld [vmem:[#allocation140_spill] sm:$0xff] }
 0x2eb   : > { %2862 = vst [vmem:[%s5489_s28 + $0x680] sm:$0xff] %v2652_v38  ;;  %2863 = vst.msk [vmem:[%s5489_s28 + $0x688] sm:$0xff] %vm438_vm0, %v2653_v63  ;;  %v2614_v34 = vmax.f32 %v2404_v46, 0.0  ;;  %v2416_v20 = vadd.f32 %v2217_v5, %v6330_v30  ;;  %v2615_v4 = vmax.f32 %v2405_v13, 0.0  ;;  %v2616_v53 = vmax.f32 %v2406_v3, 0.0  ;;  %v6336_v59 = vld [vmem:[#allocation144_spill] sm:$0xff] }
 0x2ec   : > { %v2617_v9 = vmax.f32 %v2407_v57, 0.0  ;;  %v2618_v40 = vmax.f32 %v2408_v28, 0.0  ;;  %2822 = vst [vmem:[%s5489_s28 + $0x540] sm:$0xff] %v2612_v62  ;;  %2823 = vst [vmem:[%s5489_s28 + $0x548] sm:$0xff] %v2613_v11  ;;  %v2417_v50 = vadd.f32 %v2217_v5, %v6331_v12  ;;  %v2418_v35 = vadd.f32 %v2217_v5, %v6332_v52  ;;  %v6337_v14 = vld [vmem:[#allocation149_spill] sm:$0xff]  ;;  %v6338_v32 = vld [vmem:[#allocation150_spill] sm:$0xff] }
 0x2ed   : > { %2824 = vst [vmem:[%s5489_s28 + $0x550] sm:$0xff] %v2614_v34  ;;  %v2419_v56 = vadd.f32 %v2217_v5, %v6333_v51  ;;  %v2420_v44 = vadd.f32 %v2217_v5, %v6334_v23  ;;  %2825 = vst [vmem:[%s5489_s28 + $0x558] sm:$0xff] %v2615_v4  ;;  %v2421_v45 = vadd.f32 %v2217_v5, %v6335_v21  ;;  %v2626_v39 = vmax.f32 %v2416_v20, 0.0  ;;  %v6341_v22 = vld [vmem:[#allocation153_spill] sm:$0xff]  ;;  %v6342_v33 = vld [vmem:[#allocation154_spill] sm:$0xff] }
 0x2ee   : > { %2826 = vst [vmem:[%s5489_s28 + $0x560] sm:$0xff] %v2616_v53  ;;  %2827 = vst [vmem:[%s5489_s28 + $0x568] sm:$0xff] %v2617_v9  ;;  %v2422_v27 = vadd.f32 %v2217_v5, %v6336_v59  ;;  %v2430_v16 = vadd.f32 %v2227_v43, %v5451_v36  ;;  %v2627_v26 = vmax.f32 %v2417_v50, 0.0  ;;  %v2628_v19 = vmax.f32 %v2418_v35, 0.0  ;;  %v6339_v36 = vld [vmem:[#allocation151_spill] sm:$0xff]  ;;  %v6340_v5 = vld [vmem:[#allocation152_spill] sm:$0xff] }
 0x2ef   : > { %2828 = vst.msk [vmem:[%s5489_s28 + $0x570] sm:$0xff] %vm438_vm0, %v2618_v40  ;;  %v2629_v55 = vmax.f32 %v2419_v56, 0.0  ;;  %v2630_v10 = vmax.f32 %v2420_v44, 0.0  ;;  %v2631_v29 = vmax.f32 %v2421_v45, 0.0  ;;  %2836 = vst [vmem:[%s5489_s28 + $0x5b0] sm:$0xff] %v2626_v39  ;;  %v2431_v47 = vadd.f32 %v2227_v43, %v6337_v14 }
 0x2f0   : > { %v2632_v24 = vmax.f32 %v2422_v27, 0.0  ;;  %v2432_v2 = vadd.f32 %v2227_v43, %v6338_v32  ;;  %2837 = vst [vmem:[%s5489_s28 + $0x5b8] sm:$0xff] %v2627_v26  ;;  %2838 = vst [vmem:[%s5489_s28 + $0x5c0] sm:$0xff] %v2628_v19  ;;  %v2433_v58 = vadd.f32 %v2227_v43, %v6339_v36  ;;  %v2434_v49 = vadd.f32 %v2227_v43, %v6340_v5 }
 0x2f1   : > { %2839 = vst [vmem:[%s5489_s28 + $0x5c8] sm:$0xff] %v2629_v55  ;;  %2840 = vst [vmem:[%s5489_s28 + $0x5d0] sm:$0xff] %v2630_v10  ;;  %v2435_v37 = vadd.f32 %v2227_v43, %v6341_v22  ;;  %v2436_v61 = vadd.f32 %v2227_v43, %v6342_v33  ;;  %v2640_v15 = vmax.f32 %v2430_v16, 0.0  ;;  %v2641_v42 = vmax.f32 %v2431_v47, 0.0 }
 0x2f2   : > { %2841 = vst [vmem:[%s5489_s28 + $0x5d8] sm:$0xff] %v2631_v29  ;;  %2842 = vst.msk [vmem:[%s5489_s28 + $0x5e0] sm:$0xff] %vm438_vm0, %v2632_v24  ;;  %v2642_v8 = vmax.f32 %v2432_v2, 0.0  ;;  %v2643_v6 = vmax.f32 %v2433_v58, 0.0  ;;  %v2644_v60 = vmax.f32 %v2434_v49, 0.0 }
 0x2f3   : > { %v2645_v54 = vmax.f32 %v2435_v37, 0.0  ;;  %v2646_v0 = vmax.f32 %v2436_v61, 0.0  ;;  %2850 = vst [vmem:[%s5489_s28 + $0x620] sm:$0xff] %v2640_v15  ;;  %2851 = vst [vmem:[%s5489_s28 + $0x628] sm:$0xff] %v2641_v42 }
 0x2f4   : > { %2852 = vst [vmem:[%s5489_s28 + $0x630] sm:$0xff] %v2642_v8  ;;  %2853 = vst [vmem:[%s5489_s28 + $0x638] sm:$0xff] %v2643_v6 }
 0x2f5   : > { %2854 = vst [vmem:[%s5489_s28 + $0x640] sm:$0xff] %v2644_v60  ;;  %2855 = vst [vmem:[%s5489_s28 + $0x648] sm:$0xff] %v2645_v54 }
 0x2f6   : > { %2856 = vst.msk [vmem:[%s5489_s28 + $0x650] sm:$0xff] %vm438_vm0, %v2646_v0 }
 0x2f7 PF: > { %s13_s12 = sadd.s32 1, %s3418_s12  }
 0x2f8   : > { %p10_p4 = scmp.ge.s32.totalorder %s13_s12, 4  }
 0x2fa   :  { %12 = sbr.rel (!%p10_p4) target bundleno = 1 (0x1), region = 68 }

</bundles_post_ra>
